<compile_context>
chip_gen: v7x
topology: tpu7x:2x2x1
jax: 0.10.0
libtpu: 0.0.40
codegen_flags: <defaults>
</compile_context>

<pallas_src>
import numpy as np
import jax
import jax.numpy as jnp
from jax import lax
from jax.experimental import pallas as pl
from jax.experimental.pallas import tpu as pltpu  # noqa: F401  (kept for memory-space/params use at scale)

# ----- T5 config (small, deterministic synthetic weights) -----
VOCAB = 64
D_MODEL = 32
N_HEADS = 4
D_KV = 8
INNER = N_HEADS * D_KV          # 32
D_FF = 64
N_LAYERS = 2
NUM_BUCKETS = 32
MAX_DISTANCE = 128
PAD_IDX = 0
LN_EPS = 1e-6
# -1e9 (not dtype-min) as additive key-padding bias: exp underflows to exactly 0 for
# masked keys. For a row whose keys are ALL padding this yields uniform attention over
# pad keys instead of HF's dtype-min behavior; acceptable (such rows are fully padded).
NEG_INF = -1e9


# ---------------- fused Pallas kernel ----------------
def _rmsnorm(x, w):
    # T5LayerNorm: no mean subtraction, no bias. f32 math (EUP rsqrt).
    var = jnp.mean(x * x, axis=-1, keepdims=True)
    return x * lax.rsqrt(var + LN_EPS) * w


def _t5_encoder_stack_kernel(ids_ref, x_ref, posb_ref,
                             ln1_ref, wq_ref, wk_ref, wv_ref, wo_ref,
                             ln2_ref, wi_ref, wff_ref, lnf_ref,
                             o_ref):
    B, T = ids_ref.shape
    N, D = x_ref.shape                      # N = B*T, flat token axis
    L, H, _, K = wq_ref.shape

    x = x_ref[...]                          # (N, D) f32 resident hidden state
    posb = posb_ref[...]                    # (H, T, T) f32 rel-pos bias (shared by layers)
    # Additive key-padding bias built in-kernel from the ids (B, T) -> f32.
    mask_bias = jnp.where(ids_ref[...] == PAD_IDX,
                          jnp.float32(NEG_INF), jnp.float32(0.0))

    for l in range(L):                      # static unroll over layers
        # ----- self-attention sub-layer (pre-RMSNorm, T5: no 1/sqrt(d) scaling) -----
        y = _rmsnorm(x, ln1_ref[l])         # (N, D) f32
        yb = y.astype(jnp.bfloat16)         # bf16 MXU operand
        wq, wk, wv, wo = wq_ref[l], wk_ref[l], wv_ref[l], wo_ref[l]   # bf16, resident

        attn_rows = []
        for b in range(B):                  # static unroll over batch rows
            # heads on the leading (major) axis -> batched dot_generals, no lane slicing
            y_h = jnp.broadcast_to(yb[b * T:(b + 1) * T, :], (H, T, D))    # (H,T,D) bf16
            q = jnp.einsum('htd,hdk->htk', y_h, wq,
                           preferred_element_type=jnp.float32)             # (H,T,K)
            k = jnp.einsum('htd,hdk->htk', y_h, wk,
                           preferred_element_type=jnp.float32)
            v = jnp.einsum('htd,hdk->htk', y_h, wv,
                           preferred_element_type=jnp.float32)
            # scores over all heads at once: (H,T,T)
            s = jnp.einsum('hik,hjk->hij',
                           q.astype(jnp.bfloat16), k.astype(jnp.bfloat16),
                           preferred_element_type=jnp.float32)
            s = s + posb + mask_bias[b:b + 1][None]        # + (1,1,T) key-pad bias
            # f32 softmax, exact division (no approx reciprocal)
            s = s - jnp.max(s, axis=-1, keepdims=True)
            p = jnp.exp(s)
            p = p / jnp.sum(p, axis=-1, keepdims=True)
            ctx = jnp.einsum('hij,hjk->hik',
                             p.astype(jnp.bfloat16), v.astype(jnp.bfloat16),
                             preferred_element_type=jnp.float32)           # (H,T,K)
            # per-head output projection, then sum over the leading head axis
            oh = jnp.einsum('htk,hkd->htd',
                            ctx.astype(jnp.bfloat16), wo,
                            preferred_element_type=jnp.float32)            # (H,T,D)
            attn_rows.append(jnp.sum(oh, axis=0))                          # (T, D)
        x = x + jnp.concatenate(attn_rows, axis=0)                         # (N, D)

        # ----- ReLU FFN sub-layer (DenseReluDense, no biases; dropout = eval no-op) -----
        y = _rmsnorm(x, ln2_ref[l]).astype(jnp.bfloat16)                   # (N, D) bf16
        hmid = jnp.maximum(
            jnp.dot(y, wi_ref[l], preferred_element_type=jnp.float32), 0.0)  # (N, F) f32
        x = x + jnp.dot(hmid.astype(jnp.bfloat16), wff_ref[l],
                        preferred_element_type=jnp.float32)                # (N, D)

    # ----- final RMSNorm, single store of the whole output block -----
    o_ref[...] = _rmsnorm(x, lnf_ref[...])


# ---------------- host-side glue (plain JAX) ----------------
def _relative_position_bucket(relative_position,
                              num_buckets=NUM_BUCKETS, max_distance=MAX_DISTANCE):
    # Encoder self-attention: bidirectional=True (HF T5 semantics).
    num_buckets = num_buckets // 2
    relative_buckets = jnp.where(relative_position > 0, num_buckets, 0).astype(jnp.int32)
    rp = jnp.abs(relative_position)
    max_exact = num_buckets // 2
    is_small = rp < max_exact
    rpf = jnp.maximum(rp, 1).astype(jnp.float32)
    rel_if_large = max_exact + (
        jnp.log(rpf / max_exact) / np.log(max_distance / max_exact)
        * (num_buckets - max_exact)
    ).astype(jnp.int32)
    rel_if_large = jnp.minimum(rel_if_large, num_buckets - 1)
    return relative_buckets + jnp.where(is_small, rp, rel_if_large)


def compute_position_bias(rel_attn_bias, q_len, k_len):
    context_position = jnp.arange(q_len, dtype=jnp.int32)[:, None]
    memory_position = jnp.arange(k_len, dtype=jnp.int32)[None, :]
    relative_position = memory_position - context_position
    buckets = _relative_position_bucket(relative_position)        # (q, k)
    values = jnp.take(rel_attn_bias, buckets, axis=0)              # (q, k, H)
    return values.transpose(2, 0, 1).astype(jnp.float32)           # (H, q, k)


def parlai_t5_encoder_forward(params, input_ids):
    """Mirrors ParlaiT5Encoder.forward: input ids -> (hidden_states, mask)."""
    B, T = input_ids.shape
    mask = input_ids != PAD_IDX                                    # (B, T) bool

    # Embedding lookup + rel-pos bucket table stay host-side glue (gather / int-log math).
    x = jnp.take(params['embed'], input_ids, axis=0).astype(jnp.float32)   # (B, T, D)
    x_flat = x.reshape(B * T, D_MODEL)                                      # free on host
    pos_bias = compute_position_bias(params['rel_attn_bias'], T, T)         # (H, T, T)

    hidden_flat = pl.pallas_call(
        _t5_encoder_stack_kernel,
        # grid=() : single invocation, everything resident in VMEM (total ~50 KB)
        out_shape=jax.ShapeDtypeStruct((B * T, D_MODEL), jnp.float32),
    )(input_ids.astype(jnp.int32), x_flat, pos_bias,
      params['ln1'], params['wq'], params['wk'], params['wv'], params['wo'],
      params['ln2'], params['wi'], params['wff'], params['final_ln'])

    return hidden_flat.reshape(B, T, D_MODEL), mask


def init_params(key):
    ks = jax.random.split(key, 8)

    def nrm(k, shape, scale=0.02, dtype=jnp.float32):
        return (scale * jax.random.normal(k, shape, dtype=jnp.float32)).astype(dtype)

    return {
        'embed': nrm(ks[0], (VOCAB, D_MODEL)),                                 # f32
        'rel_attn_bias': nrm(ks[1], (NUM_BUCKETS, N_HEADS)),                   # f32
        'ln1': jnp.ones((N_LAYERS, 1, D_MODEL), jnp.float32),
        # head-major, bf16 MXU operands
        'wq': nrm(ks[2], (N_LAYERS, N_HEADS, D_MODEL, D_KV), dtype=jnp.bfloat16),
        'wk': nrm(ks[3], (N_LAYERS, N_HEADS, D_MODEL, D_KV), dtype=jnp.bfloat16),
        'wv': nrm(ks[4], (N_LAYERS, N_HEADS, D_MODEL, D_KV), dtype=jnp.bfloat16),
        'wo': nrm(ks[5], (N_LAYERS, N_HEADS, D_KV, D_MODEL), dtype=jnp.bfloat16),
        'ln2': jnp.ones((N_LAYERS, 1, D_MODEL), jnp.float32),
        'wi': nrm(ks[6], (N_LAYERS, D_MODEL, D_FF), dtype=jnp.bfloat16),
        'wff': nrm(ks[7], (N_LAYERS, D_FF, D_MODEL), dtype=jnp.bfloat16),
        'final_ln': jnp.ones((1, D_MODEL), jnp.float32),
    }


if __name__ == "__main__":
    key = jax.random.PRNGKey(0)
    k_param, k_in = jax.random.split(key, 2)
    params = init_params(k_param)

    B, T = 2, 16
    input_ids = jax.random.randint(k_in, (B, T), 1, VOCAB, dtype=jnp.int32)
    input_ids = input_ids.at[1, -4:].set(PAD_IDX)   # some padding in example 1

    fwd = jax.jit(parlai_t5_encoder_forward)
    hidden, mask = fwd(params, input_ids)
    hidden = jax.block_until_ready(hidden)

    assert hidden.shape == (B, T, D_MODEL)
    assert mask.shape == (B, T) and mask.dtype == jnp.bool_
    assert bool(jnp.all(jnp.isfinite(hidden)))
    print("KERNEL_OK")
</pallas_src>

<mosaic_0001>
module attributes {stable_mosaic.version = 11 : i64} {
  func.func @_t5_encoder_stack_kernel(%arg0: memref<2x16xi32, #tpu.memory_space<vmem>>, %arg1: memref<32x32xf32, #tpu.memory_space<vmem>>, %arg2: memref<4x16x16xf32, #tpu.memory_space<vmem>>, %arg3: memref<2x1x32xf32, #tpu.memory_space<vmem>>, %arg4: memref<2x4x32x8xbf16, #tpu.memory_space<vmem>>, %arg5: memref<2x4x32x8xbf16, #tpu.memory_space<vmem>>, %arg6: memref<2x4x32x8xbf16, #tpu.memory_space<vmem>>, %arg7: memref<2x4x8x32xbf16, #tpu.memory_space<vmem>>, %arg8: memref<2x1x32xf32, #tpu.memory_space<vmem>>, %arg9: memref<2x32x64xbf16, #tpu.memory_space<vmem>>, %arg10: memref<2x64x32xbf16, #tpu.memory_space<vmem>>, %arg11: memref<1x32xf32, #tpu.memory_space<vmem>>, %arg12: memref<32x32xf32, #tpu.memory_space<vmem>>) attributes {dimension_semantics = [], scalar_prefetch = 0 : i64, scratch_operands = 0 : i64, tpu.core_type = #tpu.core_type<tc>} {
    %c0 = arith.constant 0 : index
    %c0_0 = arith.constant 0 : index
    %0 = vector.load %arg1[%c0, %c0_0] : memref<32x32xf32, #tpu.memory_space<vmem>>, vector<32x32xf32>
    %c0_1 = arith.constant 0 : index
    %c0_2 = arith.constant 0 : index
    %c0_3 = arith.constant 0 : index
    %1 = vector.load %arg2[%c0_1, %c0_2, %c0_3] : memref<4x16x16xf32, #tpu.memory_space<vmem>>, vector<4x16x16xf32>
    %c0_4 = arith.constant 0 : index
    %c0_5 = arith.constant 0 : index
    %2 = vector.load %arg0[%c0_4, %c0_5] : memref<2x16xi32, #tpu.memory_space<vmem>>, vector<2x16xi32>
    %c0_i32 = arith.constant 0 : i32
    %3 = vector.broadcast %c0_i32 : i32 to vector<2x16xi32>
    %4 = arith.cmpi eq, %2, %3 : vector<2x16xi32>
    %cst = arith.constant -1.000000e+09 : f32
    %cst_6 = arith.constant 0.000000e+00 : f32
    %5 = vector.broadcast %cst : f32 to vector<2x16xf32>
    %6 = vector.broadcast %cst_6 : f32 to vector<2x16xf32>
    %7 = arith.select %4, %5, %6 : vector<2x16xi1>, vector<2x16xf32>
    %c0_7 = arith.constant 0 : index
    %c0_8 = arith.constant 0 : index
    %c0_9 = arith.constant 0 : index
    %8 = vector.load %arg3[%c0_7, %c0_8, %c0_9] : memref<2x1x32xf32, #tpu.memory_space<vmem>>, vector<1x1x32xf32>
    %9 = vector.shape_cast %8 : vector<1x1x32xf32> to vector<1x32xf32>
    %10 = arith.mulf %0, %0 : vector<32x32xf32>
    %cst_10 = arith.constant dense<0.000000e+00> : vector<32xf32>
    %11 = vector.multi_reduction <add>, %10, %cst_10 [1] : vector<32x32xf32> to vector<32xf32>
    %12 = vector.shape_cast %11 : vector<32xf32> to vector<32x1xf32>
    %cst_11 = arith.constant 3.200000e+01 : f32
    %13 = vector.broadcast %cst_11 : f32 to vector<32x1xf32>
    %14 = arith.divf %12, %13 : vector<32x1xf32>
    %cst_12 = arith.constant 9.99999997E-7 : f32
    %15 = vector.broadcast %cst_12 : f32 to vector<32x1xf32>
    %16 = arith.addf %14, %15 : vector<32x1xf32>
    %17 = math.rsqrt %16 : vector<32x1xf32>
    %18 = vector.broadcast %17 : vector<32x1xf32> to vector<32x32xf32>
    %19 = arith.mulf %0, %18 : vector<32x32xf32>
    %20 = vector.broadcast %9 : vector<1x32xf32> to vector<32x32xf32>
    %21 = arith.mulf %19, %20 : vector<32x32xf32>
    %22 = arith.truncf %21 : vector<32x32xf32> to vector<32x32xbf16>
    %c0_13 = arith.constant 0 : index
    %c0_14 = arith.constant 0 : index
    %c0_15 = arith.constant 0 : index
    %c0_16 = arith.constant 0 : index
    %23 = vector.load %arg4[%c0_13, %c0_14, %c0_15, %c0_16] : memref<2x4x32x8xbf16, #tpu.memory_space<vmem>>, vector<1x4x32x8xbf16>
    %24 = vector.shape_cast %23 : vector<1x4x32x8xbf16> to vector<4x32x8xbf16>
    %c0_17 = arith.constant 0 : index
    %c0_18 = arith.constant 0 : index
    %c0_19 = arith.constant 0 : index
    %c0_20 = arith.constant 0 : index
    %25 = vector.load %arg5[%c0_17, %c0_18, %c0_19, %c0_20] : memref<2x4x32x8xbf16, #tpu.memory_space<vmem>>, vector<1x4x32x8xbf16>
    %26 = vector.shape_cast %25 : vector<1x4x32x8xbf16> to vector<4x32x8xbf16>
    %c0_21 = arith.constant 0 : index
    %c0_22 = arith.constant 0 : index
    %c0_23 = arith.constant 0 : index
    %c0_24 = arith.constant 0 : index
    %27 = vector.load %arg6[%c0_21, %c0_22, %c0_23, %c0_24] : memref<2x4x32x8xbf16, #tpu.memory_space<vmem>>, vector<1x4x32x8xbf16>
    %28 = vector.shape_cast %27 : vector<1x4x32x8xbf16> to vector<4x32x8xbf16>
    %c0_25 = arith.constant 0 : index
    %c0_26 = arith.constant 0 : index
    %c0_27 = arith.constant 0 : index
    %c0_28 = arith.constant 0 : index
    %29 = vector.load %arg7[%c0_25, %c0_26, %c0_27, %c0_28] : memref<2x4x8x32xbf16, #tpu.memory_space<vmem>>, vector<1x4x8x32xbf16>
    %30 = vector.shape_cast %29 : vector<1x4x8x32xbf16> to vector<4x8x32xbf16>
    %31 = vector.extract_strided_slice %22 {offsets = [0, 0], sizes = [16, 32], strides = [1, 1]} : vector<32x32xbf16> to vector<16x32xbf16>
    %32 = vector.shape_cast %31 : vector<16x32xbf16> to vector<1x16x32xbf16>
    %33 = vector.broadcast %32 : vector<1x16x32xbf16> to vector<4x16x32xbf16>
    "tpu.trace_start"() <{level = 10 : i32, message = "htd,hdk->htk"}> : () -> ()
    %cst_29 = arith.constant dense<0.000000e+00> : vector<4x16x8xf32>
    %34 = tpu.matmul %33, %24, %cst_29 {dimension_numbers = #tpu.dot_dimension_numbers<[2], [1], [1], [2], [0, 0, 0, 1, 1, 2], [0], [0]>} : vector<4x16x32xbf16>, vector<4x32x8xbf16>, vector<4x16x8xf32> -> vector<4x16x8xf32>
    %cst_30 = arith.constant dense<0.000000e+00> : vector<4x16x8xf32>
    %35 = tpu.matmul %33, %26, %cst_30 {dimension_numbers = #tpu.dot_dimension_numbers<[2], [1], [1], [2], [0, 0, 0, 1, 1, 2], [0], [0]>} : vector<4x16x32xbf16>, vector<4x32x8xbf16>, vector<4x16x8xf32> -> vector<4x16x8xf32>
    %cst_31 = arith.constant dense<0.000000e+00> : vector<4x16x8xf32>
    %36 = tpu.matmul %33, %28, %cst_31 {dimension_numbers = #tpu.dot_dimension_numbers<[2], [1], [1], [2], [0, 0, 0, 1, 1, 2], [0], [0]>} : vector<4x16x32xbf16>, vector<4x32x8xbf16>, vector<4x16x8xf32> -> vector<4x16x8xf32>
    "tpu.trace_stop"() : () -> ()
    %37 = arith.truncf %34 : vector<4x16x8xf32> to vector<4x16x8xbf16>
    %38 = arith.truncf %35 : vector<4x16x8xf32> to vector<4x16x8xbf16>
    "tpu.trace_start"() <{level = 10 : i32, message = "hik,hjk->hij"}> : () -> ()
    %cst_32 = arith.constant dense<0.000000e+00> : vector<4x16x16xf32>
    %39 = tpu.matmul %37, %38, %cst_32 {dimension_numbers = #tpu.dot_dimension_numbers<[2], [2], [1], [1], [0, 0, 0, 1, 1, 1], [0], [0]>} : vector<4x16x8xbf16>, vector<4x16x8xbf16>, vector<4x16x16xf32> -> vector<4x16x16xf32>
    "tpu.trace_stop"() : () -> ()
    %40 = arith.addf %39, %1 : vector<4x16x16xf32>
    %41 = vector.extract_strided_slice %7 {offsets = [0, 0], sizes = [1, 16], strides = [1, 1]} : vector<2x16xf32> to vector<1x16xf32>
    %42 = vector.shape_cast %41 : vector<1x16xf32> to vector<1x1x16xf32>
    %43 = vector.broadcast %42 : vector<1x1x16xf32> to vector<4x16x16xf32>
    %44 = arith.addf %40, %43 : vector<4x16x16xf32>
    %cst_33 = arith.constant dense<0xFF800000> : vector<4x16xf32>
    %45 = vector.multi_reduction <maximumf>, %44, %cst_33 [2] : vector<4x16x16xf32> to vector<4x16xf32>
    %46 = vector.shape_cast %45 : vector<4x16xf32> to vector<4x16x1xf32>
    %47 = vector.broadcast %46 : vector<4x16x1xf32> to vector<4x16x16xf32>
    %48 = arith.subf %44, %47 : vector<4x16x16xf32>
    %49 = math.exp %48 : vector<4x16x16xf32>
    %cst_34 = arith.constant dense<0.000000e+00> : vector<4x16xf32>
    %50 = vector.multi_reduction <add>, %49, %cst_34 [2] : vector<4x16x16xf32> to vector<4x16xf32>
    %51 = vector.shape_cast %50 : vector<4x16xf32> to vector<4x16x1xf32>
    %52 = vector.broadcast %51 : vector<4x16x1xf32> to vector<4x16x16xf32>
    %53 = arith.divf %49, %52 : vector<4x16x16xf32>
    %54 = arith.truncf %53 : vector<4x16x16xf32> to vector<4x16x16xbf16>
    %55 = arith.truncf %36 : vector<4x16x8xf32> to vector<4x16x8xbf16>
    "tpu.trace_start"() <{level = 10 : i32, message = "hij,hjk->hik"}> : () -> ()
    %cst_35 = arith.constant dense<0.000000e+00> : vector<4x16x8xf32>
    %56 = tpu.matmul %54, %55, %cst_35 {dimension_numbers = #tpu.dot_dimension_numbers<[2], [1], [1], [2], [0, 0, 0, 1, 1, 2], [0], [0]>} : vector<4x16x16xbf16>, vector<4x16x8xbf16>, vector<4x16x8xf32> -> vector<4x16x8xf32>
    "tpu.trace_stop"() : () -> ()
    %57 = arith.truncf %56 : vector<4x16x8xf32> to vector<4x16x8xbf16>
    "tpu.trace_start"() <{level = 10 : i32, message = "htk,hkd->htd"}> : () -> ()
    %cst_36 = arith.constant dense<0.000000e+00> : vector<4x16x32xf32>
    %58 = tpu.matmul %57, %30, %cst_36 {dimension_numbers = #tpu.dot_dimension_numbers<[2], [1], [1], [2], [0, 0, 0, 1, 1, 2], [0], [0]>} : vector<4x16x8xbf16>, vector<4x8x32xbf16>, vector<4x16x32xf32> -> vector<4x16x32xf32>
    "tpu.trace_stop"() : () -> ()
    %cst_37 = arith.constant dense<0.000000e+00> : vector<16x32xf32>
    %59 = vector.multi_reduction <add>, %58, %cst_37 [0] : vector<4x16x32xf32> to vector<16x32xf32>
    %60 = vector.extract_strided_slice %22 {offsets = [16, 0], sizes = [16, 32], strides = [1, 1]} : vector<32x32xbf16> to vector<16x32xbf16>
    %61 = vector.shape_cast %60 : vector<16x32xbf16> to vector<1x16x32xbf16>
    %62 = vector.broadcast %61 : vector<1x16x32xbf16> to vector<4x16x32xbf16>
    "tpu.trace_start"() <{level = 10 : i32, message = "htd,hdk->htk"}> : () -> ()
    %cst_38 = arith.constant dense<0.000000e+00> : vector<4x16x8xf32>
    %63 = tpu.matmul %62, %24, %cst_38 {dimension_numbers = #tpu.dot_dimension_numbers<[2], [1], [1], [2], [0, 0, 0, 1, 1, 2], [0], [0]>} : vector<4x16x32xbf16>, vector<4x32x8xbf16>, vector<4x16x8xf32> -> vector<4x16x8xf32>
    %cst_39 = arith.constant dense<0.000000e+00> : vector<4x16x8xf32>
    %64 = tpu.matmul %62, %26, %cst_39 {dimension_numbers = #tpu.dot_dimension_numbers<[2], [1], [1], [2], [0, 0, 0, 1, 1, 2], [0], [0]>} : vector<4x16x32xbf16>, vector<4x32x8xbf16>, vector<4x16x8xf32> -> vector<4x16x8xf32>
    %cst_40 = arith.constant dense<0.000000e+00> : vector<4x16x8xf32>
    %65 = tpu.matmul %62, %28, %cst_40 {dimension_numbers = #tpu.dot_dimension_numbers<[2], [1], [1], [2], [0, 0, 0, 1, 1, 2], [0], [0]>} : vector<4x16x32xbf16>, vector<4x32x8xbf16>, vector<4x16x8xf32> -> vector<4x16x8xf32>
    "tpu.trace_stop"() : () -> ()
    %66 = arith.truncf %63 : vector<4x16x8xf32> to vector<4x16x8xbf16>
    %67 = arith.truncf %64 : vector<4x16x8xf32> to vector<4x16x8xbf16>
    "tpu.trace_start"() <{level = 10 : i32, message = "hik,hjk->hij"}> : () -> ()
    %cst_41 = arith.constant dense<0.000000e+00> : vector<4x16x16xf32>
    %68 = tpu.matmul %66, %67, %cst_41 {dimension_numbers = #tpu.dot_dimension_numbers<[2], [2], [1], [1], [0, 0, 0, 1, 1, 1], [0], [0]>} : vector<4x16x8xbf16>, vector<4x16x8xbf16>, vector<4x16x16xf32> -> vector<4x16x16xf32>
    "tpu.trace_stop"() : () -> ()
    %69 = arith.addf %68, %1 : vector<4x16x16xf32>
    %70 = vector.extract_strided_slice %7 {offsets = [1, 0], sizes = [1, 16], strides = [1, 1]} : vector<2x16xf32> to vector<1x16xf32>
    %71 = vector.shape_cast %70 : vector<1x16xf32> to vector<1x1x16xf32>
    %72 = vector.broadcast %71 : vector<1x1x16xf32> to vector<4x16x16xf32>
    %73 = arith.addf %69, %72 : vector<4x16x16xf32>
    %cst_42 = arith.constant dense<0xFF800000> : vector<4x16xf32>
    %74 = vector.multi_reduction <maximumf>, %73, %cst_42 [2] : vector<4x16x16xf32> to vector<4x16xf32>
    %75 = vector.shape_cast %74 : vector<4x16xf32> to vector<4x16x1xf32>
    %76 = vector.broadcast %75 : vector<4x16x1xf32> to vector<4x16x16xf32>
    %77 = arith.subf %73, %76 : vector<4x16x16xf32>
    %78 = math.exp %77 : vector<4x16x16xf32>
    %cst_43 = arith.constant dense<0.000000e+00> : vector<4x16xf32>
    %79 = vector.multi_reduction <add>, %78, %cst_43 [2] : vector<4x16x16xf32> to vector<4x16xf32>
    %80 = vector.shape_cast %79 : vector<4x16xf32> to vector<4x16x1xf32>
    %81 = vector.broadcast %80 : vector<4x16x1xf32> to vector<4x16x16xf32>
    %82 = arith.divf %78, %81 : vector<4x16x16xf32>
    %83 = arith.truncf %82 : vector<4x16x16xf32> to vector<4x16x16xbf16>
    %84 = arith.truncf %65 : vector<4x16x8xf32> to vector<4x16x8xbf16>
    "tpu.trace_start"() <{level = 10 : i32, message = "hij,hjk->hik"}> : () -> ()
    %cst_44 = arith.constant dense<0.000000e+00> : vector<4x16x8xf32>
    %85 = tpu.matmul %83, %84, %cst_44 {dimension_numbers = #tpu.dot_dimension_numbers<[2], [1], [1], [2], [0, 0, 0, 1, 1, 2], [0], [0]>} : vector<4x16x16xbf16>, vector<4x16x8xbf16>, vector<4x16x8xf32> -> vector<4x16x8xf32>
    "tpu.trace_stop"() : () -> ()
    %86 = arith.truncf %85 : vector<4x16x8xf32> to vector<4x16x8xbf16>
    "tpu.trace_start"() <{level = 10 : i32, message = "htk,hkd->htd"}> : () -> ()
    %cst_45 = arith.constant dense<0.000000e+00> : vector<4x16x32xf32>
    %87 = tpu.matmul %86, %30, %cst_45 {dimension_numbers = #tpu.dot_dimension_numbers<[2], [1], [1], [2], [0, 0, 0, 1, 1, 2], [0], [0]>} : vector<4x16x8xbf16>, vector<4x8x32xbf16>, vector<4x16x32xf32> -> vector<4x16x32xf32>
    "tpu.trace_stop"() : () -> ()
    %cst_46 = arith.constant dense<0.000000e+00> : vector<16x32xf32>
    %88 = vector.multi_reduction <add>, %87, %cst_46 [0] : vector<4x16x32xf32> to vector<16x32xf32>
    %89 = tpu.concatenate %59, %88 in 0 : vector<16x32xf32>, vector<16x32xf32> -> vector<32x32xf32>
    %90 = arith.addf %0, %89 : vector<32x32xf32>
    %c0_47 = arith.constant 0 : index
    %c0_48 = arith.constant 0 : index
    %c0_49 = arith.constant 0 : index
    %91 = vector.load %arg8[%c0_47, %c0_48, %c0_49] : memref<2x1x32xf32, #tpu.memory_space<vmem>>, vector<1x1x32xf32>
    %92 = vector.shape_cast %91 : vector<1x1x32xf32> to vector<1x32xf32>
    %93 = arith.mulf %90, %90 : vector<32x32xf32>
    %cst_50 = arith.constant dense<0.000000e+00> : vector<32xf32>
    %94 = vector.multi_reduction <add>, %93, %cst_50 [1] : vector<32x32xf32> to vector<32xf32>
    %95 = vector.shape_cast %94 : vector<32xf32> to vector<32x1xf32>
    %cst_51 = arith.constant 3.200000e+01 : f32
    %96 = vector.broadcast %cst_51 : f32 to vector<32x1xf32>
    %97 = arith.divf %95, %96 : vector<32x1xf32>
    %cst_52 = arith.constant 9.99999997E-7 : f32
    %98 = vector.broadcast %cst_52 : f32 to vector<32x1xf32>
    %99 = arith.addf %97, %98 : vector<32x1xf32>
    %100 = math.rsqrt %99 : vector<32x1xf32>
    %101 = vector.broadcast %100 : vector<32x1xf32> to vector<32x32xf32>
    %102 = arith.mulf %90, %101 : vector<32x32xf32>
    %103 = vector.broadcast %92 : vector<1x32xf32> to vector<32x32xf32>
    %104 = arith.mulf %102, %103 : vector<32x32xf32>
    %105 = arith.truncf %104 : vector<32x32xf32> to vector<32x32xbf16>
    %c0_53 = arith.constant 0 : index
    %c0_54 = arith.constant 0 : index
    %c0_55 = arith.constant 0 : index
    %106 = vector.load %arg9[%c0_53, %c0_54, %c0_55] : memref<2x32x64xbf16, #tpu.memory_space<vmem>>, vector<1x32x64xbf16>
    %107 = vector.shape_cast %106 : vector<1x32x64xbf16> to vector<32x64xbf16>
    %cst_56 = arith.constant dense<0.000000e+00> : vector<32x64xf32>
    %108 = tpu.matmul %105, %107, %cst_56 {dimension_numbers = #tpu.dot_dimension_numbers<[1], [0], [0], [1], [0, 0, 1, 1], [], []>} : vector<32x32xbf16>, vector<32x64xbf16>, vector<32x64xf32> -> vector<32x64xf32>
    %cst_57 = arith.constant 0.000000e+00 : f32
    %109 = vector.broadcast %cst_57 : f32 to vector<32x64xf32>
    %110 = arith.maximumf %108, %109 : vector<32x64xf32>
    %111 = arith.truncf %110 : vector<32x64xf32> to vector<32x64xbf16>
    %c0_58 = arith.constant 0 : index
    %c0_59 = arith.constant 0 : index
    %c0_60 = arith.constant 0 : index
    %112 = vector.load %arg10[%c0_58, %c0_59, %c0_60] : memref<2x64x32xbf16, #tpu.memory_space<vmem>>, vector<1x64x32xbf16>
    %113 = vector.shape_cast %112 : vector<1x64x32xbf16> to vector<64x32xbf16>
    %cst_61 = arith.constant dense<0.000000e+00> : vector<32x32xf32>
    %114 = tpu.matmul %111, %113, %cst_61 {dimension_numbers = #tpu.dot_dimension_numbers<[1], [0], [0], [1], [0, 0, 1, 1], [], []>} : vector<32x64xbf16>, vector<64x32xbf16>, vector<32x32xf32> -> vector<32x32xf32>
    %115 = arith.addf %90, %114 : vector<32x32xf32>
    %c1 = arith.constant 1 : index
    %c0_62 = arith.constant 0 : index
    %c0_63 = arith.constant 0 : index
    %116 = vector.load %arg3[%c1, %c0_62, %c0_63] : memref<2x1x32xf32, #tpu.memory_space<vmem>>, vector<1x1x32xf32>
    %117 = vector.shape_cast %116 : vector<1x1x32xf32> to vector<1x32xf32>
    %118 = arith.mulf %115, %115 : vector<32x32xf32>
    %cst_64 = arith.constant dense<0.000000e+00> : vector<32xf32>
    %119 = vector.multi_reduction <add>, %118, %cst_64 [1] : vector<32x32xf32> to vector<32xf32>
    %120 = vector.shape_cast %119 : vector<32xf32> to vector<32x1xf32>
    %cst_65 = arith.constant 3.200000e+01 : f32
    %121 = vector.broadcast %cst_65 : f32 to vector<32x1xf32>
    %122 = arith.divf %120, %121 : vector<32x1xf32>
    %cst_66 = arith.constant 9.99999997E-7 : f32
    %123 = vector.broadcast %cst_66 : f32 to vector<32x1xf32>
    %124 = arith.addf %122, %123 : vector<32x1xf32>
    %125 = math.rsqrt %124 : vector<32x1xf32>
    %126 = vector.broadcast %125 : vector<32x1xf32> to vector<32x32xf32>
    %127 = arith.mulf %115, %126 : vector<32x32xf32>
    %128 = vector.broadcast %117 : vector<1x32xf32> to vector<32x32xf32>
    %129 = arith.mulf %127, %128 : vector<32x32xf32>
    %130 = arith.truncf %129 : vector<32x32xf32> to vector<32x32xbf16>
    %c1_67 = arith.constant 1 : index
    %c0_68 = arith.constant 0 : index
    %c0_69 = arith.constant 0 : index
    %c0_70 = arith.constant 0 : index
    %131 = vector.load %arg4[%c1_67, %c0_68, %c0_69, %c0_70] : memref<2x4x32x8xbf16, #tpu.memory_space<vmem>>, vector<1x4x32x8xbf16>
    %132 = vector.shape_cast %131 : vector<1x4x32x8xbf16> to vector<4x32x8xbf16>
    %c1_71 = arith.constant 1 : index
    %c0_72 = arith.constant 0 : index
    %c0_73 = arith.constant 0 : index
    %c0_74 = arith.constant 0 : index
    %133 = vector.load %arg5[%c1_71, %c0_72, %c0_73, %c0_74] : memref<2x4x32x8xbf16, #tpu.memory_space<vmem>>, vector<1x4x32x8xbf16>
    %134 = vector.shape_cast %133 : vector<1x4x32x8xbf16> to vector<4x32x8xbf16>
    %c1_75 = arith.constant 1 : index
    %c0_76 = arith.constant 0 : index
    %c0_77 = arith.constant 0 : index
    %c0_78 = arith.constant 0 : index
    %135 = vector.load %arg6[%c1_75, %c0_76, %c0_77, %c0_78] : memref<2x4x32x8xbf16, #tpu.memory_space<vmem>>, vector<1x4x32x8xbf16>
    %136 = vector.shape_cast %135 : vector<1x4x32x8xbf16> to vector<4x32x8xbf16>
    %c1_79 = arith.constant 1 : index
    %c0_80 = arith.constant 0 : index
    %c0_81 = arith.constant 0 : index
    %c0_82 = arith.constant 0 : index
    %137 = vector.load %arg7[%c1_79, %c0_80, %c0_81, %c0_82] : memref<2x4x8x32xbf16, #tpu.memory_space<vmem>>, vector<1x4x8x32xbf16>
    %138 = vector.shape_cast %137 : vector<1x4x8x32xbf16> to vector<4x8x32xbf16>
    %139 = vector.extract_strided_slice %130 {offsets = [0, 0], sizes = [16, 32], strides = [1, 1]} : vector<32x32xbf16> to vector<16x32xbf16>
    %140 = vector.shape_cast %139 : vector<16x32xbf16> to vector<1x16x32xbf16>
    %141 = vector.broadcast %140 : vector<1x16x32xbf16> to vector<4x16x32xbf16>
    "tpu.trace_start"() <{level = 10 : i32, message = "htd,hdk->htk"}> : () -> ()
    %cst_83 = arith.constant dense<0.000000e+00> : vector<4x16x8xf32>
    %142 = tpu.matmul %141, %132, %cst_83 {dimension_numbers = #tpu.dot_dimension_numbers<[2], [1], [1], [2], [0, 0, 0, 1, 1, 2], [0], [0]>} : vector<4x16x32xbf16>, vector<4x32x8xbf16>, vector<4x16x8xf32> -> vector<4x16x8xf32>
    %cst_84 = arith.constant dense<0.000000e+00> : vector<4x16x8xf32>
    %143 = tpu.matmul %141, %134, %cst_84 {dimension_numbers = #tpu.dot_dimension_numbers<[2], [1], [1], [2], [0, 0, 0, 1, 1, 2], [0], [0]>} : vector<4x16x32xbf16>, vector<4x32x8xbf16>, vector<4x16x8xf32> -> vector<4x16x8xf32>
    %cst_85 = arith.constant dense<0.000000e+00> : vector<4x16x8xf32>
    %144 = tpu.matmul %141, %136, %cst_85 {dimension_numbers = #tpu.dot_dimension_numbers<[2], [1], [1], [2], [0, 0, 0, 1, 1, 2], [0], [0]>} : vector<4x16x32xbf16>, vector<4x32x8xbf16>, vector<4x16x8xf32> -> vector<4x16x8xf32>
    "tpu.trace_stop"() : () -> ()
    %145 = arith.truncf %142 : vector<4x16x8xf32> to vector<4x16x8xbf16>
    %146 = arith.truncf %143 : vector<4x16x8xf32> to vector<4x16x8xbf16>
    "tpu.trace_start"() <{level = 10 : i32, message = "hik,hjk->hij"}> : () -> ()
    %cst_86 = arith.constant dense<0.000000e+00> : vector<4x16x16xf32>
    %147 = tpu.matmul %145, %146, %cst_86 {dimension_numbers = #tpu.dot_dimension_numbers<[2], [2], [1], [1], [0, 0, 0, 1, 1, 1], [0], [0]>} : vector<4x16x8xbf16>, vector<4x16x8xbf16>, vector<4x16x16xf32> -> vector<4x16x16xf32>
    "tpu.trace_stop"() : () -> ()
    %148 = arith.addf %147, %1 : vector<4x16x16xf32>
    %149 = vector.extract_strided_slice %7 {offsets = [0, 0], sizes = [1, 16], strides = [1, 1]} : vector<2x16xf32> to vector<1x16xf32>
    %150 = vector.shape_cast %149 : vector<1x16xf32> to vector<1x1x16xf32>
    %151 = vector.broadcast %150 : vector<1x1x16xf32> to vector<4x16x16xf32>
    %152 = arith.addf %148, %151 : vector<4x16x16xf32>
    %cst_87 = arith.constant dense<0xFF800000> : vector<4x16xf32>
    %153 = vector.multi_reduction <maximumf>, %152, %cst_87 [2] : vector<4x16x16xf32> to vector<4x16xf32>
    %154 = vector.shape_cast %153 : vector<4x16xf32> to vector<4x16x1xf32>
    %155 = vector.broadcast %154 : vector<4x16x1xf32> to vector<4x16x16xf32>
    %156 = arith.subf %152, %155 : vector<4x16x16xf32>
    %157 = math.exp %156 : vector<4x16x16xf32>
    %cst_88 = arith.constant dense<0.000000e+00> : vector<4x16xf32>
    %158 = vector.multi_reduction <add>, %157, %cst_88 [2] : vector<4x16x16xf32> to vector<4x16xf32>
    %159 = vector.shape_cast %158 : vector<4x16xf32> to vector<4x16x1xf32>
    %160 = vector.broadcast %159 : vector<4x16x1xf32> to vector<4x16x16xf32>
    %161 = arith.divf %157, %160 : vector<4x16x16xf32>
    %162 = arith.truncf %161 : vector<4x16x16xf32> to vector<4x16x16xbf16>
    %163 = arith.truncf %144 : vector<4x16x8xf32> to vector<4x16x8xbf16>
    "tpu.trace_start"() <{level = 10 : i32, message = "hij,hjk->hik"}> : () -> ()
    %cst_89 = arith.constant dense<0.000000e+00> : vector<4x16x8xf32>
    %164 = tpu.matmul %162, %163, %cst_89 {dimension_numbers = #tpu.dot_dimension_numbers<[2], [1], [1], [2], [0, 0, 0, 1, 1, 2], [0], [0]>} : vector<4x16x16xbf16>, vector<4x16x8xbf16>, vector<4x16x8xf32> -> vector<4x16x8xf32>
    "tpu.trace_stop"() : () -> ()
    %165 = arith.truncf %164 : vector<4x16x8xf32> to vector<4x16x8xbf16>
    "tpu.trace_start"() <{level = 10 : i32, message = "htk,hkd->htd"}> : () -> ()
    %cst_90 = arith.constant dense<0.000000e+00> : vector<4x16x32xf32>
    %166 = tpu.matmul %165, %138, %cst_90 {dimension_numbers = #tpu.dot_dimension_numbers<[2], [1], [1], [2], [0, 0, 0, 1, 1, 2], [0], [0]>} : vector<4x16x8xbf16>, vector<4x8x32xbf16>, vector<4x16x32xf32> -> vector<4x16x32xf32>
    "tpu.trace_stop"() : () -> ()
    %cst_91 = arith.constant dense<0.000000e+00> : vector<16x32xf32>
    %167 = vector.multi_reduction <add>, %166, %cst_91 [0] : vector<4x16x32xf32> to vector<16x32xf32>
    %168 = vector.extract_strided_slice %130 {offsets = [16, 0], sizes = [16, 32], strides = [1, 1]} : vector<32x32xbf16> to vector<16x32xbf16>
    %169 = vector.shape_cast %168 : vector<16x32xbf16> to vector<1x16x32xbf16>
    %170 = vector.broadcast %169 : vector<1x16x32xbf16> to vector<4x16x32xbf16>
    "tpu.trace_start"() <{level = 10 : i32, message = "htd,hdk->htk"}> : () -> ()
    %cst_92 = arith.constant dense<0.000000e+00> : vector<4x16x8xf32>
    %171 = tpu.matmul %170, %132, %cst_92 {dimension_numbers = #tpu.dot_dimension_numbers<[2], [1], [1], [2], [0, 0, 0, 1, 1, 2], [0], [0]>} : vector<4x16x32xbf16>, vector<4x32x8xbf16>, vector<4x16x8xf32> -> vector<4x16x8xf32>
    %cst_93 = arith.constant dense<0.000000e+00> : vector<4x16x8xf32>
    %172 = tpu.matmul %170, %134, %cst_93 {dimension_numbers = #tpu.dot_dimension_numbers<[2], [1], [1], [2], [0, 0, 0, 1, 1, 2], [0], [0]>} : vector<4x16x32xbf16>, vector<4x32x8xbf16>, vector<4x16x8xf32> -> vector<4x16x8xf32>
    %cst_94 = arith.constant dense<0.000000e+00> : vector<4x16x8xf32>
    %173 = tpu.matmul %170, %136, %cst_94 {dimension_numbers = #tpu.dot_dimension_numbers<[2], [1], [1], [2], [0, 0, 0, 1, 1, 2], [0], [0]>} : vector<4x16x32xbf16>, vector<4x32x8xbf16>, vector<4x16x8xf32> -> vector<4x16x8xf32>
    "tpu.trace_stop"() : () -> ()
    %174 = arith.truncf %171 : vector<4x16x8xf32> to vector<4x16x8xbf16>
    %175 = arith.truncf %172 : vector<4x16x8xf32> to vector<4x16x8xbf16>
    "tpu.trace_start"() <{level = 10 : i32, message = "hik,hjk->hij"}> : () -> ()
    %cst_95 = arith.constant dense<0.000000e+00> : vector<4x16x16xf32>
    %176 = tpu.matmul %174, %175, %cst_95 {dimension_numbers = #tpu.dot_dimension_numbers<[2], [2], [1], [1], [0, 0, 0, 1, 1, 1], [0], [0]>} : vector<4x16x8xbf16>, vector<4x16x8xbf16>, vector<4x16x16xf32> -> vector<4x16x16xf32>
    "tpu.trace_stop"() : () -> ()
    %177 = arith.addf %176, %1 : vector<4x16x16xf32>
    %178 = vector.extract_strided_slice %7 {offsets = [1, 0], sizes = [1, 16], strides = [1, 1]} : vector<2x16xf32> to vector<1x16xf32>
    %179 = vector.shape_cast %178 : vector<1x16xf32> to vector<1x1x16xf32>
    %180 = vector.broadcast %179 : vector<1x1x16xf32> to vector<4x16x16xf32>
    %181 = arith.addf %177, %180 : vector<4x16x16xf32>
    %cst_96 = arith.constant dense<0xFF800000> : vector<4x16xf32>
    %182 = vector.multi_reduction <maximumf>, %181, %cst_96 [2] : vector<4x16x16xf32> to vector<4x16xf32>
    %183 = vector.shape_cast %182 : vector<4x16xf32> to vector<4x16x1xf32>
    %184 = vector.broadcast %183 : vector<4x16x1xf32> to vector<4x16x16xf32>
    %185 = arith.subf %181, %184 : vector<4x16x16xf32>
    %186 = math.exp %185 : vector<4x16x16xf32>
    %cst_97 = arith.constant dense<0.000000e+00> : vector<4x16xf32>
    %187 = vector.multi_reduction <add>, %186, %cst_97 [2] : vector<4x16x16xf32> to vector<4x16xf32>
    %188 = vector.shape_cast %187 : vector<4x16xf32> to vector<4x16x1xf32>
    %189 = vector.broadcast %188 : vector<4x16x1xf32> to vector<4x16x16xf32>
    %190 = arith.divf %186, %189 : vector<4x16x16xf32>
    %191 = arith.truncf %190 : vector<4x16x16xf32> to vector<4x16x16xbf16>
    %192 = arith.truncf %173 : vector<4x16x8xf32> to vector<4x16x8xbf16>
    "tpu.trace_start"() <{level = 10 : i32, message = "hij,hjk->hik"}> : () -> ()
    %cst_98 = arith.constant dense<0.000000e+00> : vector<4x16x8xf32>
    %193 = tpu.matmul %191, %192, %cst_98 {dimension_numbers = #tpu.dot_dimension_numbers<[2], [1], [1], [2], [0, 0, 0, 1, 1, 2], [0], [0]>} : vector<4x16x16xbf16>, vector<4x16x8xbf16>, vector<4x16x8xf32> -> vector<4x16x8xf32>
    "tpu.trace_stop"() : () -> ()
    %194 = arith.truncf %193 : vector<4x16x8xf32> to vector<4x16x8xbf16>
    "tpu.trace_start"() <{level = 10 : i32, message = "htk,hkd->htd"}> : () -> ()
    %cst_99 = arith.constant dense<0.000000e+00> : vector<4x16x32xf32>
    %195 = tpu.matmul %194, %138, %cst_99 {dimension_numbers = #tpu.dot_dimension_numbers<[2], [1], [1], [2], [0, 0, 0, 1, 1, 2], [0], [0]>} : vector<4x16x8xbf16>, vector<4x8x32xbf16>, vector<4x16x32xf32> -> vector<4x16x32xf32>
    "tpu.trace_stop"() : () -> ()
    %cst_100 = arith.constant dense<0.000000e+00> : vector<16x32xf32>
    %196 = vector.multi_reduction <add>, %195, %cst_100 [0] : vector<4x16x32xf32> to vector<16x32xf32>
    %197 = tpu.concatenate %167, %196 in 0 : vector<16x32xf32>, vector<16x32xf32> -> vector<32x32xf32>
    %198 = arith.addf %115, %197 : vector<32x32xf32>
    %c1_101 = arith.constant 1 : index
    %c0_102 = arith.constant 0 : index
    %c0_103 = arith.constant 0 : index
    %199 = vector.load %arg8[%c1_101, %c0_102, %c0_103] : memref<2x1x32xf32, #tpu.memory_space<vmem>>, vector<1x1x32xf32>
    %200 = vector.shape_cast %199 : vector<1x1x32xf32> to vector<1x32xf32>
    %201 = arith.mulf %198, %198 : vector<32x32xf32>
    %cst_104 = arith.constant dense<0.000000e+00> : vector<32xf32>
    %202 = vector.multi_reduction <add>, %201, %cst_104 [1] : vector<32x32xf32> to vector<32xf32>
    %203 = vector.shape_cast %202 : vector<32xf32> to vector<32x1xf32>
    %cst_105 = arith.constant 3.200000e+01 : f32
    %204 = vector.broadcast %cst_105 : f32 to vector<32x1xf32>
    %205 = arith.divf %203, %204 : vector<32x1xf32>
    %cst_106 = arith.constant 9.99999997E-7 : f32
    %206 = vector.broadcast %cst_106 : f32 to vector<32x1xf32>
    %207 = arith.addf %205, %206 : vector<32x1xf32>
    %208 = math.rsqrt %207 : vector<32x1xf32>
    %209 = vector.broadcast %208 : vector<32x1xf32> to vector<32x32xf32>
    %210 = arith.mulf %198, %209 : vector<32x32xf32>
    %211 = vector.broadcast %200 : vector<1x32xf32> to vector<32x32xf32>
    %212 = arith.mulf %210, %211 : vector<32x32xf32>
    %213 = arith.truncf %212 : vector<32x32xf32> to vector<32x32xbf16>
    %c1_107 = arith.constant 1 : index
    %c0_108 = arith.constant 0 : index
    %c0_109 = arith.constant 0 : index
    %214 = vector.load %arg9[%c1_107, %c0_108, %c0_109] : memref<2x32x64xbf16, #tpu.memory_space<vmem>>, vector<1x32x64xbf16>
    %215 = vector.shape_cast %214 : vector<1x32x64xbf16> to vector<32x64xbf16>
    %cst_110 = arith.constant dense<0.000000e+00> : vector<32x64xf32>
    %216 = tpu.matmul %213, %215, %cst_110 {dimension_numbers = #tpu.dot_dimension_numbers<[1], [0], [0], [1], [0, 0, 1, 1], [], []>} : vector<32x32xbf16>, vector<32x64xbf16>, vector<32x64xf32> -> vector<32x64xf32>
    %cst_111 = arith.constant 0.000000e+00 : f32
    %217 = vector.broadcast %cst_111 : f32 to vector<32x64xf32>
    %218 = arith.maximumf %216, %217 : vector<32x64xf32>
    %219 = arith.truncf %218 : vector<32x64xf32> to vector<32x64xbf16>
    %c1_112 = arith.constant 1 : index
    %c0_113 = arith.constant 0 : index
    %c0_114 = arith.constant 0 : index
    %220 = vector.load %arg10[%c1_112, %c0_113, %c0_114] : memref<2x64x32xbf16, #tpu.memory_space<vmem>>, vector<1x64x32xbf16>
    %221 = vector.shape_cast %220 : vector<1x64x32xbf16> to vector<64x32xbf16>
    %cst_115 = arith.constant dense<0.000000e+00> : vector<32x32xf32>
    %222 = tpu.matmul %219, %221, %cst_115 {dimension_numbers = #tpu.dot_dimension_numbers<[1], [0], [0], [1], [0, 0, 1, 1], [], []>} : vector<32x64xbf16>, vector<64x32xbf16>, vector<32x32xf32> -> vector<32x32xf32>
    %223 = arith.addf %198, %222 : vector<32x32xf32>
    %c0_116 = arith.constant 0 : index
    %c0_117 = arith.constant 0 : index
    %224 = vector.load %arg11[%c0_116, %c0_117] : memref<1x32xf32, #tpu.memory_space<vmem>>, vector<1x32xf32>
    %225 = arith.mulf %223, %223 : vector<32x32xf32>
    %cst_118 = arith.constant dense<0.000000e+00> : vector<32xf32>
    %226 = vector.multi_reduction <add>, %225, %cst_118 [1] : vector<32x32xf32> to vector<32xf32>
    %227 = vector.shape_cast %226 : vector<32xf32> to vector<32x1xf32>
    %cst_119 = arith.constant 3.200000e+01 : f32
    %228 = vector.broadcast %cst_119 : f32 to vector<32x1xf32>
    %229 = arith.divf %227, %228 : vector<32x1xf32>
    %cst_120 = arith.constant 9.99999997E-7 : f32
    %230 = vector.broadcast %cst_120 : f32 to vector<32x1xf32>
    %231 = arith.addf %229, %230 : vector<32x1xf32>
    %232 = math.rsqrt %231 : vector<32x1xf32>
    %233 = vector.broadcast %232 : vector<32x1xf32> to vector<32x32xf32>
    %234 = arith.mulf %223, %233 : vector<32x32xf32>
    %235 = vector.broadcast %224 : vector<1x32xf32> to vector<32x32xf32>
    %236 = arith.mulf %234, %235 : vector<32x32xf32>
    %c0_121 = arith.constant 0 : index
    %c0_122 = arith.constant 0 : index
    %237 = vector.load %arg12[%c0_121, %c0_122] : memref<32x32xf32, #tpu.memory_space<vmem>>, vector<32x32xf32>
    tpu.vector_store %arg12[%c0_121, %c0_122], %236 {strides = array<i32>} : memref<32x32xf32, #tpu.memory_space<vmem>>, vector<32x32xf32>,
    return
  }
}

</mosaic_0001>

<bundles_post_ra>
// kernel: parlai_t5_encoder_forward.1
= control target key start
LH: loop header
LB: loop body
LE: loop exit
PB: predicated region body
PF: predicated region fallthrough
CT: control target
= control target key end

     0   :  { %vm63_vm0 = vcmask 261120   ;;  %v8765_v8 = vmov 0.0   ;;  %vm7220_vm1 = vmmov 0   ;;  %s8752_s0 = inlined_call_operand.vmem [shape: s32[2,16], index: 0, kind: input, shape index: {}]   ;;  %s8753_s1 = inlined_call_operand.vmem [shape: f32[32,32], index: 1, kind: input, shape index: {}]   ;;  %s8754_s2 = inlined_call_operand.vmem [shape: f32[4,16,16], index: 2, kind: input, shape index: {}]   ;;  %s8755_s3 = inlined_call_operand.vmem [shape: f32[2,1,32], index: 3, kind: input, shape index: {}]   ;;  %s8756_s4 = inlined_call_operand.vmem [shape: bf16[2,4,32,8], index: 4, kind: input, shape index: {}]   ;;  %s8757_s5 = inlined_call_operand.vmem [shape: bf16[2,4,32,8], index: 5, kind: input, shape index: {}]   ;;  %s8758_s6 = inlined_call_operand.vmem [shape: bf16[2,4,32,8], index: 6, kind: input, shape index: {}]   ;;  %s8759_s7 = inlined_call_operand.vmem [shape: bf16[2,4,8,32], index: 7, kind: input, shape index: {}]   ;;  %s8760_s8 = inlined_call_operand.vmem [shape: f32[2,1,32], index: 8, kind: input, shape index: {}]   ;;  %s8761_s9 = inlined_call_operand.vmem [shape: bf16[2,32,64], index: 9, kind: input, shape index: {}]   ;;  %s8762_s10 = inlined_call_operand.vmem [shape: bf16[2,64,32], index: 10, kind: input, shape index: {}]   ;;  %s8763_s11 = inlined_call_operand.vmem [shape: f32[1,32], index: 11, kind: input, shape index: {}]   ;;  %s8764_s12 = inlined_call_operand.hbm [shape: f32[32,32], index: 12, kind: output, shape index: {}]  }
   0x1   :  { %v43_v0 = vld [vmem:[%s8753_s1] sm:$0xff]  ;;  %v44_v1 = vld [vmem:[%s8753_s1 + $0x8] sm:$0xff]  ;;  %6238 = vmatprep.subr.bf16.mxu1 %v8765_v8  ;;  %6254 = vmatprep.subr.bf16.mxu0 %v8765_v8 }
   0x2   :  { %v59_v2 = vmul.f32 %v43_v0, %v43_v0  ;;  %v60_v3 = vmul.f32 %v44_v1, %v44_v1  ;;  %v7300_v6 = vld [vmem:[%s8756_s4] sm:$0xff]   ;;  %v7316_v9 = vld [vmem:[%s8756_s4 + $0x8] sm:$0xff]   ;;  %6242 = vmatprep.mubr.msk.bf16.mxu1 %vm7220_vm1, %v8765_v8  ;;  %6258 = vmatprep.mubr.msk.bf16.mxu0 %vm7220_vm1, %v8765_v8 }
   0x3   :  { %v7305_v7 = vld [vmem:[%s8756_s4 + $0x20] sm:$0xff]   ;;  %6239 = vmatpush3.bf16.msra.mxu1 %v7300_v6  ;;  %v7321_v10 = vld [vmem:[%s8756_s4 + $0x28] sm:$0xff]  }
   0x4   :  { %v64_v4 = vsel %vm63_vm0, %v59_v2, 0.0  ;;  %v67_v5 = vsel %vm63_vm0, %v60_v3, 0.0  ;;  %6255 = vmatpush3.bf16.msra.mxu0 %v7305_v7  ;;  %6240 = vmatprep.subr.bf16.mxu1 %v8765_v8 }
   0x5   :  { %65 = vadd.xlane.f32.xlu0 %v64_v4  ;;  %6256 = vmatprep.subr.bf16.mxu0 %v8765_v8 }
   0x7   :  { %6241 = vmatpush3.bf16.msra.mxu1 %v7316_v9 }
   0x8   :  { %6257 = vmatpush3.bf16.msra.mxu0 %v7321_v10  ;;  %6246 = vmatprep.subr.bf16.mxu1 %v8765_v8 }
   0x9   :  { %68 = vadd.xlane.f32.xlu0 %v67_v5  ;;  %6270 = vmatprep.subr.bf16.mxu0 %v8765_v8 }
   0xa   :  { %17 = vsyncpa [#allocation3], 0  ;;  %v7334_v20 = vld [vmem:[%s8755_s3] ss:$0 sm:$0xff]  ;;  %v7341_v24 = vld [vmem:[%s8756_s4 + $0x10] sm:$0xff]   ;;  %vm804_vm2 = vcmask 64512  }
   0xb   :  { %v7346_v25 = vld [vmem:[%s8757_s5] sm:$0xff]   ;;  %v7359_v27 = vld [vmem:[%s8756_s4 + $0x18] sm:$0xff]   ;;  %v7364_v28 = vld [vmem:[%s8757_s5 + $0x8] sm:$0xff]   ;;  %vm1005_vm4 = vcmask 130048   ;;  %vm1285_vm5 = vcmask 1043456   ;;  %vm2812_vm6 = vcmask 523264  }
   0xc   :  { %v7377_v29 = vld [vmem:[%s8756_s4 + $0x30] sm:$0xff]   ;;  %v7382_v30 = vld [vmem:[%s8757_s5 + $0x20] sm:$0xff]   ;;  %v7395_v31 = vld [vmem:[%s8756_s4 + $0x38] sm:$0xff]   ;;  %s7221_s27 = smov [#allocation2]  }
   0xd   :  { %v7400_v32 = vld [vmem:[%s8757_s5 + $0x28] sm:$0xff]   ;;  %v7413_v33 = vld [vmem:[%s8757_s5 + $0x10] sm:$0xff]   ;;  %v7418_v34 = vld [vmem:[%s8758_s6] sm:$0xff]   ;;  %s5732_s28 = sshll.u32 %s7221_s27, 4  ;;  %s5733_s28 = int_to_ptr.vmem [resolvable:$true] %s5732_s28 }
   0xe   :  { %v7431_v35 = vld [vmem:[%s8757_s5 + $0x18] sm:$0xff]   ;;  %v7436_v36 = vld [vmem:[%s8758_s6 + $0x8] sm:$0xff]   ;;  %v7449_v37 = vld [vmem:[%s8757_s5 + $0x30] sm:$0xff]   ;;  %p7200_p1 = scmp.lt.s32.totalorder %s5733_s28, %s5733_s28 }
   0xf   :  { %v7454_v38 = vld [vmem:[%s8758_s6 + $0x20] sm:$0xff]   ;;  %v7467_v39 = vld [vmem:[%s8757_s5 + $0x38] sm:$0xff]   ;;  %v7472_v40 = vld [vmem:[%s8758_s6 + $0x28] sm:$0xff]  }
  0x10   :  { %v7485_v41 = vld [vmem:[%s8758_s6 + $0x10] sm:$0xff]   ;;  %v7497_v42 = vld [vmem:[%s8758_s6 + $0x18] sm:$0xff]  }
  0x11   :  { %v7508_v43 = vld [vmem:[%s8758_s6 + $0x30] sm:$0xff]   ;;  %v7517_v44 = vld [vmem:[%s8758_s6 + $0x38] sm:$0xff]  }
  0x92   :  { %v66_v11 = vpop.xlane.xlu0 %65 }
  0x93   :  { %v77_v12 = vmul.f32 0.03125, %v66_v11 }
  0x95   :  { %v81_v13 = vadd.f32 1e-06, %v77_v12 }
  0x96   :  { %v69_v14 = vpop.xlane.xlu0 %68 }
  0x97   :  { %7015 = vrsqrt.f32 %v81_v13  ;;  %v78_v15 = vmul.f32 0.03125, %v69_v14 }
  0x99   :  { %v82_v16 = vadd.f32 1e-06, %v78_v15 }
  0x9b   :  { %7017 = vrsqrt.f32 %v82_v16 }
  0xa1   :  { %v7016_v17 = vpop.eup %7015 }
  0xa2   :  { %v89_v18 = vmul.f32 %v7016_v17, %v43_v0 }
  0xa4   :  { %v99_v22 = vmul.f32 %v7334_v20, %v89_v18 }
  0xa5   :  { %v7018_v19 = vpop.eup %7017 }
  0xa6   :  { %v90_v21 = vmul.f32 %v7018_v19, %v44_v1 }
  0xa8   :  { %v100_v23 = vmul.f32 %v7334_v20, %v90_v21 }
  0xaa   :  { %v7348_v26 = vpack.c.bf16 %v100_v23, %v99_v22 }
  0xac   :  { %6243 = vmatmul.mubr.msk.bf16.vlgmr.msra.gmra.mrb[0].mxu1 %vm63_vm0, %v7348_v26  ;;  %6259 = vmatmul.mubr.msk.bf16.vlgmr.msra.gmra.mrb[0].mxu0 %vm63_vm0, %v7348_v26 }
  0xad   :  { %6247 = vmatpush3.bf16.msra.mxu1 %v7341_v24  ;;  %6271 = vmatpush3.bf16.msra.mxu0 %v7346_v25 }
  0xae   :  { %6248 = vmatprep.subr.bf16.mxu1 %v8765_v8  ;;  %6272 = vmatprep.subr.bf16.mxu0 %v8765_v8 }
  0xaf   :  { %6250 = vmatprep.mubr.msk.bf16.mxu1 %vm7220_vm1, %v8765_v8  ;;  %6274 = vmatprep.mubr.msk.bf16.mxu0 %vm7220_vm1, %v8765_v8 }
  0xb1   :  { %6249 = vmatpush3.bf16.msra.mxu1 %v7359_v27  ;;  %6273 = vmatpush3.bf16.msra.mxu0 %v7364_v28 }
  0xb2   :  { %6262 = vmatprep.subr.bf16.mxu1 %v8765_v8  ;;  %6286 = vmatprep.subr.bf16.mxu0 %v8765_v8 }
  0xb4   :  { %6251 = vmatmul.mubr.msk.bf16.vlgmr.msra.gmra.mrb[4].mxu1 %vm63_vm0, %v7348_v26  ;;  %6275 = vmatmul.mubr.msk.bf16.vlgmr.msra.gmra.mrb[4].mxu0 %vm63_vm0, %v7348_v26 }
  0xb5   :  { %6263 = vmatpush3.bf16.msra.mxu1 %v7377_v29  ;;  %6287 = vmatpush3.bf16.msra.mxu0 %v7382_v30 }
  0xb6   :  { %6264 = vmatprep.subr.bf16.mxu1 %v8765_v8  ;;  %6288 = vmatprep.subr.bf16.mxu0 %v8765_v8 }
  0xb7   :  { %6266 = vmatprep.mubr.msk.bf16.mxu1 %vm7220_vm1, %v8765_v8  ;;  %6290 = vmatprep.mubr.msk.bf16.mxu0 %vm7220_vm1, %v8765_v8 }
  0xb9   :  { %6265 = vmatpush3.bf16.msra.mxu1 %v7395_v31  ;;  %6289 = vmatpush3.bf16.msra.mxu0 %v7400_v32 }
  0xba   :  { %6278 = vmatprep.subr.bf16.mxu1 %v8765_v8  ;;  %6302 = vmatprep.subr.bf16.mxu0 %v8765_v8 }
  0xbc   :  { %6267 = vmatmul.mubr.msk.bf16.vlgmr.msra.gmra.mrb[8].mxu1 %vm63_vm0, %v7348_v26  ;;  %6291 = vmatmul.mubr.msk.bf16.vlgmr.msra.gmra.mrb[8].mxu0 %vm63_vm0, %v7348_v26 }
  0xbd   :  { %6279 = vmatpush3.bf16.msra.mxu1 %v7413_v33  ;;  %6303 = vmatpush3.bf16.msra.mxu0 %v7418_v34 }
  0xbe   :  { %6280 = vmatprep.subr.bf16.mxu1 %v8765_v8  ;;  %6304 = vmatprep.subr.bf16.mxu0 %v8765_v8 }
  0xbf   :  { %6282 = vmatprep.mubr.msk.bf16.mxu1 %vm7220_vm1, %v8765_v8  ;;  %6306 = vmatprep.mubr.msk.bf16.mxu0 %vm7220_vm1, %v8765_v8 }
  0xc1   :  { %6281 = vmatpush3.bf16.msra.mxu1 %v7431_v35  ;;  %6305 = vmatpush3.bf16.msra.mxu0 %v7436_v36 }
  0xc2   :  { %6294 = vmatprep.subr.bf16.mxu1 %v8765_v8  ;;  %6318 = vmatprep.subr.bf16.mxu0 %v8765_v8 }
  0xc4   :  { %6283 = vmatmul.mubr.msk.bf16.vlgmr.msra.gmra.mrb[12].mxu1 %vm63_vm0, %v7348_v26  ;;  %6307 = vmatmul.mubr.msk.bf16.vlgmr.msra.gmra.mrb[12].mxu0 %vm63_vm0, %v7348_v26 }
  0xc5   :  { %6295 = vmatpush3.bf16.msra.mxu1 %v7449_v37  ;;  %6319 = vmatpush3.bf16.msra.mxu0 %v7454_v38 }
  0xc6   :  { %6296 = vmatprep.subr.bf16.mxu1 %v8765_v8  ;;  %6320 = vmatprep.subr.bf16.mxu0 %v8765_v8 }
  0xc7   :  { %6298 = vmatprep.mubr.msk.bf16.mxu1 %vm7220_vm1, %v8765_v8  ;;  %6322 = vmatprep.mubr.msk.bf16.mxu0 %vm7220_vm1, %v8765_v8 }
  0xc9   :  { %6297 = vmatpush3.bf16.msra.mxu1 %v7467_v39  ;;  %6321 = vmatpush3.bf16.msra.mxu0 %v7472_v40 }
  0xca   :  { %6310 = vmatprep.subr.bf16.mxu1 %v8765_v8  ;;  %6334 = vmatprep.subr.bf16.mxu0 %v8765_v8 }
  0xcc   :  { %6299 = vmatmul.mubr.msk.bf16.vlgmr.msra.gmra.mrb[16].mxu1 %vm63_vm0, %v7348_v26  ;;  %6323 = vmatmul.mubr.msk.bf16.vlgmr.msra.gmra.mrb[16].mxu0 %vm63_vm0, %v7348_v26 }
  0xcd   :  { %6311 = vmatpush3.bf16.msra.mxu1 %v7485_v41  ;;  %6314 = vmatprep.mubr.msk.bf16.mxu1 %vm7220_vm1, %v8765_v8 }
  0xce   :  { %6312 = vmatprep.subr.bf16.mxu1 %v8765_v8  ;;  %6336 = vmatprep.mubr.msk.bf16.mxu0 %vm7220_vm1, %v8765_v8 }
  0xd1   :  { %6313 = vmatpush3.bf16.msra.mxu1 %v7497_v42 }
  0xd2   :  { %6326 = vmatprep.subr.bf16.mxu1 %v8765_v8 }
  0xd4   :  { %6315 = vmatmul.mubr.msk.bf16.vlgmr.msra.gmra.mrb[20].mxu1 %vm63_vm0, %v7348_v26 }
  0xd5   :  { %6327 = vmatpush3.bf16.msra.mxu1 %v7508_v43  ;;  %6330 = vmatprep.mubr.msk.bf16.mxu1 %vm7220_vm1, %v8765_v8 }
  0xd6   :  { %6328 = vmatprep.subr.bf16.mxu1 %v8765_v8 }
  0xd9   :  { %6329 = vmatpush3.bf16.msra.mxu1 %v7517_v44 }
  0xda   :  { %6340 = vmatprep.subr.bf16.mxu1 %v8765_v8 }
  0xdc   :  { %6331 = vmatmul.mubr.msk.bf16.vlgmr.msra.gmra.mrb[24].mxu1 %vm63_vm0, %v7348_v26 }
  0xdd   :  { %6342 = vmatprep.mubr.msk.bf16.mxu1 %vm7220_vm1, %v8765_v8 }
 0x17f   :  { %v206_v45 = vpop.f32.mrb[0].mxu1  ;;  %v312_v46 = vpop.f32.mrb[0].mxu0 }
 0x180   :  { %v6244_v47 = vpop.f32.mrb[1].mxu1  ;;  %v6260_v48 = vpop.f32.mrb[1].mxu0 }
 0x181   :  { %v209_v49 = vpop.f32.mrb[2].mxu1  ;;  %v315_v50 = vpop.f32.mrb[2].mxu0 }
 0x182   :  { %v796_v51 = vpack.c.bf16 %v209_v49, %v206_v45  ;;  %v798_v52 = vpack.c.bf16 %v315_v50, %v312_v46  ;;  %v6245_v53 = vpop.f32.mrb[3].mxu1  ;;  %v6261_v54 = vpop.f32.mrb[3].mxu0 }
 0x187   :  { %v259_v55 = vpop.f32.mrb[4].mxu1  ;;  %v418_v56 = vpop.f32.mrb[4].mxu0 }
 0x188   :  { %v6252_v57 = vpop.f32.mrb[5].mxu1  ;;  %v6276_v58 = vpop.f32.mrb[5].mxu0 }
 0x189   :  { %v262_v59 = vpop.f32.mrb[6].mxu1  ;;  %v421_v60 = vpop.f32.mrb[6].mxu0 }
 0x18a   :  { %v797_v61 = vpack.c.bf16 %v262_v59, %v259_v55  ;;  %v800_v62 = vpack.c.bf16 %v421_v60, %v418_v56  ;;  %v6253_v63 = vpop.f32.mrb[7].mxu1  ;;  %v6277_v0 = vpop.f32.mrb[7].mxu0 }
 0x18c   :  { %v809_v1 = vsel %vm804_vm2, %v800_v62, 0 }
 0x18d   :  { %6335 = vmatpush3.bf16.xpose.msra.mxu0 %v809_v1 }
 0x18e   :  { %6346 = vmatprep.subr.bf16.mxu0 %v8765_v8 }
 0x18f   :  { %v365_v2 = vpop.f32.mrb[8].mxu1  ;;  %v524_v3 = vpop.f32.mrb[8].mxu0 }
 0x190   :  { %v6268_v4 = vpop.f32.mrb[9].mxu1  ;;  %v6292_v5 = vpop.f32.mrb[9].mxu0 }
 0x191   :  { %v368_v11 = vpop.f32.mrb[10].mxu1  ;;  %v527_v12 = vpop.f32.mrb[10].mxu0 }
 0x192   :  { %v799_v13 = vpack.c.bf16 %v368_v11, %v365_v2  ;;  %v802_v14 = vpack.c.bf16 %v527_v12, %v524_v3  ;;  %v6269_v15 = vpop.f32.mrb[11].mxu1  ;;  %v6293_v16 = vpop.f32.mrb[11].mxu0  ;;  %v993_v12 = vlaneseq }
 0x194   :  { %v903_v17 = vsel %vm804_vm2, %v802_v14, 0  ;;  %6337 = vmatmul.mubr.msk.bf16.vlgmr.msra.gmra.mrb[20].mxu0 %vm804_vm2, %v796_v51  ;;  %v7565_v14 = vshrl.u32 %v993_v12, 7 }
 0x195   :  { %6347 = vmatpush3.bf16.xpose.msra.mxu0 %v903_v17  ;;  %6348 = vmatprep.mubr.msk.bf16.mxu0 %vm7220_vm1, %v8765_v8  ;;  %v7574_v17 = vld [vmem:[%s8754_s2] sm:$0xff] }
 0x196   :  { %6358 = vmatprep.subr.bf16.mxu0 %v8765_v8  ;;  %v995_v15 = vsub.s32 0, %v7565_v14 }
 0x197   :  { %v471_v18 = vpop.f32.mrb[12].mxu1  ;;  %v630_v19 = vpop.f32.mrb[12].mxu0 }
 0x198   :  { %v6284_v21 = vpop.f32.mrb[13].mxu1  ;;  %v6308_v22 = vpop.f32.mrb[13].mxu0 }
 0x199   :  { %v474_v23 = vpop.f32.mrb[14].mxu1  ;;  %v633_v26 = vpop.f32.mrb[14].mxu0  ;;  %v7582_v21 = vld [vmem:[%s8754_s2 + $0x8] sm:$0xff] }
 0x19a   :  { %v801_v45 = vpack.c.bf16 %v474_v23, %v471_v18  ;;  %v1098_v46 = vpack.c.bf16 %v633_v26, %v630_v19  ;;  %v6285_v47 = vpop.f32.mrb[15].mxu1  ;;  %v6309_v48 = vpop.f32.mrb[15].mxu0 }
 0x19c   :  { %v856_v49 = vsel %vm804_vm2, %v801_v45, 0  ;;  %6349 = vmatmul.mubr.msk.bf16.vlgmr.msra.gmra.mrb[24].mxu0 %vm804_vm2, %v798_v52 }
 0x19d   :  { %6341 = vmatpush3.bf16.xpose.msra.mxu1 %v856_v49  ;;  %6359 = vmatpush3.bf16.msra.mxu0 %v1098_v46 }
 0x19e   :  { %6352 = vmatprep.subr.bf16.mxu1 %v8765_v8  ;;  %6360 = vmatprep.mubr.msk.bf16.mxu0 %vm7220_vm1, %v8765_v8 }
 0x19f   :  { %v577_v50 = vpop.f32.mrb[16].mxu1  ;;  %v7540_v51 = vpop.f32.mrb[16].mxu0  ;;  %6370 = vmatprep.subr.bf16.mxu0 %v8765_v8 }
 0x1a0   :  { %v6300_v53 = vpop.f32.mrb[17].mxu1  ;;  %v6324_v54 = vpop.f32.mrb[17].mxu0 }
 0x1a1   :  { %v580_v55 = vpop.f32.mrb[18].mxu1  ;;  %v7543_v56 = vpop.f32.mrb[18].mxu0 }
 0x1a2   :  { %v803_v57 = vpack.c.bf16 %v580_v55, %v577_v50  ;;  %v6301_v58 = vpop.f32.mrb[19].mxu1  ;;  %v6325_v59 = vpop.f32.mrb[19].mxu0 }
 0x1a3   :  { %v7593_v58 = vld [vmem:[%s8754_s2 + $0x20] sm:$0xff]  ;;  %v7598_v59 = vld [vmem:[%s8754_s2 + $0x10] sm:$0xff] }
 0x1a4   :  { %v950_v60 = vsel %vm804_vm2, %v803_v57, 0  ;;  %6343 = vmatmul.mubr.msk.bf16.vlgmr.msra.gmra.mrb[28].mxu1 %vm804_vm2, %v797_v61 }
 0x1a5   :  { %6353 = vmatpush3.bf16.xpose.msra.mxu1 %v950_v60  ;;  %6354 = vmatprep.mubr.msk.bf16.mxu1 %vm7220_vm1, %v8765_v8  ;;  %v7603_v60 = vld [vmem:[%s8754_s2 + $0x28] sm:$0xff] }
 0x1a6   :  { %6364 = vmatprep.subr.bf16.mxu1 %v8765_v8 }
 0x1a7   :  { %v683_v62 = vpop.f32.mrb[20].mxu1 }
 0x1a8   :  { %v6316_v63 = vpop.f32.mrb[21].mxu1 }
 0x1a9   :  { %v686_v0 = vpop.f32.mrb[22].mxu1  ;;  %v7608_v63 = vld [vmem:[%s8754_s2 + $0x18] sm:$0xff] }
 0x1aa   :  { %v1099_v1 = vpack.c.bf16 %v686_v0, %v683_v62  ;;  %v6317_v2 = vpop.f32.mrb[23].mxu1 }
 0x1ac   :  { %6355 = vmatmul.mubr.msk.bf16.vlgmr.msra.gmra.mrb[32].mxu1 %vm804_vm2, %v799_v13  ;;  %v55_v13 = vld [vmem:[%s8752_s0] sm:$0x3] }
 0x1ad   :  { %6365 = vmatpush3.bf16.msra.mxu1 %v1099_v1  ;;  %6366 = vmatprep.mubr.msk.bf16.mxu1 %vm7220_vm1, %v8765_v8  ;;  %vm56_vm3 = vcmp.eq.s32.totalorder %v55_v13, 0 }
 0x1ae   :  { %6376 = vmatprep.subr.bf16.mxu1 %v8765_v8  ;;  %v7569_v16 = vsel %vm56_vm3, -1e+09, %v8765_v8 }
 0x1af   :  { %v7556_v61 = vpop.f32.mrb[24].mxu1  ;;  %v7577_v18 = vrot.slane %v7569_v16, %v995_v15 }
 0x1b0   :  { %v6332_v3 = vpop.f32.mrb[25].mxu1 }
 0x1b1   :  { %v7558_v4 = vpop.f32.mrb[26].mxu1 }
 0x1b2   :  { %v6333_v11 = vpop.f32.mrb[27].mxu1 }
 0x267   :  { %v845_v19 = vpop.f32.mrb[20].mxu0 }
 0x268   :  { %v846_v22 = vadd.f32 %v845_v19, %v7574_v17  ;;  %v6338_v23 = vpop.f32.mrb[21].mxu0 }
 0x269   :  { %v848_v26 = vpop.f32.mrb[22].mxu0 }
 0x26a   :  { %v849_v45 = vadd.f32 %v848_v26, %v7582_v21  ;;  %v6339_v46 = vpop.f32.mrb[23].mxu0  ;;  %v997_v47 = vadd.f32 %v7577_v18, %v846_v22  ;;  %v7621_v26 = vld [vmem:[%s8754_s2 + $0x30] sm:$0xff] }
 0x26c   :  { %v1006_v48 = vsel %vm1005_vm4, %v997_v47, -inf  ;;  %v998_v49 = vadd.f32 %v7577_v18, %v849_v45 }
 0x26d   :  { %1007 = vmax.xlane.f32.xlu1 %v1006_v48 }
 0x26e   :  { %v1009_v54 = vsel %vm1005_vm4, %v998_v49, -inf }
 0x26f   :  { %v939_v50 = vpop.f32.mrb[24].mxu0 }
 0x270   :  { %v6350_v53 = vpop.f32.mrb[25].mxu0  ;;  %v940_v0 = vadd.f32 %v939_v50, %v7593_v58  ;;  %v7628_v50 = vld [vmem:[%s8754_s2 + $0x38] sm:$0xff] }
 0x271   :  { %1010 = vmax.xlane.f32.xlu1 %v1009_v54  ;;  %v942_v55 = vpop.f32.mrb[26].mxu0 }
 0x272   :  { %v6351_v57 = vpop.f32.mrb[27].mxu0  ;;  %v943_v11 = vadd.f32 %v942_v55, %v7603_v60  ;;  %v1001_v23 = vadd.f32 %v7577_v18, %v940_v0 }
 0x274   :  { %v1002_v46 = vadd.f32 %v7577_v18, %v943_v11  ;;  %v1018_v55 = vsel %vm1005_vm4, %v1001_v23, -inf }
 0x277   :  { %v892_v62 = vpop.f32.mrb[28].mxu1 }
 0x278   :  { %v893_v1 = vadd.f32 %v892_v62, %v7598_v59  ;;  %v6344_v2 = vpop.f32.mrb[29].mxu1 }
 0x279   :  { %v895_v3 = vpop.f32.mrb[30].mxu1 }
 0x27a   :  { %v896_v12 = vadd.f32 %v895_v3, %v7608_v63  ;;  %v6345_v13 = vpop.f32.mrb[31].mxu1  ;;  %v999_v15 = vadd.f32 %v7577_v18, %v893_v1  ;;  %v1021_v1 = vsel %vm1005_vm4, %v1002_v46, -inf }
 0x27c   :  { %v1012_v19 = vsel %vm1005_vm4, %v999_v15, -inf  ;;  %v1000_v22 = vadd.f32 %v7577_v18, %v896_v12 }
 0x27d   :  { %1013 = vmax.xlane.f32.xlu0 %v1012_v19 }
 0x27e   :  { %v1015_v45 = vsel %vm1005_vm4, %v1000_v22, -inf }
 0x27f   :  { %1016 = vmax.xlane.f32.xlu1 %v1015_v45  ;;  %v986_v48 = vpop.f32.mrb[32].mxu1 }
 0x280   :  { %v987_v53 = vadd.f32 %v986_v48, %v7621_v26  ;;  %v6356_v54 = vpop.f32.mrb[33].mxu1 }
 0x281   :  { %1019 = vmax.xlane.f32.xlu0 %v1018_v55  ;;  %v989_v57 = vpop.f32.mrb[34].mxu1 }
 0x282   :  { %v990_v62 = vadd.f32 %v989_v57, %v7628_v50  ;;  %v6357_v0 = vpop.f32.mrb[35].mxu1  ;;  %v1003_v2 = vadd.f32 %v7577_v18, %v987_v53 }
 0x283   :  { %1022 = vmax.xlane.f32.xlu1 %v1021_v1 }
 0x284   :  { %v1024_v3 = vsel %vm1005_vm4, %v1003_v2, -inf  ;;  %v1004_v11 = vadd.f32 %v7577_v18, %v990_v62 }
 0x285   :  { %1025 = vmax.xlane.f32.xlu0 %v1024_v3 }
 0x286   :  { %v1027_v12 = vsel %vm1005_vm4, %v1004_v11, -inf }
 0x287   :  { %1028 = vmax.xlane.f32.xlu1 %v1027_v12 }
 0x2fa   :  { %v1008_v13 = vpop.xlane.xlu1 %1007 }
 0x2fb   :  { %v1030_v19 = vsub.f32 %v997_v47, %v1008_v13 }
 0x2fd   :  { %v1038_v45 = vmul.f32 1.442695, %v1030_v19 }
 0x2fe   :  { %v1011_v48 = vpop.xlane.xlu1 %1010 }
 0x2ff   :  { %7019 = vpow2.f32 %v1038_v45  ;;  %v1031_v54 = vsub.f32 %v998_v49, %v1011_v48 }
 0x301   :  { %v1040_v55 = vmul.f32 1.442695, %v1031_v54 }
 0x303   :  { %7021 = vpow2.f32 %v1040_v55 }
 0x309   :  { %v7020_v57 = vpop.eup %7019 }
 0x30a   :  { %v1014_v0 = vpop.xlane.xlu0 %1013  ;;  %v1054_v53 = vsel %vm1005_vm4, %v7020_v57, 0.0 }
 0x30b   :  { %v1032_v1 = vsub.f32 %v999_v15, %v1014_v0  ;;  %1055 = vadd.xlane.f32.xlu0 %v1054_v53 }
 0x30c   :  { %v1017_v5 = vpop.xlane.xlu1 %1016 }
 0x30d   :  { %v7022_v62 = vpop.eup %7021  ;;  %v1042_v3 = vmul.f32 1.442695, %v1032_v1  ;;  %v1033_v8 = vsub.f32 %v1000_v22, %v1017_v5 }
 0x30e   :  { %v1020_v52 = vpop.xlane.xlu0 %1019  ;;  %v1057_v12 = vsel %vm1005_vm4, %v7022_v62, 0.0 }
 0x30f   :  { %7023 = vpow2.f32 %v1042_v3  ;;  %v1044_v47 = vmul.f32 1.442695, %v1033_v8  ;;  %v1034_v13 = vsub.f32 %v1001_v23, %v1020_v52  ;;  %1058 = vadd.xlane.f32.xlu1 %v1057_v12 }
 0x310   :  { %v1023_v49 = vpop.xlane.xlu1 %1022 }
 0x311   :  { %7025 = vpow2.f32 %v1044_v47  ;;  %v1046_v19 = vmul.f32 1.442695, %v1034_v13  ;;  %v1035_v45 = vsub.f32 %v1002_v46, %v1023_v49  ;;  %v7649_v49 = vld [vmem:[%s8753_s1 + $0x10] sm:$0xff] }
 0x312   :  { %v1026_v48 = vpop.xlane.xlu0 %1025 }
 0x313   :  { %7027 = vpow2.f32 %v1046_v19  ;;  %v1048_v54 = vmul.f32 1.442695, %v1035_v45  ;;  %v1036_v15 = vsub.f32 %v1003_v2, %v1026_v48  ;;  %v7654_v19 = vld [vmem:[%s8753_s1 + $0x18] sm:$0xff]  ;;  %v61_v45 = vmul.f32 %v7649_v49, %v7649_v49 }
 0x314   :  { %v1029_v55 = vpop.xlane.xlu1 %1028  ;;  %v62_v48 = vmul.f32 %v7654_v19, %v7654_v19 }
 0x315   :  { %7029 = vpow2.f32 %v1048_v54  ;;  %v1050_v0 = vmul.f32 1.442695, %v1036_v15  ;;  %v1037_v53 = vsub.f32 %v1004_v11, %v1029_v55  ;;  %v70_v54 = vsel %vm63_vm0, %v61_v45, 0.0 }
 0x316   :  { %v73_v15 = vsel %vm63_vm0, %v62_v48, 0.0  ;;  %v8772_v45 = vpack.c.bf16 %v7543_v56, %v7540_v51  ;;  %v8773_v48 = vmov 0.0  }
 0x317   :  { %7031 = vpow2.f32 %v1050_v0  ;;  %v1052_v5 = vmul.f32 1.442695, %v1037_v53 }
 0x319   :  { %v7024_v22 = vpop.eup %7023  ;;  %7033 = vpow2.f32 %v1052_v5 }
 0x31a   :  { %v1060_v8 = vsel %vm1005_vm4, %v7024_v22, 0.0 }
 0x31b   :  { %v7026_v52 = vpop.eup %7025  ;;  %1061 = vadd.xlane.f32.xlu0 %v1060_v8 }
 0x31c   :  { %v1063_v23 = vsel %vm1005_vm4, %v7026_v52, 0.0 }
 0x31d   :  { %v7028_v1 = vpop.eup %7027  ;;  %1064 = vadd.xlane.f32.xlu1 %v1063_v23 }
 0x31e   :  { %v1066_v46 = vsel %vm1005_vm4, %v7028_v1, 0.0 }
 0x31f   :  { %v7030_v3 = vpop.eup %7029  ;;  %1067 = vadd.xlane.f32.xlu0 %v1066_v46 }
 0x320   :  { %v1069_v2 = vsel %vm1005_vm4, %v7030_v3, 0.0 }
 0x321   :  { %v7032_v12 = vpop.eup %7031  ;;  %1070 = vadd.xlane.f32.xlu1 %v1069_v2 }
 0x322   :  { %v1072_v11 = vsel %vm1005_vm4, %v7032_v12, 0.0 }
 0x323   :  { %v7034_v47 = vpop.eup %7033  ;;  %1073 = vadd.xlane.f32.xlu0 %v1072_v11 }
 0x324   :  { %v1075_v13 = vsel %vm1005_vm4, %v7034_v47, 0.0 }
 0x325   :  { %1076 = vadd.xlane.f32.xlu1 %v1075_v13 }
 0x327   :  { %71 = vadd.xlane.f32.xlu0 %v70_v54 }
 0x329   :  { %74 = vadd.xlane.f32.xlu1 %v73_v15 }
 0x398   :  { %v1056_v55 = vpop.xlane.xlu0 %1055 }
 0x399   :  { %7035 = vrcp.f32 %v1056_v55 }
 0x39c   :  { %v1059_v0 = vpop.xlane.xlu1 %1058 }
 0x39d   :  { %7037 = vrcp.f32 %v1059_v0 }
 0x3a3   :  { %v7036_v53 = vpop.eup %7035 }
 0x3a4   :  { %v1079_v8 = vmul.f32 %v7036_v53, %v7020_v57 }
 0x3a7   :  { %v7038_v5 = vpop.eup %7037 }
 0x3a8   :  { %v1081_v23 = vmul.f32 %v7038_v5, %v7022_v62  ;;  %v1062_v46 = vpop.xlane.xlu0 %1061 }
 0x3a9   :  { %7039 = vrcp.f32 %v1062_v46 }
 0x3aa   :  { %v1065_v2 = vpop.xlane.xlu1 %1064  ;;  %v1094_v11 = vpack.c.bf16 %v1081_v23, %v1079_v8 }
 0x3ab   :  { %7041 = vrcp.f32 %v1065_v2  ;;  %v8774_v2 = vpack.c.bf16 %v7558_v4, %v7556_v61  ;;  %v153_v61 = vld [vmem:[%s8759_s7] sm:$0xf] }
 0x3ac   :  { %v1068_v13 = vpop.xlane.xlu0 %1067  ;;  %6361 = vmatmul.mubr.msk.bf16.vlgmr.msra.gmra.mrb[28].mxu0 %vm1005_vm4, %v1094_v11  ;;  %v7686_v4 = vsel %vm1285_vm5, %v153_v61, 0 }
 0x3ad   :  { %7043 = vrcp.f32 %v1068_v13  ;;  %6371 = vmatpush3.bf16.msra.mxu0 %v8772_v45  ;;  %6372 = vmatprep.mubr.msk.bf16.mxu0 %vm7220_vm1, %v8773_v48 }
 0x3ae   :  { %v1071_v54 = vpop.xlane.xlu1 %1070  ;;  %6382 = vmatprep.subr.bf16.mxu0 %v8773_v48 }
 0x3af   :  { %7045 = vrcp.f32 %v1071_v54 }
 0x3b0   :  { %v1074_v57 = vpop.xlane.xlu0 %1073 }
 0x3b1   :  { %7047 = vrcp.f32 %v1074_v57 }
 0x3b2   :  { %v1077_v62 = vpop.xlane.xlu1 %1076 }
 0x3b3   :  { %v7040_v15 = vpop.eup %7039  ;;  %7049 = vrcp.f32 %v1077_v62 }
 0x3b4   :  { %v1083_v0 = vmul.f32 %v7040_v15, %v7024_v22  ;;  %v155_v15 = vld [vmem:[%s8759_s7 + $0x8] sm:$0xf] }
 0x3b5   :  { %v7042_v55 = vpop.eup %7041 }
 0x3b6   :  { %v1085_v53 = vmul.f32 %v7042_v55, %v7026_v52  ;;  %v75_v45 = vpop.xlane.xlu1 %74 }
 0x3b7   :  { %v7044_v5 = vpop.eup %7043  ;;  %v80_v57 = vmul.f32 0.03125, %v75_v45 }
 0x3b8   :  { %v1095_v8 = vpack.c.bf16 %v1085_v53, %v1083_v0  ;;  %v1087_v51 = vmul.f32 %v7044_v5, %v7028_v1 }
 0x3b9   :  { %v7046_v23 = vpop.eup %7045  ;;  %v84_v5 = vadd.f32 1e-06, %v80_v57 }
 0x3ba   :  { %v1089_v56 = vmul.f32 %v7046_v23, %v7030_v3  ;;  %6367 = vmatmul.mubr.msk.bf16.vlgmr.msra.gmra.mrb[36].mxu1 %vm1005_vm4, %v1095_v8  ;;  %v154_v3 = vld [vmem:[%s8759_s7 + $0x4] sm:$0xf] }
 0x3bb   :  { %v7048_v46 = vpop.eup %7047  ;;  %6377 = vmatpush3.bf16.msra.mxu1 %v8774_v2  ;;  %6378 = vmatprep.mubr.msk.bf16.mxu1 %vm7220_vm1, %v8773_v48 }
 0x3bc   :  { %v1096_v11 = vpack.c.bf16 %v1089_v56, %v1087_v51  ;;  %6388 = vmatprep.subr.bf16.mxu1 %v8773_v48  ;;  %v1091_v52 = vmul.f32 %v7048_v46, %v7032_v12  ;;  %v7694_v12 = vsel %vm1285_vm5, %v154_v3, 0  ;;  %v7702_v51 = vsel %vm1285_vm5, %v155_v15, 0  ;;  %v156_v46 = vld [vmem:[%s8759_s7 + $0xc] sm:$0xf] }
 0x3bd   :  { %v7050_v22 = vpop.eup %7049  ;;  %v7713_v61 = vsel %vm1285_vm5, %v156_v46, 0 }
 0x3be   :  { %v1093_v13 = vmul.f32 %v7050_v22, %v7034_v47  ;;  %6373 = vmatmul.mubr.msk.bf16.vlgmr.msra.gmra.mrb[32].mxu0 %vm1005_vm4, %v1096_v11  ;;  %v72_v47 = vpop.xlane.xlu0 %71 }
 0x3bf   :  { %6384 = vmatprep.mubr.msk.bf16.mxu0 %vm7220_vm1, %v8773_v48  ;;  %6383 = vmatpush3.bf16.msra.mxu0 %v7686_v4  ;;  %v79_v54 = vmul.f32 0.03125, %v72_v47 }
 0x3c0   :  { %v1097_v1 = vpack.c.bf16 %v1093_v13, %v1091_v52  ;;  %6394 = vmatprep.subr.bf16.mxu0 %v8773_v48 }
 0x3c1   :  { %v83_v0 = vadd.f32 1e-06, %v79_v54 }
 0x3c2   :  { %6379 = vmatmul.mubr.msk.bf16.vlgmr.msra.gmra.mrb[40].mxu1 %vm1005_vm4, %v1097_v1 }
 0x3c3   :  { %6390 = vmatprep.mubr.msk.bf16.mxu1 %vm7220_vm1, %v8773_v48  ;;  %6389 = vmatpush3.bf16.msra.mxu1 %v7694_v12  ;;  %7051 = vrsqrt.f32 %v83_v0 }
 0x3c4   :  { %6400 = vmatprep.subr.bf16.mxu1 %v8773_v48  ;;  %7053 = vrsqrt.f32 %v84_v5 }
 0x3cd   :  { %v7052_v2 = vpop.eup %7051 }
 0x3ce   :  { %v7054_v22 = vpop.eup %7053  ;;  %v91_v47 = vmul.f32 %v7052_v2, %v7649_v49 }
 0x3cf   :  { %v92_v45 = vmul.f32 %v7054_v22, %v7654_v19 }
 0x3d0   :  { %v101_v0 = vmul.f32 %v7334_v20, %v91_v47 }
 0x3d1   :  { %v102_v49 = vmul.f32 %v7334_v20, %v92_v45 }
 0x47f   :  { %v1139_v62 = vpop.f32.mrb[28].mxu0 }
 0x480   :  { %v6362_v55 = vpop.f32.mrb[29].mxu0 }
 0x481   :  { %v1142_v53 = vpop.f32.mrb[30].mxu0 }
 0x482   :  { %v1278_v8 = vpack.c.bf16 %v1142_v53, %v1139_v62  ;;  %v6363_v23 = vpop.f32.mrb[31].mxu0 }
 0x483   :  { %v7729_v23 = vpack.c.bf16 %v102_v49, %v101_v0 }
 0x484   :  { %6385 = vmatmul.mubr.msk.bf16.vlgmr.msra.gmra.mrb[36].mxu0 %vm804_vm2, %v1278_v8 }
 0x485   :  { %6395 = vmatpush3.bf16.msra.mxu0 %v7702_v51  ;;  %6396 = vmatprep.mubr.msk.bf16.mxu0 %vm7220_vm1, %v8773_v48 }
 0x486   :  { %6406 = vmatprep.subr.bf16.mxu0 %v8773_v48 }
 0x48d   :  { %v1183_v56 = vpop.f32.mrb[36].mxu1 }
 0x48e   :  { %v6368_v11 = vpop.f32.mrb[37].mxu1 }
 0x48f   :  { %v1186_v52 = vpop.f32.mrb[38].mxu1 }
 0x490   :  { %v1279_v13 = vpack.c.bf16 %v1186_v52, %v1183_v56  ;;  %v6369_v1 = vpop.f32.mrb[39].mxu1 }
 0x491   :  { %v1227_v3 = vpop.f32.mrb[32].mxu0 }
 0x492   :  { %v6374_v54 = vpop.f32.mrb[33].mxu0  ;;  %6391 = vmatmul.mubr.msk.bf16.vlgmr.msra.gmra.mrb[44].mxu1 %vm804_vm2, %v1279_v13 }
 0x493   :  { %v1230_v57 = vpop.f32.mrb[34].mxu0  ;;  %6401 = vmatpush3.bf16.msra.mxu1 %v7713_v61  ;;  %6402 = vmatprep.mubr.msk.bf16.mxu1 %vm7220_vm1, %v8773_v48 }
 0x494   :  { %v1280_v62 = vpack.c.bf16 %v1230_v57, %v1227_v3  ;;  %v6375_v15 = vpop.f32.mrb[35].mxu0  ;;  %6414 = vmatprep.subr.bf16.mxu1 %v8773_v48 }
 0x495   :  { %v1271_v55 = vpop.f32.mrb[40].mxu1 }
 0x496   :  { %v6380_v53 = vpop.f32.mrb[41].mxu1  ;;  %6397 = vmatmul.mubr.msk.bf16.vlgmr.msra.gmra.mrb[40].mxu0 %vm804_vm2, %v1280_v62 }
 0x497   :  { %v1274_v19 = vpop.f32.mrb[42].mxu1  ;;  %6407 = vmatpush3.bf16.msra.mxu0 %v7300_v6  ;;  %6410 = vmatprep.mubr.msk.bf16.mxu0 %vm7220_vm1, %v8773_v48 }
 0x498   :  { %v1281_v5 = vpack.c.bf16 %v1274_v19, %v1271_v55  ;;  %v6381_v8 = vpop.f32.mrb[43].mxu1  ;;  %6408 = vmatprep.subr.bf16.mxu0 %v8773_v48 }
 0x49a   :  { %6403 = vmatmul.mubr.msk.bf16.vlgmr.msra.gmra.mrb[48].mxu1 %vm804_vm2, %v1281_v5 }
 0x49b   :  { %6409 = vmatpush3.bf16.msra.mxu0 %v7316_v9  ;;  %6415 = vmatpush3.bf16.msra.mxu1 %v7341_v24 }
 0x49c   :  { %6416 = vmatprep.subr.bf16.mxu1 %v8773_v48  ;;  %6422 = vmatprep.subr.bf16.mxu0 %v8773_v48 }
 0x49d   :  { %6418 = vmatprep.mubr.msk.bf16.mxu1 %vm7220_vm1, %v8773_v48 }
 0x49e   :  { %6411 = vmatmul.mubr.msk.bf16.vlgmr.msra.gmra.mrb[44].mxu0 %vm63_vm0, %v7729_v23 }
 0x49f   :  { %6417 = vmatpush3.bf16.msra.mxu1 %v7359_v27  ;;  %6423 = vmatpush3.bf16.msra.mxu0 %v7305_v7 }
 0x4a0   :  { %6424 = vmatprep.subr.bf16.mxu0 %v8773_v48  ;;  %6430 = vmatprep.subr.bf16.mxu1 %v8773_v48 }
 0x4a1   :  { %6426 = vmatprep.mubr.msk.bf16.mxu0 %vm7220_vm1, %v8773_v48 }
 0x4a2   :  { %6419 = vmatmul.mubr.msk.bf16.vlgmr.msra.gmra.mrb[52].mxu1 %vm63_vm0, %v7729_v23 }
 0x4a3   :  { %6425 = vmatpush3.bf16.msra.mxu0 %v7321_v10  ;;  %6431 = vmatpush3.bf16.msra.mxu1 %v7377_v29 }
 0x4a4   :  { %6432 = vmatprep.subr.bf16.mxu1 %v8773_v48  ;;  %6438 = vmatprep.subr.bf16.mxu0 %v8773_v48 }
 0x4a5   :  { %6434 = vmatprep.mubr.msk.bf16.mxu1 %vm7220_vm1, %v8773_v48 }
 0x4a6   :  { %6427 = vmatmul.mubr.msk.bf16.vlgmr.msra.gmra.mrb[48].mxu0 %vm63_vm0, %v7729_v23 }
 0x4a7   :  { %6433 = vmatpush3.bf16.msra.mxu1 %v7395_v31  ;;  %6439 = vmatpush3.bf16.msra.mxu0 %v7346_v25 }
 0x4a8   :  { %6440 = vmatprep.subr.bf16.mxu0 %v8773_v48  ;;  %6446 = vmatprep.subr.bf16.mxu1 %v8773_v48 }
 0x4a9   :  { %6442 = vmatprep.mubr.msk.bf16.mxu0 %vm7220_vm1, %v8773_v48 }
 0x4aa   :  { %6435 = vmatmul.mubr.msk.bf16.vlgmr.msra.gmra.mrb[56].mxu1 %vm63_vm0, %v7729_v23 }
 0x4ab   :  { %6441 = vmatpush3.bf16.msra.mxu0 %v7364_v28  ;;  %6447 = vmatpush3.bf16.msra.mxu1 %v7413_v33 }
 0x4ac   :  { %6448 = vmatprep.subr.bf16.mxu1 %v8773_v48  ;;  %6454 = vmatprep.subr.bf16.mxu0 %v8773_v48 }
 0x4ad   :  { %6450 = vmatprep.mubr.msk.bf16.mxu1 %vm7220_vm1, %v8773_v48 }
 0x4ae   :  { %6443 = vmatmul.mubr.msk.bf16.vlgmr.msra.gmra.mrb[52].mxu0 %vm63_vm0, %v7729_v23 }
 0x4af   :  { %6449 = vmatpush3.bf16.msra.mxu1 %v7431_v35  ;;  %6455 = vmatpush3.bf16.msra.mxu0 %v7382_v30 }
 0x4b0   :  { %6456 = vmatprep.subr.bf16.mxu0 %v8773_v48  ;;  %6462 = vmatprep.subr.bf16.mxu1 %v8773_v48 }
 0x4b1   :  { %6458 = vmatprep.mubr.msk.bf16.mxu0 %vm7220_vm1, %v8773_v48 }
 0x4b2   :  { %6451 = vmatmul.mubr.msk.bf16.vlgmr.msra.gmra.mrb[60].mxu1 %vm63_vm0, %v7729_v23 }
 0x4b3   :  { %6457 = vmatpush3.bf16.msra.mxu0 %v7400_v32  ;;  %6463 = vmatpush3.bf16.msra.mxu1 %v7449_v37 }
 0x4b4   :  { %6464 = vmatprep.subr.bf16.mxu1 %v8773_v48  ;;  %6470 = vmatprep.subr.bf16.mxu0 %v8773_v48 }
 0x4b5   :  { %6466 = vmatprep.mubr.msk.bf16.mxu1 %vm7220_vm1, %v8773_v48 }
 0x4b6   :  { %6459 = vmatmul.mubr.msk.bf16.vlgmr.msra.gmra.mrb[56].mxu0 %vm63_vm0, %v7729_v23 }
 0x4b7   :  { %6465 = vmatpush3.bf16.msra.mxu1 %v7467_v39  ;;  %6471 = vmatpush3.bf16.msra.mxu0 %v7418_v34 }
 0x4b8   :  { %6472 = vmatprep.subr.bf16.mxu0 %v8773_v48  ;;  %6478 = vmatprep.subr.bf16.mxu1 %v8773_v48 }
 0x4b9   :  { %6474 = vmatprep.mubr.msk.bf16.mxu0 %vm7220_vm1, %v8773_v48 }
 0x4ba   :  { %6467 = vmatmul.mubr.msk.bf16.vlgmr.msra.gmra.mrb[64].mxu1 %vm63_vm0, %v7729_v23 }
 0x4bb   :  { %6473 = vmatpush3.bf16.msra.mxu0 %v7436_v36  ;;  %6479 = vmatpush3.bf16.msra.mxu1 %v7485_v41 }
 0x4bc   :  { %6480 = vmatprep.subr.bf16.mxu1 %v8773_v48  ;;  %6486 = vmatprep.subr.bf16.mxu0 %v8773_v48 }
 0x4bd   :  { %6482 = vmatprep.mubr.msk.bf16.mxu1 %vm7220_vm1, %v8773_v48 }
 0x4be   :  { %6475 = vmatmul.mubr.msk.bf16.vlgmr.msra.gmra.mrb[60].mxu0 %vm63_vm0, %v7729_v23 }
 0x4bf   :  { %6481 = vmatpush3.bf16.msra.mxu1 %v7497_v42  ;;  %6487 = vmatpush3.bf16.msra.mxu0 %v7454_v38 }
 0x4c0   :  { %6488 = vmatprep.subr.bf16.mxu0 %v8773_v48  ;;  %6494 = vmatprep.subr.bf16.mxu1 %v8773_v48 }
 0x4c1   :  { %6490 = vmatprep.mubr.msk.bf16.mxu0 %vm7220_vm1, %v8773_v48 }
 0x4c2   :  { %6483 = vmatmul.mubr.msk.bf16.vlgmr.msra.gmra.mrb[68].mxu1 %vm63_vm0, %v7729_v23 }
 0x4c3   :  { %6489 = vmatpush3.bf16.msra.mxu0 %v7472_v40  ;;  %6495 = vmatpush3.bf16.msra.mxu1 %v7508_v43 }
 0x4c4   :  { %6496 = vmatprep.subr.bf16.mxu1 %v8773_v48  ;;  %6498 = vmatprep.mubr.msk.bf16.mxu1 %vm7220_vm1, %v8773_v48 }
 0x4c5   :  { %6502 = vmatprep.subr.bf16.mxu0 %v8773_v48 }
 0x4c6   :  { %6491 = vmatmul.mubr.msk.bf16.vlgmr.msra.gmra.mrb[64].mxu0 %vm63_vm0, %v7729_v23 }
 0x4c7   :  { %6497 = vmatpush3.bf16.msra.mxu1 %v7517_v44  ;;  %6504 = vmatprep.mubr.msk.bf16.mxu0 %vm7220_vm1, %v8773_v48 }
 0x4c8   :  { %6508 = vmatprep.subr.bf16.mxu1 %v8773_v48 }
 0x4ca   :  { %6499 = vmatmul.mubr.msk.bf16.vlgmr.msra.gmra.mrb[72].mxu1 %vm63_vm0, %v7729_v23 }
 0x4cb   :  { %6510 = vmatprep.mubr.msk.bf16.mxu1 %vm7220_vm1, %v8773_v48 }
 0x557   :  { %v1323_v6 = vpop.f32.mrb[36].mxu0 }
 0x558   :  { %v6386_v7 = vpop.f32.mrb[37].mxu0  ;;  %v1471_v24 = vsel %vm63_vm0, %v1323_v6, 0.0 }
 0x559   :  { %v1326_v9 = vpop.f32.mrb[38].mxu0 }
 0x55a   :  { %v6387_v10 = vpop.f32.mrb[39].mxu0  ;;  %v1478_v30 = vsel %vm63_vm0, %v1326_v9, 0.0 }
 0x565   :  { %v1370_v20 = vpop.f32.mrb[44].mxu1 }
 0x566   :  { %v1472_v25 = vsel %vm63_vm0, %v1370_v20, 0.0  ;;  %v6392_v27 = vpop.f32.mrb[45].mxu1 }
 0x567   :  { %v1473_v28 = vadd.f32 %v1472_v25, %v1471_v24  ;;  %v1373_v29 = vpop.f32.mrb[46].mxu1 }
 0x568   :  { %v1479_v31 = vsel %vm63_vm0, %v1373_v29, 0.0  ;;  %v6393_v32 = vpop.f32.mrb[47].mxu1 }
 0x569   :  { %v1480_v33 = vadd.f32 %v1479_v31, %v1478_v30  ;;  %v1417_v34 = vpop.f32.mrb[40].mxu0 }
 0x56a   :  { %v1474_v35 = vsel %vm63_vm0, %v1417_v34, 0.0  ;;  %v6398_v36 = vpop.f32.mrb[41].mxu0 }
 0x56b   :  { %v1475_v37 = vadd.f32 %v1474_v35, %v1473_v28  ;;  %v1420_v38 = vpop.f32.mrb[42].mxu0 }
 0x56c   :  { %v1481_v39 = vsel %vm63_vm0, %v1420_v38, 0.0  ;;  %v6399_v40 = vpop.f32.mrb[43].mxu0 }
 0x56d   :  { %v1482_v41 = vadd.f32 %v1481_v39, %v1480_v33  ;;  %v1464_v42 = vpop.f32.mrb[48].mxu1 }
 0x56e   :  { %v1476_v43 = vsel %vm63_vm0, %v1464_v42, 0.0  ;;  %v6404_v44 = vpop.f32.mrb[49].mxu1 }
 0x56f   :  { %v7835_v56 = vadd.f32 %v1476_v43, %v1475_v37  ;;  %v1467_v46 = vpop.f32.mrb[50].mxu1 }
 0x570   :  { %v1483_v2 = vsel %vm63_vm0, %v1467_v46, 0.0  ;;  %v6405_v11 = vpop.f32.mrb[51].mxu1 }
 0x571   :  { %v7838_v22 = vadd.f32 %v1483_v2, %v1482_v41  ;;  %v1522_v52 = vpop.f32.mrb[44].mxu0 }
 0x572   :  { %v6412_v13 = vpop.f32.mrb[45].mxu0 }
 0x573   :  { %v1525_v1 = vpop.f32.mrb[46].mxu0 }
 0x574   :  { %v1980_v3 = vpack.c.bf16 %v1525_v1, %v1522_v52  ;;  %v6413_v47 = vpop.f32.mrb[47].mxu0 }
 0x575   :  { %v1563_v45 = vpop.f32.mrb[52].mxu1 }
 0x576   :  { %v6420_v54 = vpop.f32.mrb[53].mxu1 }
 0x577   :  { %v1566_v57 = vpop.f32.mrb[54].mxu1 }
 0x578   :  { %v1981_v62 = vpack.c.bf16 %v1566_v57, %v1563_v45  ;;  %v6421_v15 = vpop.f32.mrb[55].mxu1 }
 0x579   :  { %v1604_v55 = vpop.f32.mrb[48].mxu0 }
 0x57a   :  { %v6428_v0 = vpop.f32.mrb[49].mxu0 }
 0x57b   :  { %v1607_v49 = vpop.f32.mrb[50].mxu0 }
 0x57c   :  { %v1982_v53 = vpack.c.bf16 %v1607_v49, %v1604_v55  ;;  %v6429_v19 = vpop.f32.mrb[51].mxu0 }
 0x57d   :  { %v1645_v5 = vpop.f32.mrb[56].mxu1 }
 0x57e   :  { %v6436_v8 = vpop.f32.mrb[57].mxu1 }
 0x57f   :  { %v1648_v23 = vpop.f32.mrb[58].mxu1 }
 0x580   :  { %v1983_v6 = vpack.c.bf16 %v1648_v23, %v1645_v5  ;;  %v6437_v7 = vpop.f32.mrb[59].mxu1 }
 0x581   :  { %v1686_v9 = vpop.f32.mrb[52].mxu0 }
 0x582   :  { %v6444_v10 = vpop.f32.mrb[53].mxu0 }
 0x583   :  { %v1689_v20 = vpop.f32.mrb[54].mxu0 }
 0x584   :  { %v1984_v24 = vpack.c.bf16 %v1689_v20, %v1686_v9  ;;  %v6445_v25 = vpop.f32.mrb[55].mxu0 }
 0x585   :  { %v1727_v27 = vpop.f32.mrb[60].mxu1 }
 0x586   :  { %v1992_v28 = vsel %vm804_vm2, %v1984_v24, 0  ;;  %v6452_v29 = vpop.f32.mrb[61].mxu1 }
 0x587   :  { %v1730_v30 = vpop.f32.mrb[62].mxu1  ;;  %6503 = vmatpush3.bf16.xpose.msra.mxu0 %v1992_v28 }
 0x588   :  { %v1985_v31 = vpack.c.bf16 %v1730_v30, %v1727_v27  ;;  %v6453_v32 = vpop.f32.mrb[63].mxu1  ;;  %6514 = vmatprep.subr.bf16.mxu0 %v8773_v48 }
 0x589   :  { %v1768_v33 = vpop.f32.mrb[56].mxu0 }
 0x58a   :  { %v2039_v34 = vsel %vm804_vm2, %v1985_v31, 0  ;;  %v6460_v35 = vpop.f32.mrb[57].mxu0 }
 0x58b   :  { %v1771_v36 = vpop.f32.mrb[58].mxu0  ;;  %6509 = vmatpush3.bf16.xpose.msra.mxu1 %v2039_v34 }
 0x58c   :  { %v1986_v37 = vpack.c.bf16 %v1771_v36, %v1768_v33  ;;  %v6461_v38 = vpop.f32.mrb[59].mxu0  ;;  %6520 = vmatprep.subr.bf16.mxu1 %v8773_v48 }
 0x58d   :  { %v1809_v39 = vpop.f32.mrb[64].mxu1 }
 0x58e   :  { %v2086_v40 = vsel %vm804_vm2, %v1986_v37, 0  ;;  %v6468_v41 = vpop.f32.mrb[65].mxu1  ;;  %6505 = vmatmul.mubr.msk.bf16.vlgmr.msra.gmra.mrb[68].mxu0 %vm804_vm2, %v1980_v3 }
 0x58f   :  { %v1812_v42 = vpop.f32.mrb[66].mxu1  ;;  %6515 = vmatpush3.bf16.xpose.msra.mxu0 %v2086_v40  ;;  %6516 = vmatprep.mubr.msk.bf16.mxu0 %vm7220_vm1, %v8773_v48 }
 0x590   :  { %v1987_v43 = vpack.c.bf16 %v1812_v42, %v1809_v39  ;;  %v6469_v44 = vpop.f32.mrb[67].mxu1  ;;  %6526 = vmatprep.subr.bf16.mxu0 %v8773_v48 }
 0x591   :  { %v1850_v46 = vpop.f32.mrb[60].mxu0 }
 0x592   :  { %v2133_v2 = vsel %vm804_vm2, %v1987_v43, 0  ;;  %v6476_v11 = vpop.f32.mrb[61].mxu0  ;;  %6511 = vmatmul.mubr.msk.bf16.vlgmr.msra.gmra.mrb[76].mxu1 %vm804_vm2, %v1981_v62 }
 0x593   :  { %v1853_v52 = vpop.f32.mrb[62].mxu0  ;;  %6521 = vmatpush3.bf16.xpose.msra.mxu1 %v2133_v2  ;;  %6522 = vmatprep.mubr.msk.bf16.mxu1 %vm7220_vm1, %v8773_v48 }
 0x594   :  { %v2280_v13 = vpack.c.bf16 %v1853_v52, %v1850_v46  ;;  %v6477_v1 = vpop.f32.mrb[63].mxu0  ;;  %6532 = vmatprep.subr.bf16.mxu1 %v8773_v48 }
 0x595   :  { %v1891_v3 = vpop.f32.mrb[68].mxu1 }
 0x596   :  { %v6484_v47 = vpop.f32.mrb[69].mxu1  ;;  %6517 = vmatmul.mubr.msk.bf16.vlgmr.msra.gmra.mrb[72].mxu0 %vm804_vm2, %v1982_v53 }
 0x597   :  { %v1894_v45 = vpop.f32.mrb[70].mxu1  ;;  %6527 = vmatpush3.bf16.msra.mxu0 %v2280_v13  ;;  %6528 = vmatprep.mubr.msk.bf16.mxu0 %vm7220_vm1, %v8773_v48 }
 0x598   :  { %v2281_v54 = vpack.c.bf16 %v1894_v45, %v1891_v3  ;;  %v6485_v57 = vpop.f32.mrb[71].mxu1  ;;  %6538 = vmatprep.subr.bf16.mxu0 %v8773_v48 }
 0x599   :  { %v7858_v62 = vpop.f32.mrb[64].mxu0 }
 0x59a   :  { %v6492_v15 = vpop.f32.mrb[65].mxu0  ;;  %6523 = vmatmul.mubr.msk.bf16.vlgmr.msra.gmra.mrb[80].mxu1 %vm804_vm2, %v1983_v6  ;;  %v2178_v6 = vsub.s32 1, %v7565_v14 }
 0x59b   :  { %v7861_v55 = vpop.f32.mrb[66].mxu0  ;;  %6533 = vmatpush3.bf16.msra.mxu1 %v2281_v54  ;;  %6534 = vmatprep.mubr.msk.bf16.mxu1 %vm7220_vm1, %v8773_v48 }
 0x59c   :  { %v2282_v0 = vpack.c.bf16 %v7861_v55, %v7858_v62  ;;  %v6493_v49 = vpop.f32.mrb[67].mxu0  ;;  %6544 = vmatprep.subr.bf16.mxu1 %v8773_v48  ;;  %v7876_v7 = vrot.slane %v7569_v16, %v2178_v6 }
 0x59d   :  { %v7868_v53 = vpop.f32.mrb[72].mxu1 }
 0x59e   :  { %v6500_v19 = vpop.f32.mrb[73].mxu1 }
 0x59f   :  { %v7870_v5 = vpop.f32.mrb[74].mxu1 }
 0x5a0   :  { %v2283_v8 = vpack.c.bf16 %v7870_v5, %v7868_v53  ;;  %v6501_v23 = vpop.f32.mrb[75].mxu1 }
 0x661   :  { %v2028_v9 = vpop.f32.mrb[68].mxu0 }
 0x662   :  { %v2029_v10 = vadd.f32 %v2028_v9, %v7574_v17  ;;  %v6506_v20 = vpop.f32.mrb[69].mxu0 }
 0x663   :  { %v2031_v24 = vpop.f32.mrb[70].mxu0 }
 0x664   :  { %v2032_v25 = vadd.f32 %v2031_v24, %v7582_v21  ;;  %v6507_v27 = vpop.f32.mrb[71].mxu0  ;;  %v2180_v28 = vadd.f32 %v7876_v7, %v2029_v10 }
 0x665   :  { %v2075_v29 = vpop.f32.mrb[76].mxu1 }
 0x666   :  { %v2076_v30 = vadd.f32 %v2075_v29, %v7598_v59  ;;  %v6512_v31 = vpop.f32.mrb[77].mxu1  ;;  %v2188_v32 = vsel %vm1005_vm4, %v2180_v28, -inf  ;;  %v2181_v14 = vadd.f32 %v7876_v7, %v2032_v25 }
 0x667   :  { %2189 = vmax.xlane.f32.xlu0 %v2188_v32  ;;  %v2078_v16 = vpop.f32.mrb[78].mxu1 }
 0x668   :  { %v2079_v33 = vadd.f32 %v2078_v16, %v7608_v63  ;;  %v6513_v17 = vpop.f32.mrb[79].mxu1  ;;  %v2191_v34 = vsel %vm1005_vm4, %v2181_v14, -inf  ;;  %v2182_v21 = vadd.f32 %v7876_v7, %v2076_v30 }
 0x669   :  { %2192 = vmax.xlane.f32.xlu1 %v2191_v34  ;;  %v2122_v35 = vpop.f32.mrb[72].mxu0 }
 0x66a   :  { %v2123_v36 = vadd.f32 %v2122_v35, %v7593_v58  ;;  %v6518_v37 = vpop.f32.mrb[73].mxu0  ;;  %v2194_v59 = vsel %vm1005_vm4, %v2182_v21, -inf  ;;  %v2183_v38 = vadd.f32 %v7876_v7, %v2079_v33 }
 0x66b   :  { %v2125_v39 = vpop.f32.mrb[74].mxu0  ;;  %2195 = vmax.xlane.f32.xlu0 %v2194_v59 }
 0x66c   :  { %v2126_v40 = vadd.f32 %v2125_v39, %v7603_v60  ;;  %v6519_v41 = vpop.f32.mrb[75].mxu0  ;;  %v2197_v63 = vsel %vm1005_vm4, %v2183_v38, -inf  ;;  %v2184_v42 = vadd.f32 %v7876_v7, %v2123_v36 }
 0x66d   :  { %2198 = vmax.xlane.f32.xlu1 %v2197_v63  ;;  %v2169_v43 = vpop.f32.mrb[80].mxu1  ;;  %v7183_v41 = vld [vmem:[%s8753_s1] sm:$0xff] }
 0x66e   :  { %v2170_v44 = vadd.f32 %v2169_v43, %v7621_v26  ;;  %v6524_v46 = vpop.f32.mrb[81].mxu1  ;;  %v2200_v58 = vsel %vm1005_vm4, %v2184_v42, -inf  ;;  %v2185_v2 = vadd.f32 %v7876_v7, %v2126_v40  ;;  %v7910_v63 = vadd.f32 %v7183_v41, %v7835_v56 }
 0x66f   :  { %2201 = vmax.xlane.f32.xlu0 %v2200_v58  ;;  %v2172_v11 = vpop.f32.mrb[82].mxu1 }
 0x670   :  { %v2173_v52 = vadd.f32 %v2172_v11, %v7628_v50  ;;  %v6525_v13 = vpop.f32.mrb[83].mxu1  ;;  %v2203_v60 = vsel %vm1005_vm4, %v2185_v2, -inf  ;;  %v2186_v1 = vadd.f32 %v7876_v7, %v2170_v44  ;;  %v7184_v44 = vld [vmem:[%s8753_s1 + $0x8] sm:$0xff]  ;;  %v2659_v56 = vmul.f32 %v7910_v63, %v7910_v63 }
 0x671   :  { %2204 = vmax.xlane.f32.xlu1 %v2203_v60  ;;  %v7917_v46 = vadd.f32 %v7184_v44, %v7838_v22 }
 0x672   :  { %v2206_v3 = vsel %vm1005_vm4, %v2186_v1, -inf  ;;  %v2187_v47 = vadd.f32 %v7876_v7, %v2173_v52  ;;  %v2663_v22 = vsel %vm63_vm0, %v2659_v56, 0.0 }
 0x673   :  { %2207 = vmax.xlane.f32.xlu0 %v2206_v3  ;;  %v2660_v60 = vmul.f32 %v7917_v46, %v7917_v46 }
 0x674   :  { %v2209_v26 = vsel %vm1005_vm4, %v2187_v47, -inf }
 0x675   :  { %2210 = vmax.xlane.f32.xlu1 %v2209_v26 }
 0x6f4   :  { %v2190_v45 = vpop.xlane.xlu0 %2189 }
 0x6f5   :  { %v2212_v54 = vsub.f32 %v2180_v28, %v2190_v45 }
 0x6f6   :  { %v2193_v57 = vpop.xlane.xlu1 %2192 }
 0x6f7   :  { %v2220_v15 = vmul.f32 1.442695, %v2212_v54  ;;  %v2213_v49 = vsub.f32 %v2181_v14, %v2193_v57 }
 0x6f8   :  { %v2196_v50 = vpop.xlane.xlu0 %2195 }
 0x6f9   :  { %7055 = vpow2.f32 %v2220_v15  ;;  %v2222_v19 = vmul.f32 1.442695, %v2213_v49  ;;  %v2214_v23 = vsub.f32 %v2182_v21, %v2196_v50 }
 0x6fa   :  { %v2199_v6 = vpop.xlane.xlu1 %2198 }
 0x6fb   :  { %7057 = vpow2.f32 %v2222_v19  ;;  %v2224_v9 = vmul.f32 1.442695, %v2214_v23  ;;  %v2215_v10 = vsub.f32 %v2183_v38, %v2199_v6 }
 0x6fc   :  { %v2202_v20 = vpop.xlane.xlu0 %2201 }
 0x6fd   :  { %7059 = vpow2.f32 %v2224_v9  ;;  %v2226_v24 = vmul.f32 1.442695, %v2215_v10  ;;  %v2216_v25 = vsub.f32 %v2184_v42, %v2202_v20 }
 0x6fe   :  { %v2205_v27 = vpop.xlane.xlu1 %2204 }
 0x6ff   :  { %7061 = vpow2.f32 %v2226_v24  ;;  %v2228_v29 = vmul.f32 1.442695, %v2216_v25  ;;  %v2217_v30 = vsub.f32 %v2185_v2, %v2205_v27 }
 0x700   :  { %v2208_v28 = vpop.xlane.xlu0 %2207 }
 0x701   :  { %7063 = vpow2.f32 %v2228_v29  ;;  %v2230_v31 = vmul.f32 1.442695, %v2217_v30  ;;  %v2218_v32 = vsub.f32 %v2186_v1, %v2208_v28  ;;  %v2666_v1 = vsel %vm63_vm0, %v2660_v60, 0.0 }
 0x702   :  { %v2211_v14 = vpop.xlane.xlu1 %2210 }
 0x703   :  { %v7056_v16 = vpop.eup %7055  ;;  %7065 = vpow2.f32 %v2230_v31  ;;  %v2232_v33 = vmul.f32 1.442695, %v2218_v32  ;;  %v2219_v17 = vsub.f32 %v2187_v47, %v2211_v14 }
 0x704   :  { %v2236_v34 = vsel %vm1005_vm4, %v7056_v16, 0.0 }
 0x705   :  { %v7058_v21 = vpop.eup %7057  ;;  %7067 = vpow2.f32 %v2232_v33  ;;  %v2234_v35 = vmul.f32 1.442695, %v2219_v17  ;;  %2237 = vadd.xlane.f32.xlu0 %v2236_v34 }
 0x706   :  { %v2239_v36 = vsel %vm1005_vm4, %v7058_v21, 0.0 }
 0x707   :  { %v7060_v37 = vpop.eup %7059  ;;  %7069 = vpow2.f32 %v2234_v35  ;;  %2240 = vadd.xlane.f32.xlu1 %v2239_v36 }
 0x708   :  { %v2242_v59 = vsel %vm1005_vm4, %v7060_v37, 0.0 }
 0x709   :  { %v7062_v38 = vpop.eup %7061  ;;  %2243 = vadd.xlane.f32.xlu0 %v2242_v59 }
 0x70a   :  { %v2245_v39 = vsel %vm1005_vm4, %v7062_v38, 0.0 }
 0x70b   :  { %v7064_v40 = vpop.eup %7063  ;;  %2246 = vadd.xlane.f32.xlu1 %v2245_v39 }
 0x70c   :  { %v2248_v42 = vsel %vm1005_vm4, %v7064_v40, 0.0 }
 0x70d   :  { %v7066_v43 = vpop.eup %7065  ;;  %2249 = vadd.xlane.f32.xlu0 %v2248_v42 }
 0x70e   :  { %v2251_v58 = vsel %vm1005_vm4, %v7066_v43, 0.0 }
 0x70f   :  { %v7068_v2 = vpop.eup %7067  ;;  %2252 = vadd.xlane.f32.xlu1 %v2251_v58  ;;  %v7961_v58 = vld [vmem:[%s8760_s8] ss:$0 sm:$0xff] }
 0x710   :  { %v2254_v11 = vsel %vm1005_vm4, %v7068_v2, 0.0 }
 0x711   :  { %v7070_v52 = vpop.eup %7069  ;;  %2255 = vadd.xlane.f32.xlu0 %v2254_v11 }
 0x712   :  { %v2257_v13 = vsel %vm1005_vm4, %v7070_v52, 0.0 }
 0x713   :  { %2258 = vadd.xlane.f32.xlu1 %v2257_v13 }
 0x715   :  { %2664 = vadd.xlane.f32.xlu0 %v2663_v22 }
 0x717   :  { %2667 = vadd.xlane.f32.xlu1 %v2666_v1 }
 0x792   :  { %v2238_v3 = vpop.xlane.xlu0 %2237 }
 0x793   :  { %7071 = vrcp.f32 %v2238_v3 }
 0x794   :  { %v2241_v47 = vpop.xlane.xlu1 %2240 }
 0x795   :  { %7073 = vrcp.f32 %v2241_v47 }
 0x796   :  { %v2244_v26 = vpop.xlane.xlu0 %2243 }
 0x797   :  { %7075 = vrcp.f32 %v2244_v26 }
 0x798   :  { %v2247_v45 = vpop.xlane.xlu1 %2246 }
 0x799   :  { %7077 = vrcp.f32 %v2247_v45 }
 0x79a   :  { %v2250_v54 = vpop.xlane.xlu0 %2249 }
 0x79b   :  { %7079 = vrcp.f32 %v2250_v54 }
 0x79c   :  { %v2253_v57 = vpop.xlane.xlu1 %2252 }
 0x79d   :  { %v7072_v15 = vpop.eup %7071  ;;  %7081 = vrcp.f32 %v2253_v57 }
 0x79e   :  { %v2256_v49 = vpop.xlane.xlu0 %2255  ;;  %v2261_v19 = vmul.f32 %v7072_v15, %v7056_v16 }
 0x79f   :  { %v7074_v50 = vpop.eup %7073  ;;  %7083 = vrcp.f32 %v2256_v49 }
 0x7a0   :  { %v2263_v23 = vmul.f32 %v7074_v50, %v7058_v21  ;;  %v2259_v6 = vpop.xlane.xlu1 %2258 }
 0x7a1   :  { %v7076_v9 = vpop.eup %7075  ;;  %7085 = vrcp.f32 %v2259_v6 }
 0x7a2   :  { %v2276_v10 = vpack.c.bf16 %v2263_v23, %v2261_v19  ;;  %v2265_v24 = vmul.f32 %v7076_v9, %v7060_v37  ;;  %v2665_v5 = vpop.xlane.xlu0 %2664 }
 0x7a3   :  { %v7078_v20 = vpop.eup %7077  ;;  %v2675_v33 = vmul.f32 0.03125, %v2665_v5 }
 0x7a4   :  { %v2267_v25 = vmul.f32 %v7078_v20, %v7062_v38  ;;  %6529 = vmatmul.mubr.msk.bf16.vlgmr.msra.gmra.mrb[76].mxu0 %vm1005_vm4, %v2276_v10  ;;  %v2668_v53 = vpop.xlane.xlu1 %2667 }
 0x7a5   :  { %v7080_v27 = vpop.eup %7079  ;;  %6539 = vmatpush3.bf16.msra.mxu0 %v2282_v0  ;;  %6540 = vmatprep.mubr.msk.bf16.mxu0 %vm7220_vm1, %v8773_v48  ;;  %v2679_v17 = vadd.f32 1e-06, %v2675_v33 }
 0x7a6   :  { %v2277_v29 = vpack.c.bf16 %v2267_v25, %v2265_v24  ;;  %6550 = vmatprep.subr.bf16.mxu0 %v8773_v48  ;;  %v2269_v28 = vmul.f32 %v7080_v27, %v7064_v40 }
 0x7a7   :  { %v7082_v30 = vpop.eup %7081 }
 0x7a8   :  { %v2271_v31 = vmul.f32 %v7082_v30, %v7066_v43  ;;  %6535 = vmatmul.mubr.msk.bf16.vlgmr.msra.gmra.mrb[84].mxu1 %vm1005_vm4, %v2277_v29 }
 0x7a9   :  { %v7084_v32 = vpop.eup %7083  ;;  %6545 = vmatpush3.bf16.msra.mxu1 %v2283_v8  ;;  %6546 = vmatprep.mubr.msk.bf16.mxu1 %vm7220_vm1, %v8773_v48  ;;  %v2676_v8 = vmul.f32 0.03125, %v2668_v53 }
 0x7aa   :  { %v2278_v62 = vpack.c.bf16 %v2271_v31, %v2269_v28  ;;  %6556 = vmatprep.subr.bf16.mxu1 %v8773_v48  ;;  %v2273_v0 = vmul.f32 %v7084_v32, %v7068_v2 }
 0x7ab   :  { %v7086_v55 = vpop.eup %7085 }
 0x7ac   :  { %v2275_v14 = vmul.f32 %v7086_v55, %v7070_v52  ;;  %6541 = vmatmul.mubr.msk.bf16.vlgmr.msra.gmra.mrb[80].mxu0 %vm1005_vm4, %v2278_v62 }
 0x7ad   :  { %6551 = vmatpush3.bf16.msra.mxu0 %v7686_v4  ;;  %6552 = vmatprep.mubr.msk.bf16.mxu0 %vm7220_vm1, %v8773_v48  ;;  %v2680_v4 = vadd.f32 1e-06, %v2676_v8 }
 0x7ae   :  { %v2279_v16 = vpack.c.bf16 %v2275_v14, %v2273_v0  ;;  %6562 = vmatprep.subr.bf16.mxu0 %v8773_v48 }
 0x7af   :  { %7087 = vrsqrt.f32 %v2680_v4  ;;  %v7185_v4 = vld [vmem:[%s8753_s1 + $0x10] sm:$0xff] }
 0x7b0   :  { %6547 = vmatmul.mubr.msk.bf16.vlgmr.msra.gmra.mrb[88].mxu1 %vm1005_vm4, %v2279_v16  ;;  %7089 = vrsqrt.f32 %v2679_v17 }
 0x7b1   :  { %6557 = vmatpush3.bf16.msra.mxu1 %v7694_v12  ;;  %6558 = vmatprep.mubr.msk.bf16.mxu1 %vm7220_vm1, %v8773_v48 }
 0x7b2   :  { %6568 = vmatprep.subr.bf16.mxu1 %v8773_v48 }
 0x7b9   :  { %v7088_v21 = vpop.eup %7087 }
 0x7ba   :  { %v7090_v37 = vpop.eup %7089  ;;  %v2688_v39 = vmul.f32 %v7088_v21, %v7917_v46  ;;  %v7186_v21 = vld [vmem:[%s8753_s1 + $0x18] sm:$0xff] }
 0x7bb   :  { %v2687_v42 = vmul.f32 %v7090_v37, %v7910_v63 }
 0x7bc   :  { %v2698_v11 = vmul.f32 %v7961_v58, %v2688_v39  ;;  %v6980_v39 = vld [vmem:[%s8761_s9 + $0x8] sm:$0xff]  }
 0x877   :  { %v2321_v34 = vpop.f32.mrb[76].mxu0 }
 0x878   :  { %v6530_v35 = vpop.f32.mrb[77].mxu0 }
 0x879   :  { %v2324_v36 = vpop.f32.mrb[78].mxu0 }
 0x87a   :  { %v2460_v59 = vpack.c.bf16 %v2324_v36, %v2321_v34  ;;  %v6531_v12 = vpop.f32.mrb[79].mxu0 }
 0x87b   :  { %v2365_v38 = vpop.f32.mrb[84].mxu1 }
 0x87c   :  { %v6536_v40 = vpop.f32.mrb[85].mxu1  ;;  %6553 = vmatmul.mubr.msk.bf16.vlgmr.msra.gmra.mrb[84].mxu0 %vm804_vm2, %v2460_v59 }
 0x87d   :  { %v2368_v41 = vpop.f32.mrb[86].mxu1  ;;  %6563 = vmatpush3.bf16.msra.mxu0 %v7702_v51  ;;  %6564 = vmatprep.mubr.msk.bf16.mxu0 %vm7220_vm1, %v8773_v48  ;;  %v2697_v51 = vmul.f32 %v7961_v58, %v2687_v42  ;;  %v6981_v40 = vld [vmem:[%s8762_s10] sm:$0xff]  }
 0x87e   :  { %v2461_v43 = vpack.c.bf16 %v2368_v41, %v2365_v38  ;;  %v6537_v44 = vpop.f32.mrb[87].mxu1  ;;  %v6979_v38 = vld [vmem:[%s8761_s9] sm:$0xff]   ;;  %v6982_v41 = vld [vmem:[%s8762_s10 + $0x8] sm:$0xff]  }
 0x87f   :  { %v2409_v2 = vpop.f32.mrb[80].mxu0  ;;  %v2701_v1 = vpack.c.bf16 %v2698_v11, %v2697_v51  ;;  %6574 = vmatprep.subr.bf16.mxu0 %v6979_v38 }
 0x880   :  { %v6542_v56 = vpop.f32.mrb[81].mxu0  ;;  %6559 = vmatmul.mubr.msk.bf16.vlgmr.msra.gmra.mrb[92].mxu1 %vm804_vm2, %v2461_v43 }
 0x881   :  { %v2412_v52 = vpop.f32.mrb[82].mxu0  ;;  %6569 = vmatpush3.bf16.msra.mxu1 %v7713_v61  ;;  %6570 = vmatprep.mubr.msk.bf16.mxu1 %vm7220_vm1, %v8773_v48 }
 0x882   :  { %v2462_v13 = vpack.c.bf16 %v2412_v52, %v2409_v2  ;;  %v6543_v60 = vpop.f32.mrb[83].mxu0  ;;  %6582 = vmatprep.subr.bf16.mxu1 %v6981_v40 }
 0x883   :  { %v2453_v22 = vpop.f32.mrb[88].mxu1 }
 0x884   :  { %v6548_v3 = vpop.f32.mrb[89].mxu1  ;;  %6565 = vmatmul.mubr.msk.bf16.vlgmr.msra.gmra.mrb[88].mxu0 %vm804_vm2, %v2462_v13 }
 0x885   :  { %v2456_v47 = vpop.f32.mrb[90].mxu1  ;;  %6578 = vmatprep.mubr.msk.bf16.mxu0 %vm63_vm0, %v2701_v1  ;;  %6575 = vmatpush3.bf16.msra.mxu0 %v6979_v38  ;;  %v8101_v38 = vld [vmem:[%s8756_s4 + $0x58] sm:$0xff]  }
 0x886   :  { %v2463_v26 = vpack.c.bf16 %v2456_v47, %v2453_v22  ;;  %v6549_v45 = vpop.f32.mrb[91].mxu1  ;;  %6576 = vmatprep.subr.bf16.mxu0 %v6980_v39  ;;  %v6983_v47 = vld [vmem:[%s8762_s10 + $0x10] sm:$0xff]  }
 0x888   :  { %6571 = vmatmul.mubr.msk.bf16.vlgmr.msra.gmra.mrb[96].mxu1 %vm804_vm2, %v2463_v26  ;;  %v6984_v26 = vld [vmem:[%s8762_s10 + $0x18] sm:$0xff]  }
 0x889   :  { %6577 = vmatpush3.bf16.msra.mxu0 %v6980_v39  ;;  %6583 = vmatpush3.bf16.msra.mxu1 %v6981_v40  ;;  %v8106_v39 = vld [vmem:[%s8757_s5 + $0x48] sm:$0xff]   ;;  %v8119_v40 = vld [vmem:[%s8756_s4 + $0x70] sm:$0xff]  }
 0x88a   :  { %6594 = vmatprep.subr.bf16.mxu0 %v8773_v48  ;;  %6584 = vmatprep.subr.bf16.mxu1 %v6982_v41 }
 0x88d   :  { %6585 = vmatpush3.bf16.msra.mxu1 %v6982_v41  ;;  %v8124_v41 = vld [vmem:[%s8757_s5 + $0x60] sm:$0xff]  }
 0x88e   :  { %6586 = vmatprep.subr.bf16.mxu1 %v6983_v47 }
 0x891   :  { %6587 = vmatpush3.bf16.msra.mxu1 %v6983_v47  ;;  %v8259_v47 = vld [vmem:[%s8758_s6 + $0x78] sm:$0xff]  }
 0x892   :  { %6588 = vmatprep.subr.bf16.mxu1 %v6984_v26 }
 0x895   :  { %6589 = vmatpush3.bf16.msra.mxu1 %v6984_v26 }
 0x896   :  { %6610 = vmatprep.subr.bf16.mxu1 %v8773_v48 }
 0x94f   :  { %v2501_v61 = vpop.f32.mrb[84].mxu0 }
 0x950   :  { %v6554_v54 = vpop.f32.mrb[85].mxu0  ;;  %v2640_v50 = vsel %vm63_vm0, %v2501_v61, 0.0 }
 0x951   :  { %v2504_v57 = vpop.f32.mrb[86].mxu0 }
 0x952   :  { %v6555_v15 = vpop.f32.mrb[87].mxu0  ;;  %v2647_v10 = vsel %vm63_vm0, %v2504_v57, 0.0 }
 0x953   :  { %v2545_v49 = vpop.f32.mrb[92].mxu1 }
 0x954   :  { %v2641_v19 = vsel %vm63_vm0, %v2545_v49, 0.0  ;;  %v6560_v23 = vpop.f32.mrb[93].mxu1 }
 0x955   :  { %v2642_v6 = vadd.f32 %v2641_v19, %v2640_v50  ;;  %v2548_v9 = vpop.f32.mrb[94].mxu1 }
 0x956   :  { %v2648_v20 = vsel %vm63_vm0, %v2548_v9, 0.0  ;;  %v6561_v24 = vpop.f32.mrb[95].mxu1 }
 0x957   :  { %v2649_v25 = vadd.f32 %v2648_v20, %v2647_v10  ;;  %v2589_v27 = vpop.f32.mrb[88].mxu0 }
 0x958   :  { %v2643_v29 = vsel %vm63_vm0, %v2589_v27, 0.0  ;;  %v6566_v30 = vpop.f32.mrb[89].mxu0 }
 0x959   :  { %v2644_v28 = vadd.f32 %v2643_v29, %v2642_v6  ;;  %v2592_v31 = vpop.f32.mrb[90].mxu0 }
 0x95a   :  { %v2650_v32 = vsel %vm63_vm0, %v2592_v31, 0.0  ;;  %v6567_v62 = vpop.f32.mrb[91].mxu0  ;;  %v8060_v31 = vld [vmem:[%s8756_s4 + $0x48] sm:$0xff]  }
 0x95b   :  { %v2651_v55 = vadd.f32 %v2650_v32, %v2649_v25  ;;  %v2633_v0 = vpop.f32.mrb[96].mxu1  ;;  %v8065_v32 = vld [vmem:[%s8756_s4 + $0x68] sm:$0xff]  }
 0x95c   :  { %v2645_v14 = vsel %vm63_vm0, %v2633_v0, 0.0  ;;  %v6572_v16 = vpop.f32.mrb[97].mxu1 }
 0x95d   :  { %v2646_v53 = vadd.f32 %v2645_v14, %v2644_v28  ;;  %v2636_v5 = vpop.f32.mrb[98].mxu1 }
 0x95e   :  { %v2652_v8 = vsel %vm63_vm0, %v2636_v5, 0.0  ;;  %v6573_v33 = vpop.f32.mrb[99].mxu1 }
 0x95f   :  { %v7983_v17 = vadd.f32 %v7185_v4, %v2646_v53  ;;  %v2653_v34 = vadd.f32 %v2652_v8, %v2651_v55  ;;  %v8075_v4 = vld [vmem:[%s8755_s3 + $0x1] ss:$0 sm:$0xff] }
 0x961   :  { %v7988_v35 = vadd.f32 %v7186_v21, %v2653_v34  ;;  %v2661_v36 = vmul.f32 %v7983_v17, %v7983_v17 }
 0x963   :  { %v2669_v37 = vsel %vm63_vm0, %v2661_v36, 0.0  ;;  %v2662_v59 = vmul.f32 %v7988_v35, %v7988_v35 }
 0x964   :  { %2670 = vadd.xlane.f32.xlu0 %v2669_v37  ;;  %v8083_v37 = vld [vmem:[%s8756_s4 + $0x50] sm:$0xff]  }
 0x965   :  { %v2672_v12 = vsel %vm63_vm0, %v2662_v59, 0.0  ;;  %v8088_v59 = vld [vmem:[%s8757_s5 + $0x40] sm:$0xff]  }
 0x966   :  { %2673 = vadd.xlane.f32.xlu1 %v2672_v12 }
 0x9f1   :  { %v2671_v42 = vpop.xlane.xlu0 %2670 }
 0x9f2   :  { %v2677_v43 = vmul.f32 0.03125, %v2671_v42  ;;  %v8137_v42 = vld [vmem:[%s8756_s4 + $0x78] sm:$0xff]  }
 0x9f3   :  { %v2674_v44 = vpop.xlane.xlu1 %2673 }
 0x9f4   :  { %v2681_v2 = vadd.f32 1e-06, %v2677_v43  ;;  %v2678_v11 = vmul.f32 0.03125, %v2674_v44  ;;  %v8142_v43 = vld [vmem:[%s8757_s5 + $0x68] sm:$0xff]   ;;  %v8155_v44 = vld [vmem:[%s8757_s5 + $0x50] sm:$0xff]  }
 0x9f6   :  { %7091 = vrsqrt.f32 %v2681_v2  ;;  %v2682_v56 = vadd.f32 1e-06, %v2678_v11  ;;  %v8160_v2 = vld [vmem:[%s8758_s6 + $0x40] sm:$0xff]   ;;  %v8173_v11 = vld [vmem:[%s8757_s5 + $0x58] sm:$0xff]  }
 0x9f8   :  { %7093 = vrsqrt.f32 %v2682_v56  ;;  %v8178_v56 = vld [vmem:[%s8758_s6 + $0x48] sm:$0xff]  }
 0xa00   :  { %v7092_v52 = vpop.eup %7091 }
 0xa01   :  { %v2689_v51 = vmul.f32 %v7092_v52, %v7983_v17  ;;  %v8191_v52 = vld [vmem:[%s8757_s5 + $0x70] sm:$0xff]  }
 0xa02   :  { %v7094_v13 = vpop.eup %7093 }
 0xa03   :  { %v2690_v60 = vmul.f32 %v7094_v13, %v7988_v35  ;;  %v2699_v22 = vmul.f32 %v7961_v58, %v2689_v51  ;;  %v8196_v51 = vld [vmem:[%s8758_s6 + $0x60] sm:$0xff]   ;;  %v8209_v13 = vld [vmem:[%s8757_s5 + $0x78] sm:$0xff]  }
 0xa05   :  { %v2700_v1 = vmul.f32 %v7961_v58, %v2690_v60  ;;  %v8214_v60 = vld [vmem:[%s8758_s6 + $0x68] sm:$0xff]  }
 0xa07   :  { %v2702_v3 = vpack.c.bf16 %v2700_v1, %v2699_v22  ;;  %v8227_v22 = vld [vmem:[%s8758_s6 + $0x50] sm:$0xff]   ;;  %v8239_v1 = vld [vmem:[%s8758_s6 + $0x58] sm:$0xff]  }
 0xa09   :  { %6579 = vmatmul.mubr.msk.bf16.vlgmr.msra.gmra.mrb[92].mxu0 %vm63_vm0, %v2702_v3  ;;  %v8250_v3 = vld [vmem:[%s8758_s6 + $0x70] sm:$0xff]  }
 0xa0a   :  { %6598 = vmatprep.mubr.msk.bf16.mxu0 %vm7220_vm1, %v8773_v48 }
 0xadc   :  { %v6580_v58 = vpop.f32.mrb[92].mxu0 }
 0xadd   :  { %v2759_v45 = vpop.f32.mrb[93].mxu0  ;;  %v2776_v54 = vmax.f32 %v6580_v58, 0.0 }
 0xade   :  { %v6581_v61 = vpop.f32.mrb[94].mxu0  ;;  %v2774_v49 = vmax.f32 %v2759_v45, 0.0 }
 0xadf   :  { %v2777_v57 = vmax.f32 %v6581_v61, 0.0  ;;  %v2762_v15 = vpop.f32.mrb[95].mxu0 }
 0xae0   :  { %v2775_v50 = vmax.f32 %v2762_v15, 0.0 }
 0xae1   :  { %v2779_v19 = vpack.c.bf16 %v2777_v57, %v2776_v54 }
 0xae2   :  { %v2778_v23 = vpack.c.bf16 %v2775_v50, %v2774_v49 }
 0xae4   :  { %6590 = vmatprep.mubr.msk.bf16.mxu1 %vm2812_vm6, %v2778_v23 }
 0xae5   :  { %6591 = vmatmul.mubr.msk.bf16.vlgmr.msra.gmra.mrb[100].mxu1 %vm2812_vm6, %v2779_v19 }
 0xae6   :  { %6614 = vmatprep.mubr.msk.bf16.mxu1 %vm7220_vm1, %v8773_v48 }
 0xbb8   :  { %v8027_v6 = vpop.f32.mrb[100].mxu1 }
 0xbb9   :  { %v2853_v9 = vpop.f32.mrb[101].mxu1 }
 0xbba   :  { %v8030_v10 = vadd.f32 %v2853_v9, %v7910_v63  ;;  %v8032_v20 = vpop.f32.mrb[102].mxu1  ;;  %v8046_v63 = vld [vmem:[%s8756_s4 + $0x40] sm:$0xff]  }
 0xbbb   :  { %v2856_v24 = vpop.f32.mrb[103].mxu1  ;;  %6595 = vmatpush3.bf16.msra.mxu0 %v8046_v63 }
 0xbbc   :  { %8775 = vst [vmem:[#allocation5_spill] sm:$0xff] %v8030_v10  ;;  %v8035_v25 = vadd.f32 %v2856_v24, %v7917_v46  ;;  %v2874_v27 = vmul.f32 %v8030_v10, %v8030_v10  ;;  %v8051_v46 = vld [vmem:[%s8756_s4 + $0x60] sm:$0xff]   ;;  %6596 = vmatprep.subr.bf16.mxu0 %v8773_v48 }
 0xbbd   :  { %6611 = vmatpush3.bf16.msra.mxu1 %v8051_v46 }
 0xbbe   :  { %8776 = vst [vmem:[#allocation6_spill] sm:$0xff] %v8035_v25  ;;  %v2878_v29 = vsel %vm63_vm0, %v2874_v27, 0.0  ;;  %v2875_v30 = vmul.f32 %v8035_v25, %v8035_v25  ;;  %6612 = vmatprep.subr.bf16.mxu1 %v8773_v48 }
 0xbbf   :  { %2879 = vadd.xlane.f32.xlu0 %v2878_v29  ;;  %6597 = vmatpush3.bf16.msra.mxu0 %v8060_v31 }
 0xbc0   :  { %v2881_v28 = vsel %vm63_vm0, %v2875_v30, 0.0  ;;  %6602 = vmatprep.subr.bf16.mxu0 %v8773_v48 }
 0xbc1   :  { %2882 = vadd.xlane.f32.xlu1 %v2881_v28  ;;  %6613 = vmatpush3.bf16.msra.mxu1 %v8065_v32 }
 0xbc2   :  { %6626 = vmatprep.subr.bf16.mxu1 %v8773_v48 }
 0xc4c   :  { %v2880_v62 = vpop.xlane.xlu0 %2879 }
 0xc4d   :  { %v2890_v55 = vmul.f32 0.03125, %v2880_v62 }
 0xc4e   :  { %v2883_v0 = vpop.xlane.xlu1 %2882 }
 0xc4f   :  { %v2894_v14 = vadd.f32 1e-06, %v2890_v55  ;;  %v2891_v16 = vmul.f32 0.03125, %v2883_v0 }
 0xc51   :  { %7095 = vrsqrt.f32 %v2894_v14  ;;  %v2895_v53 = vadd.f32 1e-06, %v2891_v16 }
 0xc53   :  { %7097 = vrsqrt.f32 %v2895_v53 }
 0xc5b   :  { %v7096_v5 = vpop.eup %7095 }
 0xc5c   :  { %v2902_v8 = vmul.f32 %v7096_v5, %v8030_v10 }
 0xc5d   :  { %v7098_v33 = vpop.eup %7097 }
 0xc5e   :  { %v2903_v34 = vmul.f32 %v7098_v33, %v8035_v25  ;;  %v2912_v21 = vmul.f32 %v8075_v4, %v2902_v8 }
 0xc60   :  { %v2913_v36 = vmul.f32 %v8075_v4, %v2903_v34 }
 0xc62   :  { %v8090_v12 = vpack.c.bf16 %v2913_v36, %v2912_v21 }
 0xc64   :  { %6599 = vmatmul.mubr.msk.bf16.vlgmr.msra.gmra.mrb[96].mxu0 %vm63_vm0, %v8090_v12  ;;  %6615 = vmatmul.mubr.msk.bf16.vlgmr.msra.gmra.mrb[104].mxu1 %vm63_vm0, %v8090_v12 }
 0xc65   :  { %6603 = vmatpush3.bf16.msra.mxu0 %v8083_v37  ;;  %6627 = vmatpush3.bf16.msra.mxu1 %v8088_v59 }
 0xc66   :  { %6604 = vmatprep.subr.bf16.mxu0 %v8773_v48  ;;  %6628 = vmatprep.subr.bf16.mxu1 %v8773_v48 }
 0xc67   :  { %6606 = vmatprep.mubr.msk.bf16.mxu0 %vm7220_vm1, %v8773_v48  ;;  %6630 = vmatprep.mubr.msk.bf16.mxu1 %vm7220_vm1, %v8773_v48 }
 0xc69   :  { %6605 = vmatpush3.bf16.msra.mxu0 %v8101_v38  ;;  %6629 = vmatpush3.bf16.msra.mxu1 %v8106_v39 }
 0xc6a   :  { %6618 = vmatprep.subr.bf16.mxu0 %v8773_v48  ;;  %6642 = vmatprep.subr.bf16.mxu1 %v8773_v48 }
 0xc6c   :  { %6607 = vmatmul.mubr.msk.bf16.vlgmr.msra.gmra.mrb[100].mxu0 %vm63_vm0, %v8090_v12  ;;  %6631 = vmatmul.mubr.msk.bf16.vlgmr.msra.gmra.mrb[108].mxu1 %vm63_vm0, %v8090_v12 }
 0xc6d   :  { %6619 = vmatpush3.bf16.msra.mxu0 %v8119_v40  ;;  %6643 = vmatpush3.bf16.msra.mxu1 %v8124_v41 }
 0xc6e   :  { %6620 = vmatprep.subr.bf16.mxu0 %v8773_v48  ;;  %6644 = vmatprep.subr.bf16.mxu1 %v8773_v48 }
 0xc6f   :  { %6622 = vmatprep.mubr.msk.bf16.mxu0 %vm7220_vm1, %v8773_v48  ;;  %6646 = vmatprep.mubr.msk.bf16.mxu1 %vm7220_vm1, %v8773_v48 }
 0xc71   :  { %6621 = vmatpush3.bf16.msra.mxu0 %v8137_v42  ;;  %6645 = vmatpush3.bf16.msra.mxu1 %v8142_v43 }
 0xc72   :  { %6634 = vmatprep.subr.bf16.mxu0 %v8773_v48  ;;  %6658 = vmatprep.subr.bf16.mxu1 %v8773_v48 }
 0xc74   :  { %6623 = vmatmul.mubr.msk.bf16.vlgmr.msra.gmra.mrb[104].mxu0 %vm63_vm0, %v8090_v12  ;;  %6647 = vmatmul.mubr.msk.bf16.vlgmr.msra.gmra.mrb[112].mxu1 %vm63_vm0, %v8090_v12 }
 0xc75   :  { %6635 = vmatpush3.bf16.msra.mxu0 %v8155_v44  ;;  %6659 = vmatpush3.bf16.msra.mxu1 %v8160_v2 }
 0xc76   :  { %6636 = vmatprep.subr.bf16.mxu0 %v8773_v48  ;;  %6660 = vmatprep.subr.bf16.mxu1 %v8773_v48 }
 0xc77   :  { %6638 = vmatprep.mubr.msk.bf16.mxu0 %vm7220_vm1, %v8773_v48  ;;  %6662 = vmatprep.mubr.msk.bf16.mxu1 %vm7220_vm1, %v8773_v48 }
 0xc79   :  { %6637 = vmatpush3.bf16.msra.mxu0 %v8173_v11  ;;  %6661 = vmatpush3.bf16.msra.mxu1 %v8178_v56 }
 0xc7a   :  { %6650 = vmatprep.subr.bf16.mxu0 %v8773_v48  ;;  %6674 = vmatprep.subr.bf16.mxu1 %v8773_v48 }
 0xc7c   :  { %6639 = vmatmul.mubr.msk.bf16.vlgmr.msra.gmra.mrb[108].mxu0 %vm63_vm0, %v8090_v12  ;;  %6663 = vmatmul.mubr.msk.bf16.vlgmr.msra.gmra.mrb[116].mxu1 %vm63_vm0, %v8090_v12 }
 0xc7d   :  { %6651 = vmatpush3.bf16.msra.mxu0 %v8191_v52  ;;  %6675 = vmatpush3.bf16.msra.mxu1 %v8196_v51 }
 0xc7e   :  { %6652 = vmatprep.subr.bf16.mxu0 %v8773_v48  ;;  %6676 = vmatprep.subr.bf16.mxu1 %v8773_v48 }
 0xc7f   :  { %6654 = vmatprep.mubr.msk.bf16.mxu0 %vm7220_vm1, %v8773_v48  ;;  %6678 = vmatprep.mubr.msk.bf16.mxu1 %vm7220_vm1, %v8773_v48 }
 0xc81   :  { %6653 = vmatpush3.bf16.msra.mxu0 %v8209_v13  ;;  %6677 = vmatpush3.bf16.msra.mxu1 %v8214_v60 }
 0xc82   :  { %6666 = vmatprep.subr.bf16.mxu0 %v8773_v48  ;;  %6690 = vmatprep.subr.bf16.mxu1 %v8773_v48 }
 0xc84   :  { %6655 = vmatmul.mubr.msk.bf16.vlgmr.msra.gmra.mrb[112].mxu0 %vm63_vm0, %v8090_v12  ;;  %6679 = vmatmul.mubr.msk.bf16.vlgmr.msra.gmra.mrb[120].mxu1 %vm63_vm0, %v8090_v12 }
 0xc85   :  { %6667 = vmatpush3.bf16.msra.mxu0 %v8227_v22  ;;  %6670 = vmatprep.mubr.msk.bf16.mxu0 %vm7220_vm1, %v8773_v48 }
 0xc86   :  { %6668 = vmatprep.subr.bf16.mxu0 %v8773_v48  ;;  %6692 = vmatprep.mubr.msk.bf16.mxu1 %vm7220_vm1, %v8773_v48 }
 0xc89   :  { %6669 = vmatpush3.bf16.msra.mxu0 %v8239_v1 }
 0xc8a   :  { %6682 = vmatprep.subr.bf16.mxu0 %v8773_v48 }
 0xc8c   :  { %6671 = vmatmul.mubr.msk.bf16.vlgmr.msra.gmra.mrb[116].mxu0 %vm63_vm0, %v8090_v12 }
 0xc8d   :  { %6683 = vmatpush3.bf16.msra.mxu0 %v8250_v3  ;;  %6686 = vmatprep.mubr.msk.bf16.mxu0 %vm7220_vm1, %v8773_v48 }
 0xc8e   :  { %6684 = vmatprep.subr.bf16.mxu0 %v8773_v48 }
 0xc91   :  { %6685 = vmatpush3.bf16.msra.mxu0 %v8259_v47 }
 0xc92   :  { %6696 = vmatprep.subr.bf16.mxu0 %v8773_v48 }
 0xc94   :  { %6687 = vmatmul.mubr.msk.bf16.vlgmr.msra.gmra.mrb[120].mxu0 %vm63_vm0, %v8090_v12 }
 0xc95   :  { %6698 = vmatprep.mubr.msk.bf16.mxu0 %vm7220_vm1, %v8773_v48 }
 0xd37   :  { %v3023_v26 = vpop.f32.mrb[96].mxu0  ;;  %v3129_v58 = vpop.f32.mrb[104].mxu1 }
 0xd38   :  { %v6600_v45 = vpop.f32.mrb[97].mxu0  ;;  %v6616_v61 = vpop.f32.mrb[105].mxu1 }
 0xd39   :  { %v3026_v54 = vpop.f32.mrb[98].mxu0  ;;  %v3132_v57 = vpop.f32.mrb[106].mxu1 }
 0xd3a   :  { %v3613_v15 = vpack.c.bf16 %v3026_v54, %v3023_v26  ;;  %v3615_v49 = vpack.c.bf16 %v3132_v57, %v3129_v58  ;;  %v6601_v50 = vpop.f32.mrb[99].mxu0  ;;  %v6617_v19 = vpop.f32.mrb[107].mxu1 }
 0xd3f   :  { %v3076_v23 = vpop.f32.mrb[100].mxu0  ;;  %v3235_v9 = vpop.f32.mrb[108].mxu1 }
 0xd40   :  { %v6608_v24 = vpop.f32.mrb[101].mxu0  ;;  %v6632_v27 = vpop.f32.mrb[109].mxu1 }
 0xd41   :  { %v3079_v29 = vpop.f32.mrb[102].mxu0  ;;  %v3238_v30 = vpop.f32.mrb[110].mxu1 }
 0xd42   :  { %v3614_v28 = vpack.c.bf16 %v3079_v29, %v3076_v23  ;;  %v3617_v62 = vpack.c.bf16 %v3238_v30, %v3235_v9  ;;  %v6609_v55 = vpop.f32.mrb[103].mxu0  ;;  %v6633_v0 = vpop.f32.mrb[111].mxu1 }
 0xd44   :  { %v3625_v14 = vsel %vm804_vm2, %v3617_v62, 0 }
 0xd45   :  { %6691 = vmatpush3.bf16.xpose.msra.mxu1 %v3625_v14 }
 0xd46   :  { %6702 = vmatprep.subr.bf16.mxu1 %v8773_v48 }
 0xd47   :  { %v3182_v16 = vpop.f32.mrb[104].mxu0  ;;  %v3341_v53 = vpop.f32.mrb[112].mxu1 }
 0xd48   :  { %v6624_v5 = vpop.f32.mrb[105].mxu0  ;;  %v6648_v8 = vpop.f32.mrb[113].mxu1 }
 0xd49   :  { %v3185_v33 = vpop.f32.mrb[106].mxu0  ;;  %v3344_v34 = vpop.f32.mrb[114].mxu1 }
 0xd4a   :  { %v3616_v21 = vpack.c.bf16 %v3185_v33, %v3182_v16  ;;  %v3619_v36 = vpack.c.bf16 %v3344_v34, %v3341_v53  ;;  %v6625_v12 = vpop.f32.mrb[107].mxu0  ;;  %v6649_v26 = vpop.f32.mrb[115].mxu1 }
 0xd4c   :  { %v3719_v58 = vsel %vm804_vm2, %v3619_v36, 0  ;;  %6693 = vmatmul.mubr.msk.bf16.vlgmr.msra.gmra.mrb[124].mxu1 %vm804_vm2, %v3613_v15 }
 0xd4d   :  { %6703 = vmatpush3.bf16.xpose.msra.mxu1 %v3719_v58  ;;  %6704 = vmatprep.mubr.msk.bf16.mxu1 %vm7220_vm1, %v8773_v48 }
 0xd4e   :  { %6714 = vmatprep.subr.bf16.mxu1 %v8773_v48 }
 0xd4f   :  { %v3288_v45 = vpop.f32.mrb[108].mxu0  ;;  %v3447_v61 = vpop.f32.mrb[116].mxu1 }
 0xd50   :  { %v6640_v54 = vpop.f32.mrb[109].mxu0  ;;  %v6664_v57 = vpop.f32.mrb[117].mxu1 }
 0xd51   :  { %v3291_v50 = vpop.f32.mrb[110].mxu0  ;;  %v3450_v19 = vpop.f32.mrb[118].mxu1 }
 0xd52   :  { %v3618_v23 = vpack.c.bf16 %v3291_v50, %v3288_v45  ;;  %v3909_v9 = vpack.c.bf16 %v3450_v19, %v3447_v61  ;;  %v6641_v24 = vpop.f32.mrb[111].mxu0  ;;  %v6665_v27 = vpop.f32.mrb[119].mxu1 }
 0xd54   :  { %v3672_v29 = vsel %vm804_vm2, %v3618_v23, 0  ;;  %6705 = vmatmul.mubr.msk.bf16.vlgmr.msra.gmra.mrb[128].mxu1 %vm804_vm2, %v3615_v49 }
 0xd55   :  { %6697 = vmatpush3.bf16.xpose.msra.mxu0 %v3672_v29  ;;  %6715 = vmatpush3.bf16.msra.mxu1 %v3909_v9  ;;  %v8313_v9 = vld [vmem:[%s8754_s2 + $0x8] sm:$0xff] }
 0xd56   :  { %6708 = vmatprep.subr.bf16.mxu0 %v8773_v48  ;;  %6716 = vmatprep.mubr.msk.bf16.mxu1 %vm7220_vm1, %v8773_v48 }
 0xd57   :  { %v3394_v15 = vpop.f32.mrb[112].mxu0  ;;  %v8282_v30 = vpop.f32.mrb[120].mxu1  ;;  %6726 = vmatprep.subr.bf16.mxu1 %v8773_v48 }
 0xd58   :  { %v6656_v62 = vpop.f32.mrb[113].mxu0  ;;  %v6680_v55 = vpop.f32.mrb[121].mxu1 }
 0xd59   :  { %v3397_v0 = vpop.f32.mrb[114].mxu0  ;;  %v8285_v14 = vpop.f32.mrb[122].mxu1 }
 0xd5a   :  { %v3620_v16 = vpack.c.bf16 %v3397_v0, %v3394_v15  ;;  %v6657_v53 = vpop.f32.mrb[115].mxu0  ;;  %v6681_v5 = vpop.f32.mrb[123].mxu1 }
 0xd5c   :  { %v3766_v8 = vsel %vm804_vm2, %v3620_v16, 0  ;;  %6699 = vmatmul.mubr.msk.bf16.vlgmr.msra.gmra.mrb[124].mxu0 %vm804_vm2, %v3614_v28 }
 0xd5d   :  { %6709 = vmatpush3.bf16.xpose.msra.mxu0 %v3766_v8  ;;  %6710 = vmatprep.mubr.msk.bf16.mxu0 %vm7220_vm1, %v8773_v48 }
 0xd5e   :  { %6720 = vmatprep.subr.bf16.mxu0 %v8773_v48 }
 0xd5f   :  { %v3500_v33 = vpop.f32.mrb[116].mxu0 }
 0xd60   :  { %v6672_v34 = vpop.f32.mrb[117].mxu0 }
 0xd61   :  { %v3503_v36 = vpop.f32.mrb[118].mxu0 }
 0xd62   :  { %v3910_v12 = vpack.c.bf16 %v3503_v36, %v3500_v33  ;;  %v6673_v26 = vpop.f32.mrb[119].mxu0  ;;  %v8323_v33 = vld [vmem:[%s8754_s2 + $0x20] sm:$0xff]  ;;  %v8329_v36 = vld [vmem:[%s8754_s2 + $0x10] sm:$0xff] }
 0xd64   :  { %6711 = vmatmul.mubr.msk.bf16.vlgmr.msra.gmra.mrb[128].mxu0 %vm804_vm2, %v3616_v21  ;;  %v8307_v21 = vld [vmem:[%s8754_s2] sm:$0xff] }
 0xd65   :  { %6721 = vmatpush3.bf16.msra.mxu0 %v3910_v12  ;;  %6722 = vmatprep.mubr.msk.bf16.mxu0 %vm7220_vm1, %v8773_v48 }
 0xd66   :  { %6732 = vmatprep.subr.bf16.mxu0 %v8773_v48 }
 0xd67   :  { %v8298_v28 = vpop.f32.mrb[120].mxu0 }
 0xd68   :  { %v6688_v58 = vpop.f32.mrb[121].mxu0 }
 0xd69   :  { %v8300_v45 = vpop.f32.mrb[122].mxu0 }
 0xd6a   :  { %v6689_v54 = vpop.f32.mrb[123].mxu0 }
 0xd6b   :  { %v8335_v54 = vld [vmem:[%s8754_s2 + $0x28] sm:$0xff] }
 0xd6c   :  { %8777 = vst [vmem:[#allocation7_spill] sm:$0xff] %v8335_v54 }
 0xe1f   :  { %v3661_v57 = vpop.f32.mrb[124].mxu1 }
 0xe20   :  { %v3662_v50 = vadd.f32 %v8307_v21, %v3661_v57  ;;  %v6694_v19 = vpop.f32.mrb[125].mxu1 }
 0xe21   :  { %v3664_v23 = vpop.f32.mrb[126].mxu1 }
 0xe22   :  { %v3665_v24 = vadd.f32 %v8313_v9, %v3664_v23  ;;  %v6695_v27 = vpop.f32.mrb[127].mxu1  ;;  %v3809_v29 = vadd.f32 %v3662_v50, %v7577_v18  ;;  %v8341_v50 = vld [vmem:[%s8754_s2 + $0x18] sm:$0xff] }
 0xe24   :  { %v3817_v15 = vsel %vm1005_vm4, %v3809_v29, -inf  ;;  %v3810_v62 = vadd.f32 %v3665_v24, %v7577_v18 }
 0xe25   :  { %3818 = vmax.xlane.f32.xlu0 %v3817_v15 }
 0xe26   :  { %v3820_v55 = vsel %vm1005_vm4, %v3810_v62, -inf }
 0xe27   :  { %3821 = vmax.xlane.f32.xlu1 %v3820_v55  ;;  %v3755_v0 = vpop.f32.mrb[128].mxu1 }
 0xe28   :  { %v6706_v16 = vpop.f32.mrb[129].mxu1  ;;  %v3756_v34 = vadd.f32 %v8323_v33, %v3755_v0 }
 0xe29   :  { %v3758_v53 = vpop.f32.mrb[130].mxu1 }
 0xe2a   :  { %v6707_v5 = vpop.f32.mrb[131].mxu1  ;;  %v3759_v57 = vadd.f32 %v8335_v54, %v3758_v53  ;;  %v3813_v55 = vadd.f32 %v3756_v34, %v7577_v18  ;;  %v8360_v34 = vld [vmem:[%s8754_s2 + $0x38] sm:$0xff] }
 0xe2b   :  { %v8353_v5 = vld [vmem:[%s8754_s2 + $0x30] sm:$0xff]  ;;  %8779 = vst [vmem:[#allocation9_spill] sm:$0xff] %v8360_v34 }
 0xe2c   :  { %v3814_v16 = vadd.f32 %v3759_v57, %v7577_v18  ;;  %8778 = vst [vmem:[#allocation8_spill] sm:$0xff] %v8353_v5 }
 0xe2f   :  { %v3708_v8 = vpop.f32.mrb[124].mxu0 }
 0xe30   :  { %v3709_v12 = vadd.f32 %v8329_v36, %v3708_v8  ;;  %v6700_v26 = vpop.f32.mrb[125].mxu0 }
 0xe31   :  { %v3711_v58 = vpop.f32.mrb[126].mxu0  ;;  %v3829_v26 = vsel %vm1005_vm4, %v3813_v55, -inf }
 0xe32   :  { %v3712_v19 = vadd.f32 %v8341_v50, %v3711_v58  ;;  %v6701_v23 = vpop.f32.mrb[127].mxu0  ;;  %v3811_v24 = vadd.f32 %v3709_v12, %v7577_v18 }
 0xe33   :  { %v3832_v23 = vsel %vm1005_vm4, %v3814_v16, -inf }
 0xe34   :  { %v3823_v27 = vsel %vm1005_vm4, %v3811_v24, -inf  ;;  %v3812_v15 = vadd.f32 %v3712_v19, %v7577_v18 }
 0xe35   :  { %3824 = vmax.xlane.f32.xlu0 %v3823_v27 }
 0xe36   :  { %v3826_v0 = vsel %vm1005_vm4, %v3812_v15, -inf }
 0xe37   :  { %3827 = vmax.xlane.f32.xlu1 %v3826_v0  ;;  %v3802_v53 = vpop.f32.mrb[128].mxu0 }
 0xe38   :  { %v3803_v8 = vadd.f32 %v8353_v5, %v3802_v53  ;;  %v6712_v12 = vpop.f32.mrb[129].mxu0 }
 0xe39   :  { %3830 = vmax.xlane.f32.xlu0 %v3829_v26  ;;  %v3805_v58 = vpop.f32.mrb[130].mxu0 }
 0xe3a   :  { %v3806_v57 = vadd.f32 %v8360_v34, %v3805_v58  ;;  %v6713_v19 = vpop.f32.mrb[131].mxu0  ;;  %v3815_v27 = vadd.f32 %v3803_v8, %v7577_v18 }
 0xe3b   :  { %3833 = vmax.xlane.f32.xlu1 %v3832_v23 }
 0xe3c   :  { %v3835_v0 = vsel %vm1005_vm4, %v3815_v27, -inf  ;;  %v3816_v53 = vadd.f32 %v3806_v57, %v7577_v18 }
 0xe3d   :  { %3836 = vmax.xlane.f32.xlu0 %v3835_v0 }
 0xe3e   :  { %v3838_v12 = vsel %vm1005_vm4, %v3816_v53, -inf }
 0xe3f   :  { %3839 = vmax.xlane.f32.xlu1 %v3838_v12 }
 0xeb2   :  { %v3819_v26 = vpop.xlane.xlu0 %3818 }
 0xeb3   :  { %v3841_v61 = vsub.f32 %v3809_v29, %v3819_v26 }
 0xeb4   :  { %v3822_v49 = vpop.xlane.xlu1 %3821 }
 0xeb5   :  { %v3849_v25 = vmul.f32 1.442695, %v3841_v61  ;;  %v3842_v10 = vsub.f32 %v3810_v62, %v3822_v49 }
 0xeb7   :  { %7099 = vpow2.f32 %v3849_v25  ;;  %v3851_v58 = vmul.f32 1.442695, %v3842_v10 }
 0xeb9   :  { %7101 = vpow2.f32 %v3851_v58 }
 0xec1   :  { %v7100_v19 = vpop.eup %7099 }
 0xec2   :  { %v3825_v34 = vpop.xlane.xlu0 %3824  ;;  %v3865_v8 = vsel %vm1005_vm4, %v7100_v19, 0.0 }
 0xec3   :  { %v7102_v23 = vpop.eup %7101  ;;  %v3843_v5 = vsub.f32 %v3811_v24, %v3825_v34  ;;  %3866 = vadd.xlane.f32.xlu0 %v3865_v8 }
 0xec4   :  { %v3828_v18 = vpop.xlane.xlu1 %3827  ;;  %v3868_v57 = vsel %vm1005_vm4, %v7102_v23, 0.0 }
 0xec5   :  { %v3853_v0 = vmul.f32 1.442695, %v3843_v5  ;;  %v3844_v12 = vsub.f32 %v3812_v15, %v3828_v18  ;;  %3869 = vadd.xlane.f32.xlu1 %v3868_v57 }
 0xec6   :  { %v3831_v29 = vpop.xlane.xlu0 %3830 }
 0xec7   :  { %7103 = vpow2.f32 %v3853_v0  ;;  %v3855_v61 = vmul.f32 1.442695, %v3844_v12  ;;  %v3845_v49 = vsub.f32 %v3813_v55, %v3831_v29 }
 0xec8   :  { %v3834_v25 = vpop.xlane.xlu1 %3833 }
 0xec9   :  { %7105 = vpow2.f32 %v3855_v61  ;;  %v3857_v10 = vmul.f32 1.442695, %v3845_v49  ;;  %v3846_v62 = vsub.f32 %v3814_v16, %v3834_v25  ;;  %v8374_v16 = vadd.f32 %v8027_v6, %v7983_v17 }
 0xeca   :  { %v3837_v26 = vpop.xlane.xlu0 %3836 }
 0xecb   :  { %7107 = vpow2.f32 %v3857_v10  ;;  %v3859_v58 = vmul.f32 1.442695, %v3846_v62  ;;  %v3847_v54 = vsub.f32 %v3815_v27, %v3837_v26  ;;  %v2876_v49 = vmul.f32 %v8374_v16, %v8374_v16 }
 0xecc   :  { %v3840_v24 = vpop.xlane.xlu1 %3839 }
 0xecd   :  { %7109 = vpow2.f32 %v3859_v58  ;;  %v3861_v34 = vmul.f32 1.442695, %v3847_v54  ;;  %v3848_v8 = vsub.f32 %v3816_v53, %v3840_v24  ;;  %v8379_v53 = vadd.f32 %v8032_v20, %v7988_v35 }
 0xece   :  { %v2884_v35 = vsel %vm63_vm0, %v2876_v49, 0.0 }
 0xecf   :  { %7111 = vpow2.f32 %v3861_v34  ;;  %v3863_v5 = vmul.f32 1.442695, %v3848_v8  ;;  %v2877_v6 = vmul.f32 %v8379_v53, %v8379_v53 }
 0xed1   :  { %v7104_v15 = vpop.eup %7103  ;;  %7113 = vpow2.f32 %v3863_v5  ;;  %v2887_v20 = vsel %vm63_vm0, %v2877_v6, 0.0 }
 0xed2   :  { %v3871_v18 = vsel %vm1005_vm4, %v7104_v15, 0.0 }
 0xed3   :  { %v7106_v57 = vpop.eup %7105  ;;  %3872 = vadd.xlane.f32.xlu0 %v3871_v18 }
 0xed4   :  { %v3874_v55 = vsel %vm1005_vm4, %v7106_v57, 0.0 }
 0xed5   :  { %v7108_v0 = vpop.eup %7107  ;;  %3875 = vadd.xlane.f32.xlu1 %v3874_v55  ;;  %v8780_v55 = vpack.c.bf16 %v8285_v14, %v8282_v30 }
 0xed6   :  { %v3877_v27 = vsel %vm1005_vm4, %v7108_v0, 0.0 }
 0xed7   :  { %v7110_v54 = vpop.eup %7109  ;;  %3878 = vadd.xlane.f32.xlu0 %v3877_v27 }
 0xed8   :  { %v3880_v12 = vsel %vm1005_vm4, %v7110_v54, 0.0 }
 0xed9   :  { %v7112_v29 = vpop.eup %7111  ;;  %3881 = vadd.xlane.f32.xlu1 %v3880_v12 }
 0xeda   :  { %v3883_v61 = vsel %vm1005_vm4, %v7112_v29, 0.0 }
 0xedb   :  { %v7114_v25 = vpop.eup %7113  ;;  %3884 = vadd.xlane.f32.xlu0 %v3883_v61 }
 0xedc   :  { %v3886_v17 = vsel %vm1005_vm4, %v7114_v25, 0.0 }
 0xedd   :  { %3887 = vadd.xlane.f32.xlu1 %v3886_v17 }
 0xedf   :  { %2885 = vadd.xlane.f32.xlu0 %v2884_v35 }
 0xee1   :  { %2888 = vadd.xlane.f32.xlu1 %v2887_v20 }
 0xf50   :  { %v3867_v10 = vpop.xlane.xlu0 %3866 }
 0xf51   :  { %7115 = vrcp.f32 %v3867_v10 }
 0xf52   :  { %v3870_v62 = vpop.xlane.xlu1 %3869 }
 0xf53   :  { %7117 = vrcp.f32 %v3870_v62 }
 0xf5b   :  { %v7116_v26 = vpop.eup %7115 }
 0xf5c   :  { %v3890_v24 = vmul.f32 %v7116_v26, %v7100_v19  ;;  %v8781_v26 = vpack.c.bf16 %v8300_v45, %v8298_v28  ;;  %v5877_v28 = vld [vmem:[%s8759_s7 + $0x10] sm:$0xf] }
 0xf5d   :  { %v7118_v58 = vpop.eup %7117  ;;  %v8414_v45 = vsel %vm1285_vm5, %v5877_v28, 0 }
 0xf5e   :  { %v3892_v34 = vmul.f32 %v7118_v58, %v7102_v23 }
 0xf60   :  { %v3873_v8 = vpop.xlane.xlu0 %3872  ;;  %v3905_v5 = vpack.c.bf16 %v3892_v34, %v3890_v24 }
 0xf61   :  { %7119 = vrcp.f32 %v3873_v8  ;;  %v5879_v8 = vld [vmem:[%s8759_s7 + $0x18] sm:$0xf] }
 0xf62   :  { %6717 = vmatmul.mubr.msk.bf16.vlgmr.msra.gmra.mrb[132].mxu1 %vm1005_vm4, %v3905_v5  ;;  %v3876_v18 = vpop.xlane.xlu1 %3875 }
 0xf63   :  { %6727 = vmatpush3.bf16.msra.mxu1 %v8780_v55  ;;  %7121 = vrcp.f32 %v3876_v18  ;;  %6728 = vmatprep.mubr.msk.bf16.mxu1 %vm7220_vm1, %v8773_v48 }
 0xf64   :  { %v3879_v27 = vpop.xlane.xlu0 %3878  ;;  %6738 = vmatprep.subr.bf16.mxu1 %v8773_v48 }
 0xf65   :  { %7123 = vrcp.f32 %v3879_v27 }
 0xf66   :  { %v3882_v19 = vpop.xlane.xlu1 %3881 }
 0xf67   :  { %7125 = vrcp.f32 %v3882_v19 }
 0xf68   :  { %v3885_v23 = vpop.xlane.xlu0 %3884 }
 0xf69   :  { %7127 = vrcp.f32 %v3885_v23 }
 0xf6a   :  { %v3888_v12 = vpop.xlane.xlu1 %3887 }
 0xf6b   :  { %v7120_v61 = vpop.eup %7119  ;;  %7129 = vrcp.f32 %v3888_v12  ;;  %v8430_v12 = vsel %vm1285_vm5, %v5879_v8, 0 }
 0xf6c   :  { %v3894_v17 = vmul.f32 %v7120_v61, %v7104_v15  ;;  %v2886_v5 = vpop.xlane.xlu0 %2885 }
 0xf6d   :  { %v7122_v49 = vpop.eup %7121  ;;  %v2892_v61 = vmul.f32 0.03125, %v2886_v5 }
 0xf6e   :  { %v3896_v6 = vmul.f32 %v7122_v49, %v7106_v57 }
 0xf6f   :  { %v7124_v30 = vpop.eup %7123 }
 0xf70   :  { %v3906_v14 = vpack.c.bf16 %v3896_v6, %v3894_v17  ;;  %v3898_v20 = vmul.f32 %v7124_v30, %v7108_v0  ;;  %v2896_v17 = vadd.f32 1e-06, %v2892_v61  ;;  %v5880_v30 = vld [vmem:[%s8759_s7 + $0x1c] sm:$0xf] }
 0xf71   :  { %v7126_v35 = vpop.eup %7125 }
 0xf72   :  { %v3900_v10 = vmul.f32 %v7126_v35, %v7110_v54  ;;  %6723 = vmatmul.mubr.msk.bf16.vlgmr.msra.gmra.mrb[132].mxu0 %vm1005_vm4, %v3906_v14  ;;  %v5878_v54 = vld [vmem:[%s8759_s7 + $0x14] sm:$0xf] }
 0xf73   :  { %v7128_v62 = vpop.eup %7127  ;;  %6733 = vmatpush3.bf16.msra.mxu0 %v8781_v26  ;;  %6734 = vmatprep.mubr.msk.bf16.mxu0 %vm7220_vm1, %v8773_v48 }
 0xf74   :  { %v3907_v58 = vpack.c.bf16 %v3900_v10, %v3898_v20  ;;  %6744 = vmatprep.subr.bf16.mxu0 %v8773_v48  ;;  %v3902_v57 = vmul.f32 %v7128_v62, %v7112_v29  ;;  %v8422_v29 = vsel %vm1285_vm5, %v5878_v54, 0  ;;  %v8441_v62 = vsel %vm1285_vm5, %v5880_v30, 0 }
 0xf75   :  { %v7130_v15 = vpop.eup %7129 }
 0xf76   :  { %v3904_v24 = vmul.f32 %v7130_v15, %v7114_v25  ;;  %6729 = vmatmul.mubr.msk.bf16.vlgmr.msra.gmra.mrb[136].mxu1 %vm1005_vm4, %v3907_v58  ;;  %v2889_v25 = vpop.xlane.xlu1 %2888 }
 0xf77   :  { %6740 = vmatprep.mubr.msk.bf16.mxu1 %vm7220_vm1, %v8773_v48  ;;  %6739 = vmatpush3.bf16.msra.mxu1 %v8414_v45  ;;  %v2893_v55 = vmul.f32 0.03125, %v2889_v25 }
 0xf78   :  { %v3908_v0 = vpack.c.bf16 %v3904_v24, %v3902_v57  ;;  %6750 = vmatprep.subr.bf16.mxu1 %v8773_v48 }
 0xf79   :  { %v2897_v49 = vadd.f32 1e-06, %v2893_v55 }
 0xf7a   :  { %6735 = vmatmul.mubr.msk.bf16.vlgmr.msra.gmra.mrb[136].mxu0 %vm1005_vm4, %v3908_v0 }
 0xf7b   :  { %6746 = vmatprep.mubr.msk.bf16.mxu0 %vm7220_vm1, %v8773_v48  ;;  %6745 = vmatpush3.bf16.msra.mxu0 %v8422_v29  ;;  %7131 = vrsqrt.f32 %v2897_v49 }
 0xf7c   :  { %6756 = vmatprep.subr.bf16.mxu0 %v8773_v48  ;;  %7133 = vrsqrt.f32 %v2896_v17 }
 0xf85   :  { %v7132_v26 = vpop.eup %7131 }
 0xf86   :  { %v7134_v57 = vpop.eup %7133  ;;  %v2905_v0 = vmul.f32 %v7132_v26, %v8379_v53 }
0x1035   :  { %v3950_v34 = vpop.f32.mrb[132].mxu1 }
0x1036   :  { %v6718_v18 = vpop.f32.mrb[133].mxu1 }
0x1037   :  { %v3953_v27 = vpop.f32.mrb[134].mxu1  ;;  %v2915_v18 = vmul.f32 %v8075_v4, %v2905_v0 }
0x1038   :  { %v4089_v19 = vpack.c.bf16 %v3953_v27, %v3950_v34  ;;  %v6719_v23 = vpop.f32.mrb[135].mxu1  ;;  %v2904_v34 = vmul.f32 %v7134_v57, %v8374_v16 }
0x103a   :  { %6741 = vmatmul.mubr.msk.bf16.vlgmr.msra.gmra.mrb[140].mxu1 %vm804_vm2, %v4089_v19  ;;  %v2914_v19 = vmul.f32 %v8075_v4, %v2904_v34 }
0x103b   :  { %6751 = vmatpush3.bf16.msra.mxu1 %v8430_v12  ;;  %6752 = vmatprep.mubr.msk.bf16.mxu1 %vm7220_vm1, %v8773_v48 }
0x103c   :  { %6762 = vmatprep.subr.bf16.mxu1 %v8773_v48  ;;  %v8460_v23 = vpack.c.bf16 %v2915_v18, %v2914_v19 }
0x1045   :  { %v3994_v6 = vpop.f32.mrb[132].mxu0 }
0x1046   :  { %v6724_v14 = vpop.f32.mrb[133].mxu0 }
0x1047   :  { %v3997_v35 = vpop.f32.mrb[134].mxu0 }
0x1048   :  { %v4090_v20 = vpack.c.bf16 %v3997_v35, %v3994_v6  ;;  %v6725_v10 = vpop.f32.mrb[135].mxu0 }
0x1049   :  { %v4038_v58 = vpop.f32.mrb[136].mxu1 }
0x104a   :  { %v6730_v15 = vpop.f32.mrb[137].mxu1  ;;  %6747 = vmatmul.mubr.msk.bf16.vlgmr.msra.gmra.mrb[140].mxu0 %vm804_vm2, %v4090_v20 }
0x104b   :  { %v4041_v24 = vpop.f32.mrb[138].mxu1  ;;  %6757 = vmatpush3.bf16.msra.mxu0 %v8441_v62  ;;  %6758 = vmatprep.mubr.msk.bf16.mxu0 %vm7220_vm1, %v8773_v48 }
0x104c   :  { %v4091_v28 = vpack.c.bf16 %v4041_v24, %v4038_v58  ;;  %v6731_v54 = vpop.f32.mrb[139].mxu1  ;;  %6770 = vmatprep.subr.bf16.mxu0 %v8773_v48 }
0x104d   :  { %v4082_v25 = vpop.f32.mrb[136].mxu0 }
0x104e   :  { %v6736_v8 = vpop.f32.mrb[137].mxu0  ;;  %6753 = vmatmul.mubr.msk.bf16.vlgmr.msra.gmra.mrb[144].mxu1 %vm804_vm2, %v4091_v28 }
0x104f   :  { %v4085_v5 = vpop.f32.mrb[138].mxu0  ;;  %6763 = vmatpush3.bf16.msra.mxu1 %v8046_v63  ;;  %6766 = vmatprep.mubr.msk.bf16.mxu1 %vm7220_vm1, %v8773_v48 }
0x1050   :  { %v4092_v55 = vpack.c.bf16 %v4085_v5, %v4082_v25  ;;  %v6737_v27 = vpop.f32.mrb[139].mxu0  ;;  %6764 = vmatprep.subr.bf16.mxu1 %v8773_v48 }
0x1052   :  { %6759 = vmatmul.mubr.msk.bf16.vlgmr.msra.gmra.mrb[144].mxu0 %vm804_vm2, %v4092_v55 }
0x1053   :  { %6765 = vmatpush3.bf16.msra.mxu1 %v8060_v31  ;;  %6771 = vmatpush3.bf16.msra.mxu0 %v8083_v37 }
0x1054   :  { %6772 = vmatprep.subr.bf16.mxu0 %v8773_v48  ;;  %6778 = vmatprep.subr.bf16.mxu1 %v8773_v48 }
0x1055   :  { %6774 = vmatprep.mubr.msk.bf16.mxu0 %vm7220_vm1, %v8773_v48 }
0x1056   :  { %6767 = vmatmul.mubr.msk.bf16.vlgmr.msra.gmra.mrb[148].mxu1 %vm63_vm0, %v8460_v23 }
0x1057   :  { %6773 = vmatpush3.bf16.msra.mxu0 %v8101_v38  ;;  %6779 = vmatpush3.bf16.msra.mxu1 %v8051_v46 }
0x1058   :  { %6780 = vmatprep.subr.bf16.mxu1 %v8773_v48  ;;  %6786 = vmatprep.subr.bf16.mxu0 %v8773_v48 }
0x1059   :  { %6782 = vmatprep.mubr.msk.bf16.mxu1 %vm7220_vm1, %v8773_v48 }
0x105a   :  { %6775 = vmatmul.mubr.msk.bf16.vlgmr.msra.gmra.mrb[148].mxu0 %vm63_vm0, %v8460_v23 }
0x105b   :  { %6781 = vmatpush3.bf16.msra.mxu1 %v8065_v32  ;;  %6787 = vmatpush3.bf16.msra.mxu0 %v8119_v40 }
0x105c   :  { %6788 = vmatprep.subr.bf16.mxu0 %v8773_v48  ;;  %6794 = vmatprep.subr.bf16.mxu1 %v8773_v48 }
0x105d   :  { %6790 = vmatprep.mubr.msk.bf16.mxu0 %vm7220_vm1, %v8773_v48 }
0x105e   :  { %6783 = vmatmul.mubr.msk.bf16.vlgmr.msra.gmra.mrb[152].mxu1 %vm63_vm0, %v8460_v23 }
0x105f   :  { %6789 = vmatpush3.bf16.msra.mxu0 %v8137_v42  ;;  %6795 = vmatpush3.bf16.msra.mxu1 %v8088_v59 }
0x1060   :  { %6796 = vmatprep.subr.bf16.mxu1 %v8773_v48  ;;  %6802 = vmatprep.subr.bf16.mxu0 %v8773_v48 }
0x1061   :  { %6798 = vmatprep.mubr.msk.bf16.mxu1 %vm7220_vm1, %v8773_v48 }
0x1062   :  { %6791 = vmatmul.mubr.msk.bf16.vlgmr.msra.gmra.mrb[152].mxu0 %vm63_vm0, %v8460_v23 }
0x1063   :  { %6797 = vmatpush3.bf16.msra.mxu1 %v8106_v39  ;;  %6803 = vmatpush3.bf16.msra.mxu0 %v8155_v44 }
0x1064   :  { %6804 = vmatprep.subr.bf16.mxu0 %v8773_v48  ;;  %6810 = vmatprep.subr.bf16.mxu1 %v8773_v48 }
0x1065   :  { %6806 = vmatprep.mubr.msk.bf16.mxu0 %vm7220_vm1, %v8773_v48 }
0x1066   :  { %6799 = vmatmul.mubr.msk.bf16.vlgmr.msra.gmra.mrb[156].mxu1 %vm63_vm0, %v8460_v23 }
0x1067   :  { %6805 = vmatpush3.bf16.msra.mxu0 %v8173_v11  ;;  %6811 = vmatpush3.bf16.msra.mxu1 %v8124_v41 }
0x1068   :  { %6812 = vmatprep.subr.bf16.mxu1 %v8773_v48  ;;  %6818 = vmatprep.subr.bf16.mxu0 %v8773_v48 }
0x1069   :  { %6814 = vmatprep.mubr.msk.bf16.mxu1 %vm7220_vm1, %v8773_v48 }
0x106a   :  { %6807 = vmatmul.mubr.msk.bf16.vlgmr.msra.gmra.mrb[156].mxu0 %vm63_vm0, %v8460_v23 }
0x106b   :  { %6813 = vmatpush3.bf16.msra.mxu1 %v8142_v43  ;;  %6819 = vmatpush3.bf16.msra.mxu0 %v8191_v52 }
0x106c   :  { %6820 = vmatprep.subr.bf16.mxu0 %v8773_v48  ;;  %6826 = vmatprep.subr.bf16.mxu1 %v8773_v48 }
0x106d   :  { %6822 = vmatprep.mubr.msk.bf16.mxu0 %vm7220_vm1, %v8773_v48 }
0x106e   :  { %6815 = vmatmul.mubr.msk.bf16.vlgmr.msra.gmra.mrb[160].mxu1 %vm63_vm0, %v8460_v23 }
0x106f   :  { %6821 = vmatpush3.bf16.msra.mxu0 %v8209_v13  ;;  %6827 = vmatpush3.bf16.msra.mxu1 %v8160_v2 }
0x1070   :  { %6828 = vmatprep.subr.bf16.mxu1 %v8773_v48  ;;  %6834 = vmatprep.subr.bf16.mxu0 %v8773_v48 }
0x1071   :  { %6830 = vmatprep.mubr.msk.bf16.mxu1 %vm7220_vm1, %v8773_v48 }
0x1072   :  { %6823 = vmatmul.mubr.msk.bf16.vlgmr.msra.gmra.mrb[160].mxu0 %vm63_vm0, %v8460_v23 }
0x1073   :  { %6829 = vmatpush3.bf16.msra.mxu1 %v8178_v56  ;;  %6835 = vmatpush3.bf16.msra.mxu0 %v8227_v22 }
0x1074   :  { %6836 = vmatprep.subr.bf16.mxu0 %v8773_v48  ;;  %6842 = vmatprep.subr.bf16.mxu1 %v8773_v48 }
0x1075   :  { %6838 = vmatprep.mubr.msk.bf16.mxu0 %vm7220_vm1, %v8773_v48 }
0x1076   :  { %6831 = vmatmul.mubr.msk.bf16.vlgmr.msra.gmra.mrb[164].mxu1 %vm63_vm0, %v8460_v23 }
0x1077   :  { %6837 = vmatpush3.bf16.msra.mxu0 %v8239_v1  ;;  %6843 = vmatpush3.bf16.msra.mxu1 %v8196_v51 }
0x1078   :  { %6844 = vmatprep.subr.bf16.mxu1 %v8773_v48  ;;  %6850 = vmatprep.subr.bf16.mxu0 %v8773_v48 }
0x1079   :  { %6846 = vmatprep.mubr.msk.bf16.mxu1 %vm7220_vm1, %v8773_v48 }
0x107a   :  { %6839 = vmatmul.mubr.msk.bf16.vlgmr.msra.gmra.mrb[164].mxu0 %vm63_vm0, %v8460_v23 }
0x107b   :  { %6845 = vmatpush3.bf16.msra.mxu1 %v8214_v60  ;;  %6851 = vmatpush3.bf16.msra.mxu0 %v8250_v3 }
0x107c   :  { %6852 = vmatprep.subr.bf16.mxu0 %v8773_v48  ;;  %6854 = vmatprep.mubr.msk.bf16.mxu0 %vm7220_vm1, %v8773_v48 }
0x107d   :  { %6858 = vmatprep.subr.bf16.mxu1 %v8773_v48 }
0x107e   :  { %6847 = vmatmul.mubr.msk.bf16.vlgmr.msra.gmra.mrb[168].mxu1 %vm63_vm0, %v8460_v23 }
0x107f   :  { %6853 = vmatpush3.bf16.msra.mxu0 %v8259_v47  ;;  %6860 = vmatprep.mubr.msk.bf16.mxu1 %vm7220_vm1, %v8773_v48 }
0x1080   :  { %6864 = vmatprep.subr.bf16.mxu0 %v8773_v48 }
0x1082   :  { %6855 = vmatmul.mubr.msk.bf16.vlgmr.msra.gmra.mrb[168].mxu0 %vm63_vm0, %v8460_v23 }
0x1083   :  { %6866 = vmatprep.mubr.msk.bf16.mxu0 %vm7220_vm1, %v8773_v48 }
0x110d   :  { %v4133_v63 = vpop.f32.mrb[140].mxu1 }
0x110e   :  { %v6742_v46 = vpop.f32.mrb[141].mxu1  ;;  %v4281_v37 = vsel %vm63_vm0, %v4133_v63, 0.0 }
0x110f   :  { %v4136_v31 = vpop.f32.mrb[142].mxu1 }
0x1110   :  { %v6743_v32 = vpop.f32.mrb[143].mxu1  ;;  %v4288_v41 = vsel %vm63_vm0, %v4136_v31, 0.0 }
0x111d   :  { %v4180_v4 = vpop.f32.mrb[140].mxu0 }
0x111e   :  { %v4282_v59 = vsel %vm63_vm0, %v4180_v4, 0.0  ;;  %v6748_v38 = vpop.f32.mrb[141].mxu0 }
0x111f   :  { %v4283_v39 = vadd.f32 %v4282_v59, %v4281_v37  ;;  %v4183_v40 = vpop.f32.mrb[142].mxu0 }
0x1120   :  { %v4289_v42 = vsel %vm63_vm0, %v4183_v40, 0.0  ;;  %v6749_v43 = vpop.f32.mrb[143].mxu0 }
0x1121   :  { %v4290_v44 = vadd.f32 %v4289_v42, %v4288_v41  ;;  %v4227_v2 = vpop.f32.mrb[144].mxu1 }
0x1122   :  { %v4284_v11 = vsel %vm63_vm0, %v4227_v2, 0.0  ;;  %v6754_v56 = vpop.f32.mrb[145].mxu1 }
0x1123   :  { %v4285_v52 = vadd.f32 %v4284_v11, %v4283_v39  ;;  %v4230_v51 = vpop.f32.mrb[146].mxu1 }
0x1124   :  { %v4291_v13 = vsel %vm63_vm0, %v4230_v51, 0.0  ;;  %v6755_v60 = vpop.f32.mrb[147].mxu1 }
0x1125   :  { %v4292_v22 = vadd.f32 %v4291_v13, %v4290_v44  ;;  %v4274_v1 = vpop.f32.mrb[144].mxu0 }
0x1126   :  { %v4286_v3 = vsel %vm63_vm0, %v4274_v1, 0.0  ;;  %v6760_v47 = vpop.f32.mrb[145].mxu0 }
0x1127   :  { %v8563_v61 = vadd.f32 %v4286_v3, %v4285_v52  ;;  %v4277_v49 = vpop.f32.mrb[146].mxu0 }
0x1128   :  { %v4293_v17 = vsel %vm63_vm0, %v4277_v49, 0.0  ;;  %v6761_v6 = vpop.f32.mrb[147].mxu0 }
0x1129   :  { %v8566_v30 = vadd.f32 %v4293_v17, %v4292_v22  ;;  %v4332_v14 = vpop.f32.mrb[148].mxu1 }
0x112a   :  { %v6768_v35 = vpop.f32.mrb[149].mxu1 }
0x112b   :  { %v4335_v20 = vpop.f32.mrb[150].mxu1 }
0x112c   :  { %v4790_v10 = vpack.c.bf16 %v4335_v20, %v4332_v14  ;;  %v6769_v26 = vpop.f32.mrb[151].mxu1 }
0x112d   :  { %v4373_v58 = vpop.f32.mrb[148].mxu0 }
0x112e   :  { %v6776_v15 = vpop.f32.mrb[149].mxu0 }
0x112f   :  { %v4376_v57 = vpop.f32.mrb[150].mxu0 }
0x1130   :  { %v4791_v24 = vpack.c.bf16 %v4376_v57, %v4373_v58  ;;  %v6777_v0 = vpop.f32.mrb[151].mxu0 }
0x1131   :  { %v4414_v28 = vpop.f32.mrb[152].mxu1 }
0x1132   :  { %v6784_v54 = vpop.f32.mrb[153].mxu1 }
0x1133   :  { %v4417_v25 = vpop.f32.mrb[154].mxu1 }
0x1134   :  { %v4792_v34 = vpack.c.bf16 %v4417_v25, %v4414_v28  ;;  %v6785_v8 = vpop.f32.mrb[155].mxu1 }
0x1135   :  { %v4455_v5 = vpop.f32.mrb[152].mxu0 }
0x1136   :  { %v6792_v18 = vpop.f32.mrb[153].mxu0 }
0x1137   :  { %v4458_v55 = vpop.f32.mrb[154].mxu0 }
0x1138   :  { %v4793_v27 = vpack.c.bf16 %v4458_v55, %v4455_v5  ;;  %v6793_v19 = vpop.f32.mrb[155].mxu0 }
0x1139   :  { %v4496_v23 = vpop.f32.mrb[156].mxu1 }
0x113a   :  { %v6800_v63 = vpop.f32.mrb[157].mxu1 }
0x113b   :  { %v4499_v46 = vpop.f32.mrb[158].mxu1 }
0x113c   :  { %v4794_v31 = vpack.c.bf16 %v4499_v46, %v4496_v23  ;;  %v6801_v32 = vpop.f32.mrb[159].mxu1 }
0x113d   :  { %v4537_v4 = vpop.f32.mrb[156].mxu0 }
0x113e   :  { %v4802_v37 = vsel %vm804_vm2, %v4794_v31, 0  ;;  %v6808_v59 = vpop.f32.mrb[157].mxu0 }
0x113f   :  { %v4540_v38 = vpop.f32.mrb[158].mxu0  ;;  %6859 = vmatpush3.bf16.xpose.msra.mxu1 %v4802_v37 }
0x1140   :  { %v4795_v39 = vpack.c.bf16 %v4540_v38, %v4537_v4  ;;  %v6809_v40 = vpop.f32.mrb[159].mxu0  ;;  %6870 = vmatprep.subr.bf16.mxu1 %v8773_v48 }
0x1141   :  { %v4578_v41 = vpop.f32.mrb[160].mxu1 }
0x1142   :  { %v4849_v42 = vsel %vm804_vm2, %v4795_v39, 0  ;;  %v6816_v43 = vpop.f32.mrb[161].mxu1 }
0x1143   :  { %v4581_v44 = vpop.f32.mrb[162].mxu1  ;;  %6865 = vmatpush3.bf16.xpose.msra.mxu0 %v4849_v42 }
0x1144   :  { %v4796_v2 = vpack.c.bf16 %v4581_v44, %v4578_v41  ;;  %v6817_v11 = vpop.f32.mrb[163].mxu1  ;;  %6876 = vmatprep.subr.bf16.mxu0 %v8773_v48 }
0x1145   :  { %v4619_v56 = vpop.f32.mrb[160].mxu0 }
0x1146   :  { %v4896_v52 = vsel %vm804_vm2, %v4796_v2, 0  ;;  %v6824_v51 = vpop.f32.mrb[161].mxu0  ;;  %6861 = vmatmul.mubr.msk.bf16.vlgmr.msra.gmra.mrb[172].mxu1 %vm804_vm2, %v4790_v10  ;;  %v8782_v2 = vld [vmem:[#allocation7_spill] sm:$0xff] }
0x1147   :  { %v4622_v13 = vpop.f32.mrb[162].mxu0  ;;  %6871 = vmatpush3.bf16.xpose.msra.mxu1 %v4896_v52  ;;  %6872 = vmatprep.mubr.msk.bf16.mxu1 %vm7220_vm1, %v8773_v48 }
0x1148   :  { %v4797_v60 = vpack.c.bf16 %v4622_v13, %v4619_v56  ;;  %v6825_v22 = vpop.f32.mrb[163].mxu0  ;;  %6882 = vmatprep.subr.bf16.mxu1 %v8773_v48  ;;  %v8783_v13 = vld [vmem:[#allocation8_spill] sm:$0xff] }
0x1149   :  { %v4660_v1 = vpop.f32.mrb[164].mxu1 }
0x114a   :  { %v4943_v3 = vsel %vm804_vm2, %v4797_v60, 0  ;;  %v6832_v47 = vpop.f32.mrb[165].mxu1  ;;  %6867 = vmatmul.mubr.msk.bf16.vlgmr.msra.gmra.mrb[172].mxu0 %vm804_vm2, %v4791_v24 }
0x114b   :  { %v4663_v49 = vpop.f32.mrb[166].mxu1  ;;  %6877 = vmatpush3.bf16.xpose.msra.mxu0 %v4943_v3  ;;  %6878 = vmatprep.mubr.msk.bf16.mxu0 %vm7220_vm1, %v8773_v48  ;;  %v8784_v47 = vld [vmem:[#allocation9_spill] sm:$0xff] }
0x114c   :  { %v5086_v17 = vpack.c.bf16 %v4663_v49, %v4660_v1  ;;  %v6833_v6 = vpop.f32.mrb[167].mxu1  ;;  %6888 = vmatprep.subr.bf16.mxu0 %v8773_v48 }
0x114d   :  { %v4701_v14 = vpop.f32.mrb[164].mxu0 }
0x114e   :  { %v6840_v35 = vpop.f32.mrb[165].mxu0  ;;  %6873 = vmatmul.mubr.msk.bf16.vlgmr.msra.gmra.mrb[176].mxu1 %vm804_vm2, %v4792_v34 }
0x114f   :  { %v4704_v20 = vpop.f32.mrb[166].mxu0  ;;  %6883 = vmatpush3.bf16.msra.mxu1 %v5086_v17  ;;  %6884 = vmatprep.mubr.msk.bf16.mxu1 %vm7220_vm1, %v8773_v48 }
0x1150   :  { %v5087_v10 = vpack.c.bf16 %v4704_v20, %v4701_v14  ;;  %v6841_v26 = vpop.f32.mrb[167].mxu0  ;;  %6894 = vmatprep.subr.bf16.mxu1 %v8773_v48 }
0x1151   :  { %v8586_v58 = vpop.f32.mrb[168].mxu1 }
0x1152   :  { %v6848_v15 = vpop.f32.mrb[169].mxu1  ;;  %6879 = vmatmul.mubr.msk.bf16.vlgmr.msra.gmra.mrb[176].mxu0 %vm804_vm2, %v4793_v27 }
0x1153   :  { %v8589_v57 = vpop.f32.mrb[170].mxu1  ;;  %6889 = vmatpush3.bf16.msra.mxu0 %v5087_v10  ;;  %6890 = vmatprep.mubr.msk.bf16.mxu0 %vm7220_vm1, %v8773_v48 }
0x1154   :  { %v5088_v24 = vpack.c.bf16 %v8589_v57, %v8586_v58  ;;  %v6849_v0 = vpop.f32.mrb[171].mxu1  ;;  %6900 = vmatprep.subr.bf16.mxu0 %v8773_v48 }
0x1155   :  { %v8596_v28 = vpop.f32.mrb[168].mxu0 }
0x1156   :  { %v6856_v54 = vpop.f32.mrb[169].mxu0 }
0x1157   :  { %v8598_v25 = vpop.f32.mrb[170].mxu0 }
0x1158   :  { %v5089_v34 = vpack.c.bf16 %v8598_v25, %v8596_v28  ;;  %v6857_v8 = vpop.f32.mrb[171].mxu0 }
0x1219   :  { %v4838_v5 = vpop.f32.mrb[172].mxu1 }
0x121a   :  { %v4839_v18 = vadd.f32 %v8307_v21, %v4838_v5  ;;  %v6862_v55 = vpop.f32.mrb[173].mxu1 }
0x121b   :  { %v4841_v27 = vpop.f32.mrb[174].mxu1 }
0x121c   :  { %v4842_v19 = vadd.f32 %v8313_v9, %v4841_v27  ;;  %v6863_v23 = vpop.f32.mrb[175].mxu1  ;;  %v4986_v63 = vadd.f32 %v4839_v18, %v7876_v7 }
0x121d   :  { %v4885_v46 = vpop.f32.mrb[172].mxu0 }
0x121e   :  { %v4886_v31 = vadd.f32 %v8329_v36, %v4885_v46  ;;  %v6868_v32 = vpop.f32.mrb[173].mxu0  ;;  %v4994_v4 = vsel %vm1005_vm4, %v4986_v63, -inf  ;;  %v4987_v37 = vadd.f32 %v4842_v19, %v7876_v7 }
0x121f   :  { %4995 = vmax.xlane.f32.xlu0 %v4994_v4  ;;  %v4888_v59 = vpop.f32.mrb[174].mxu0 }
0x1220   :  { %v4889_v38 = vadd.f32 %v8341_v50, %v4888_v59  ;;  %v6869_v21 = vpop.f32.mrb[175].mxu0  ;;  %v4997_v39 = vsel %vm1005_vm4, %v4987_v37, -inf  ;;  %v4988_v9 = vadd.f32 %v4886_v31, %v7876_v7 }
0x1221   :  { %4998 = vmax.xlane.f32.xlu1 %v4997_v39  ;;  %v4932_v40 = vpop.f32.mrb[176].mxu1 }
0x1222   :  { %v4933_v41 = vadd.f32 %v8323_v33, %v4932_v40  ;;  %v6874_v42 = vpop.f32.mrb[177].mxu1  ;;  %v5000_v36 = vsel %vm1005_vm4, %v4988_v9, -inf  ;;  %v4989_v43 = vadd.f32 %v4889_v38, %v7876_v7 }
0x1223   :  { %v4935_v44 = vpop.f32.mrb[178].mxu1  ;;  %5001 = vmax.xlane.f32.xlu0 %v5000_v36 }
0x1224   :  { %v4936_v11 = vadd.f32 %v8782_v2, %v4935_v44  ;;  %v6875_v56 = vpop.f32.mrb[179].mxu1  ;;  %v5003_v50 = vsel %vm1005_vm4, %v4989_v43, -inf  ;;  %v4990_v52 = vadd.f32 %v4933_v41, %v7876_v7 }
0x1225   :  { %5004 = vmax.xlane.f32.xlu1 %v5003_v50  ;;  %v4979_v51 = vpop.f32.mrb[176].mxu0 }
0x1226   :  { %v4980_v60 = vadd.f32 %v8783_v13, %v4979_v51  ;;  %v6880_v22 = vpop.f32.mrb[177].mxu0  ;;  %v5006_v33 = vsel %vm1005_vm4, %v4990_v52, -inf  ;;  %v4991_v1 = vadd.f32 %v4936_v11, %v7876_v7 }
0x1227   :  { %5007 = vmax.xlane.f32.xlu0 %v5006_v33  ;;  %v4982_v3 = vpop.f32.mrb[178].mxu0  ;;  %v8786_v22 = vld [vmem:[#allocation6_spill] sm:$0xff] }
0x1228   :  { %v4983_v49 = vadd.f32 %v8784_v47, %v4982_v3  ;;  %v6881_v17 = vpop.f32.mrb[179].mxu0  ;;  %v5009_v6 = vsel %vm1005_vm4, %v4991_v1, -inf  ;;  %v4992_v14 = vadd.f32 %v4980_v60, %v7876_v7  ;;  %v8637_v33 = vadd.f32 %v8566_v30, %v8786_v22 }
0x1229   :  { %5010 = vmax.xlane.f32.xlu1 %v5009_v6 }
0x122a   :  { %v5012_v35 = vsel %vm1005_vm4, %v4992_v14, -inf  ;;  %v4993_v20 = vadd.f32 %v4983_v49, %v7876_v7  ;;  %v5467_v6 = vmul.f32 %v8637_v33, %v8637_v33 }
0x122b   :  { %5013 = vmax.xlane.f32.xlu0 %v5012_v35 }
0x122c   :  { %v5015_v10 = vsel %vm1005_vm4, %v4993_v20, -inf }
0x122d   :  { %5016 = vmax.xlane.f32.xlu1 %v5015_v10 }
0x12ac   :  { %v4996_v26 = vpop.xlane.xlu0 %4995 }
0x12ad   :  { %v5018_v15 = vsub.f32 %v4986_v63, %v4996_v26 }
0x12ae   :  { %v4999_v0 = vpop.xlane.xlu1 %4998 }
0x12af   :  { %v5026_v54 = vmul.f32 1.442695, %v5018_v15  ;;  %v5019_v8 = vsub.f32 %v4987_v37, %v4999_v0 }
0x12b0   :  { %v5002_v5 = vpop.xlane.xlu0 %5001 }
0x12b1   :  { %7135 = vpow2.f32 %v5026_v54  ;;  %v5028_v18 = vmul.f32 1.442695, %v5019_v8  ;;  %v5020_v55 = vsub.f32 %v4988_v9, %v5002_v5 }
0x12b2   :  { %v5005_v27 = vpop.xlane.xlu1 %5004 }
0x12b3   :  { %7137 = vpow2.f32 %v5028_v18  ;;  %v5030_v19 = vmul.f32 1.442695, %v5020_v55  ;;  %v5021_v23 = vsub.f32 %v4989_v43, %v5005_v27 }
0x12b4   :  { %v5008_v46 = vpop.xlane.xlu0 %5007 }
0x12b5   :  { %7139 = vpow2.f32 %v5030_v19  ;;  %v5032_v7 = vmul.f32 1.442695, %v5021_v23  ;;  %v5022_v31 = vsub.f32 %v4990_v52, %v5008_v46  ;;  %v8785_v52 = vld [vmem:[#allocation5_spill] sm:$0xff] }
0x12b6   :  { %v5011_v32 = vpop.xlane.xlu1 %5010  ;;  %v8632_v51 = vadd.f32 %v8563_v61, %v8785_v52 }
0x12b7   :  { %7141 = vpow2.f32 %v5032_v7  ;;  %v5034_v4 = vmul.f32 1.442695, %v5022_v31  ;;  %v5023_v59 = vsub.f32 %v4991_v1, %v5011_v32 }
0x12b8   :  { %v5014_v63 = vpop.xlane.xlu0 %5013  ;;  %v5466_v49 = vmul.f32 %v8632_v51, %v8632_v51 }
0x12b9   :  { %7143 = vpow2.f32 %v5034_v4  ;;  %v5036_v38 = vmul.f32 1.442695, %v5023_v59  ;;  %v5024_v37 = vsub.f32 %v4992_v14, %v5014_v63  ;;  %v5473_v14 = vsel %vm63_vm0, %v5467_v6, 0.0 }
0x12ba   :  { %v5017_v21 = vpop.xlane.xlu1 %5016  ;;  %v5470_v30 = vsel %vm63_vm0, %v5466_v49, 0.0 }
0x12bb   :  { %v7136_v39 = vpop.eup %7135  ;;  %7145 = vpow2.f32 %v5036_v38  ;;  %v5038_v9 = vmul.f32 1.442695, %v5024_v37  ;;  %v5025_v40 = vsub.f32 %v4993_v20, %v5017_v21 }
0x12bc   :  { %v5042_v41 = vsel %vm1005_vm4, %v7136_v39, 0.0 }
0x12bd   :  { %v7138_v42 = vpop.eup %7137  ;;  %7147 = vpow2.f32 %v5038_v9  ;;  %v5040_v36 = vmul.f32 1.442695, %v5025_v40  ;;  %5043 = vadd.xlane.f32.xlu0 %v5042_v41 }
0x12be   :  { %v5045_v43 = vsel %vm1005_vm4, %v7138_v42, 0.0 }
0x12bf   :  { %v7140_v44 = vpop.eup %7139  ;;  %7149 = vpow2.f32 %v5040_v36  ;;  %5046 = vadd.xlane.f32.xlu1 %v5045_v43 }
0x12c0   :  { %v5048_v2 = vsel %vm1005_vm4, %v7140_v44, 0.0 }
0x12c1   :  { %v7142_v11 = vpop.eup %7141  ;;  %5049 = vadd.xlane.f32.xlu0 %v5048_v2 }
0x12c2   :  { %v5051_v56 = vsel %vm1005_vm4, %v7142_v11, 0.0 }
0x12c3   :  { %v7144_v50 = vpop.eup %7143  ;;  %5052 = vadd.xlane.f32.xlu1 %v5051_v56 }
0x12c4   :  { %v5054_v13 = vsel %vm1005_vm4, %v7144_v50, 0.0 }
0x12c5   :  { %v7146_v60 = vpop.eup %7145  ;;  %5055 = vadd.xlane.f32.xlu0 %v5054_v13 }
0x12c6   :  { %v5057_v1 = vsel %vm1005_vm4, %v7146_v60, 0.0 }
0x12c7   :  { %v7148_v3 = vpop.eup %7147  ;;  %5058 = vadd.xlane.f32.xlu1 %v5057_v1  ;;  %v8681_v1 = vld [vmem:[%s8760_s8 + $0x1] ss:$0 sm:$0xff] }
0x12c8   :  { %v5060_v47 = vsel %vm1005_vm4, %v7148_v3, 0.0 }
0x12c9   :  { %v7150_v17 = vpop.eup %7149  ;;  %5061 = vadd.xlane.f32.xlu0 %v5060_v47 }
0x12ca   :  { %v5063_v61 = vsel %vm1005_vm4, %v7150_v17, 0.0 }
0x12cb   :  { %5064 = vadd.xlane.f32.xlu1 %v5063_v61 }
0x12cd   :  { %5471 = vadd.xlane.f32.xlu0 %v5470_v30 }
0x12cf   :  { %5474 = vadd.xlane.f32.xlu1 %v5473_v14 }
0x134a   :  { %v5044_v35 = vpop.xlane.xlu0 %5043 }
0x134b   :  { %7151 = vrcp.f32 %v5044_v35 }
0x134c   :  { %v5047_v20 = vpop.xlane.xlu1 %5046 }
0x134d   :  { %7153 = vrcp.f32 %v5047_v20 }
0x134e   :  { %v5050_v10 = vpop.xlane.xlu0 %5049 }
0x134f   :  { %7155 = vrcp.f32 %v5050_v10 }
0x1350   :  { %v5053_v26 = vpop.xlane.xlu1 %5052 }
0x1351   :  { %7157 = vrcp.f32 %v5053_v26 }
0x1352   :  { %v5056_v15 = vpop.xlane.xlu0 %5055 }
0x1353   :  { %7159 = vrcp.f32 %v5056_v15 }
0x1354   :  { %v5059_v0 = vpop.xlane.xlu1 %5058 }
0x1355   :  { %v7152_v54 = vpop.eup %7151  ;;  %7161 = vrcp.f32 %v5059_v0 }
0x1356   :  { %v5062_v8 = vpop.xlane.xlu0 %5061  ;;  %v5067_v18 = vmul.f32 %v7152_v54, %v7136_v39 }
0x1357   :  { %v7154_v5 = vpop.eup %7153  ;;  %7163 = vrcp.f32 %v5062_v8 }
0x1358   :  { %v5069_v55 = vmul.f32 %v7154_v5, %v7138_v42  ;;  %v5065_v27 = vpop.xlane.xlu1 %5064 }
0x1359   :  { %v7156_v19 = vpop.eup %7155  ;;  %7165 = vrcp.f32 %v5065_v27 }
0x135a   :  { %v5082_v23 = vpack.c.bf16 %v5069_v55, %v5067_v18  ;;  %v5071_v7 = vmul.f32 %v7156_v19, %v7140_v44  ;;  %v5472_v25 = vpop.xlane.xlu0 %5471 }
0x135b   :  { %v7158_v46 = vpop.eup %7157  ;;  %v5482_v9 = vmul.f32 0.03125, %v5472_v25 }
0x135c   :  { %v5073_v31 = vmul.f32 %v7158_v46, %v7142_v11  ;;  %6885 = vmatmul.mubr.msk.bf16.vlgmr.msra.gmra.mrb[180].mxu1 %vm1005_vm4, %v5082_v23  ;;  %v5475_v28 = vpop.xlane.xlu1 %5474 }
0x135d   :  { %v7160_v32 = vpop.eup %7159  ;;  %6895 = vmatpush3.bf16.msra.mxu1 %v5088_v24  ;;  %6896 = vmatprep.mubr.msk.bf16.mxu1 %vm7220_vm1, %v8773_v48  ;;  %v5486_v40 = vadd.f32 1e-06, %v5482_v9 }
0x135e   :  { %v5083_v4 = vpack.c.bf16 %v5073_v31, %v5071_v7  ;;  %6906 = vmatprep.subr.bf16.mxu1 %v8773_v48  ;;  %v5075_v63 = vmul.f32 %v7160_v32, %v7144_v50 }
0x135f   :  { %v7162_v59 = vpop.eup %7161 }
0x1360   :  { %v5077_v38 = vmul.f32 %v7162_v59, %v7146_v60  ;;  %6891 = vmatmul.mubr.msk.bf16.vlgmr.msra.gmra.mrb[180].mxu0 %vm1005_vm4, %v5083_v4 }
0x1361   :  { %v7164_v37 = vpop.eup %7163  ;;  %6901 = vmatpush3.bf16.msra.mxu0 %v5089_v34  ;;  %6902 = vmatprep.mubr.msk.bf16.mxu0 %vm7220_vm1, %v8773_v48  ;;  %v5483_v34 = vmul.f32 0.03125, %v5475_v28 }
0x1362   :  { %v5084_v58 = vpack.c.bf16 %v5077_v38, %v5075_v63  ;;  %6912 = vmatprep.subr.bf16.mxu0 %v8773_v48  ;;  %v5079_v24 = vmul.f32 %v7164_v37, %v7148_v3 }
0x1363   :  { %v7166_v57 = vpop.eup %7165 }
0x1364   :  { %v5081_v21 = vmul.f32 %v7166_v57, %v7150_v17  ;;  %6897 = vmatmul.mubr.msk.bf16.vlgmr.msra.gmra.mrb[184].mxu1 %vm1005_vm4, %v5084_v58 }
0x1365   :  { %6907 = vmatpush3.bf16.msra.mxu1 %v8414_v45  ;;  %6908 = vmatprep.mubr.msk.bf16.mxu1 %vm7220_vm1, %v8773_v48  ;;  %v5487_v45 = vadd.f32 1e-06, %v5483_v34 }
0x1366   :  { %v5085_v39 = vpack.c.bf16 %v5081_v21, %v5079_v24  ;;  %6918 = vmatprep.subr.bf16.mxu1 %v8773_v48 }
0x1367   :  { %7167 = vrsqrt.f32 %v5487_v45 }
0x1368   :  { %6903 = vmatmul.mubr.msk.bf16.vlgmr.msra.gmra.mrb[184].mxu0 %vm1005_vm4, %v5085_v39  ;;  %7169 = vrsqrt.f32 %v5486_v40 }
0x1369   :  { %6913 = vmatpush3.bf16.msra.mxu0 %v8422_v29  ;;  %6914 = vmatprep.mubr.msk.bf16.mxu0 %vm7220_vm1, %v8773_v48 }
0x136a   :  { %6924 = vmatprep.subr.bf16.mxu0 %v8773_v48 }
0x1371   :  { %v7168_v42 = vpop.eup %7167 }
0x1372   :  { %v7170_v44 = vpop.eup %7169  ;;  %v5495_v56 = vmul.f32 %v7168_v42, %v8637_v33 }
0x1373   :  { %v5494_v13 = vmul.f32 %v7170_v44, %v8632_v51  ;;  %v7009_v44 = vld [vmem:[%s8761_s9 + $0x10] sm:$0xff]  }
0x1374   :  { %v5505_v47 = vmul.f32 %v8681_v1, %v5495_v56 }
0x142f   :  { %v5127_v41 = vpop.f32.mrb[180].mxu1 }
0x1430   :  { %v6886_v36 = vpop.f32.mrb[181].mxu1 }
0x1431   :  { %v5130_v43 = vpop.f32.mrb[182].mxu1 }
0x1432   :  { %v5266_v2 = vpack.c.bf16 %v5130_v43, %v5127_v41  ;;  %v6887_v29 = vpop.f32.mrb[183].mxu1 }
0x1433   :  { %v5171_v11 = vpop.f32.mrb[180].mxu0 }
0x1434   :  { %v6892_v50 = vpop.f32.mrb[181].mxu0  ;;  %6909 = vmatmul.mubr.msk.bf16.vlgmr.msra.gmra.mrb[188].mxu1 %vm804_vm2, %v5266_v2  ;;  %v7012_v2 = vld [vmem:[%s8762_s10 + $0x28] sm:$0xff]  }
0x1435   :  { %v5174_v52 = vpop.f32.mrb[182].mxu0  ;;  %6919 = vmatpush3.bf16.msra.mxu1 %v8430_v12  ;;  %6920 = vmatprep.mubr.msk.bf16.mxu1 %vm7220_vm1, %v8773_v48  ;;  %v5504_v12 = vmul.f32 %v8681_v1, %v5494_v13 }
0x1436   :  { %v5267_v60 = vpack.c.bf16 %v5174_v52, %v5171_v11  ;;  %v6893_v22 = vpop.f32.mrb[183].mxu0  ;;  %6930 = vmatprep.subr.bf16.mxu1 %v7009_v44 }
0x1437   :  { %v5215_v3 = vpop.f32.mrb[184].mxu1  ;;  %v5508_v14 = vpack.c.bf16 %v5505_v47, %v5504_v12 }
0x1438   :  { %v6898_v49 = vpop.f32.mrb[185].mxu1  ;;  %6915 = vmatmul.mubr.msk.bf16.vlgmr.msra.gmra.mrb[188].mxu0 %vm804_vm2, %v5267_v60 }
0x1439   :  { %v5218_v17 = vpop.f32.mrb[186].mxu1  ;;  %6925 = vmatpush3.bf16.msra.mxu0 %v8441_v62  ;;  %6926 = vmatprep.mubr.msk.bf16.mxu0 %vm7220_vm1, %v8773_v48 }
0x143a   :  { %v5268_v61 = vpack.c.bf16 %v5218_v17, %v5215_v3  ;;  %v6899_v6 = vpop.f32.mrb[187].mxu1 }
0x143b   :  { %v5259_v30 = vpop.f32.mrb[184].mxu0  ;;  %v7014_v6 = vld [vmem:[%s8762_s10 + $0x38] sm:$0xff]  }
0x143c   :  { %v6904_v35 = vpop.f32.mrb[185].mxu0  ;;  %6921 = vmatmul.mubr.msk.bf16.vlgmr.msra.gmra.mrb[192].mxu1 %vm804_vm2, %v5268_v61  ;;  %v7013_v61 = vld [vmem:[%s8762_s10 + $0x30] sm:$0xff]  }
0x143d   :  { %v5262_v20 = vpop.f32.mrb[186].mxu0  ;;  %6934 = vmatprep.mubr.msk.bf16.mxu1 %vm63_vm0, %v5508_v14  ;;  %6931 = vmatpush3.bf16.msra.mxu1 %v7009_v44 }
0x143e   :  { %v5269_v10 = vpack.c.bf16 %v5262_v20, %v5259_v30  ;;  %v6905_v26 = vpop.f32.mrb[187].mxu0 }
0x1440   :  { %6927 = vmatmul.mubr.msk.bf16.vlgmr.msra.gmra.mrb[192].mxu0 %vm804_vm2, %v5269_v10 }
0x1507   :  { %v5307_v62 = vpop.f32.mrb[188].mxu1 }
0x1508   :  { %v6910_v15 = vpop.f32.mrb[189].mxu1  ;;  %v5446_v48 = vsel %vm63_vm0, %v5307_v62, 0.0 }
0x1509   :  { %v5310_v0 = vpop.f32.mrb[190].mxu1 }
0x150a   :  { %v6911_v54 = vpop.f32.mrb[191].mxu1  ;;  %v5453_v19 = vsel %vm63_vm0, %v5310_v0, 0.0 }
0x150b   :  { %v5351_v8 = vpop.f32.mrb[188].mxu0 }
0x150c   :  { %v5447_v5 = vsel %vm63_vm0, %v5351_v8, 0.0  ;;  %v6916_v18 = vpop.f32.mrb[189].mxu0 }
0x150d   :  { %v5448_v55 = vadd.f32 %v5447_v5, %v5446_v48  ;;  %v5354_v27 = vpop.f32.mrb[190].mxu0 }
0x150e   :  { %v5454_v23 = vsel %vm63_vm0, %v5354_v27, 0.0  ;;  %v6917_v46 = vpop.f32.mrb[191].mxu0 }
0x150f   :  { %v5455_v7 = vadd.f32 %v5454_v23, %v5453_v19  ;;  %v5395_v31 = vpop.f32.mrb[192].mxu1 }
0x1510   :  { %v5449_v32 = vsel %vm63_vm0, %v5395_v31, 0.0  ;;  %v6922_v4 = vpop.f32.mrb[193].mxu1 }
0x1511   :  { %v5450_v59 = vadd.f32 %v5449_v32, %v5448_v55  ;;  %v5398_v63 = vpop.f32.mrb[194].mxu1 }
0x1512   :  { %v5456_v38 = vsel %vm63_vm0, %v5398_v63, 0.0  ;;  %v6923_v37 = vpop.f32.mrb[195].mxu1 }
0x1513   :  { %v5457_v58 = vadd.f32 %v5456_v38, %v5455_v7  ;;  %v5439_v57 = vpop.f32.mrb[192].mxu0 }
0x1514   :  { %v5451_v24 = vsel %vm63_vm0, %v5439_v57, 0.0  ;;  %v6928_v21 = vpop.f32.mrb[193].mxu0 }
0x1515   :  { %v5452_v39 = vadd.f32 %v5451_v24, %v5450_v59  ;;  %v5442_v28 = vpop.f32.mrb[194].mxu0 }
0x1516   :  { %v5458_v25 = vsel %vm63_vm0, %v5442_v28, 0.0  ;;  %v6929_v34 = vpop.f32.mrb[195].mxu0 }
0x1517   :  { %v5462_v9 = vadd.f32 %v5452_v39, %v8374_v16  ;;  %v5459_v45 = vadd.f32 %v5458_v25, %v5457_v58  ;;  %v7010_v16 = vld [vmem:[%s8761_s9 + $0x18] sm:$0xff]  }
0x1518   :  { %6932 = vmatprep.subr.bf16.mxu1 %v7010_v16 }
0x1519   :  { %v5463_v40 = vadd.f32 %v5459_v45, %v8379_v53  ;;  %v5468_v41 = vmul.f32 %v5462_v9, %v5462_v9  ;;  %6933 = vmatpush3.bf16.msra.mxu1 %v7010_v16  ;;  %v7011_v53 = vld [vmem:[%s8762_s10 + $0x20] sm:$0xff]  }
0x151a   :  { %6938 = vmatprep.subr.bf16.mxu0 %v7011_v53  ;;  %v5977_v45 = vld [vmem:[%s8763_s11] ss:$0 sm:$0xff]  ;;  %s7195_s11 = scalar_lea.vmem %s5733_s28, 512 }
0x151b   :  { %v5476_v42 = vsel %vm63_vm0, %v5468_v41, 0.0  ;;  %v5469_v36 = vmul.f32 %v5463_v40, %v5463_v40  ;;  %6939 = vmatpush3.bf16.msra.mxu0 %v7011_v53  ;;  %p7196_p0 = scmp.ne.s32.totalorder %s5733_s28, %s7195_s11  ;;  %p7201_p2 = scmp.lt.s32.totalorder %s7195_s11, %s7195_s11 }
0x151c   :  { %5477 = vadd.xlane.f32.xlu0 %v5476_v42  ;;  %6940 = vmatprep.subr.bf16.mxu0 %v7012_v2 }
0x151d   :  { %v5479_v43 = vsel %vm63_vm0, %v5469_v36, 0.0  ;;  %p7202_p3 = por %p7201_p2, %p7200_p1 }
0x151e   :  { %5480 = vadd.xlane.f32.xlu1 %v5479_v43 }
0x151f   :  { %6941 = vmatpush3.bf16.msra.mxu0 %v7012_v2  ;;  %p7203_p4 = pnand %p7202_p3, %p7196_p0 }
0x1520   :  { %6942 = vmatprep.subr.bf16.mxu0 %v7013_v61 }
0x1523   :  { %6943 = vmatpush3.bf16.msra.mxu0 %v7013_v61 }
0x1524   :  { %6944 = vmatprep.subr.bf16.mxu0 %v7014_v6 }
0x1527   :  { %6945 = vmatpush3.bf16.msra.mxu0 %v7014_v6 }
0x15a9   :  { %v5478_v29 = vpop.xlane.xlu0 %5477 }
0x15aa   :  { %v5484_v11 = vmul.f32 0.03125, %v5478_v29 }
0x15ab   :  { %v5481_v56 = vpop.xlane.xlu1 %5480 }
0x15ac   :  { %v5488_v50 = vadd.f32 1e-06, %v5484_v11  ;;  %v5485_v52 = vmul.f32 0.03125, %v5481_v56 }
0x15ae   :  { %7171 = vrsqrt.f32 %v5488_v50  ;;  %v5489_v13 = vadd.f32 1e-06, %v5485_v52 }
0x15b0   :  { %7173 = vrsqrt.f32 %v5489_v13 }
0x15b8   :  { %v7172_v60 = vpop.eup %7171 }
0x15b9   :  { %v5496_v22 = vmul.f32 %v7172_v60, %v5462_v9 }
0x15ba   :  { %v7174_v3 = vpop.eup %7173 }
0x15bb   :  { %v5497_v47 = vmul.f32 %v7174_v3, %v5463_v40  ;;  %v5506_v49 = vmul.f32 %v8681_v1, %v5496_v22 }
0x15bd   :  { %v5507_v17 = vmul.f32 %v8681_v1, %v5497_v47 }
0x15bf   :  { %v5509_v12 = vpack.c.bf16 %v5507_v17, %v5506_v49 }
0x15c1   :  { %6935 = vmatmul.mubr.msk.bf16.vlgmr.msra.gmra.mrb[196].mxu1 %vm63_vm0, %v5509_v12 }
0x1694   :  { %v6936_v30 = vpop.f32.mrb[196].mxu1 }
0x1695   :  { %v5567_v14 = vpop.f32.mrb[197].mxu1  ;;  %v5584_v20 = vmax.f32 %v6936_v30, 0.0 }
0x1696   :  { %v6937_v35 = vpop.f32.mrb[198].mxu1  ;;  %v5582_v26 = vmax.f32 %v5567_v14, 0.0 }
0x1697   :  { %v5585_v1 = vmax.f32 %v6937_v35, 0.0  ;;  %v5570_v10 = vpop.f32.mrb[199].mxu1 }
0x1698   :  { %v5583_v62 = vmax.f32 %v5570_v10, 0.0 }
0x1699   :  { %v5587_v15 = vpack.c.bf16 %v5585_v1, %v5584_v20 }
0x169a   :  { %v5586_v0 = vpack.c.bf16 %v5583_v62, %v5582_v26 }
0x169c   :  { %6946 = vmatprep.mubr.msk.bf16.mxu0 %vm2812_vm6, %v5586_v0 }
0x169d   :  { %6947 = vmatmul.mubr.msk.bf16.vlgmr.msra.gmra.mrb[196].mxu0 %vm2812_vm6, %v5587_v15 }
0x1770   :  { %v6948_v54 = vpop.f32.mrb[196].mxu0 }
0x1771   :  { %v5661_v8 = vpop.f32.mrb[197].mxu0  ;;  %v5678_v48 = vadd.f32 %v6948_v54, %v5462_v9 }
0x1772   :  { %v5676_v5 = vadd.f32 %v5661_v8, %v8632_v51  ;;  %v6949_v18 = vpop.f32.mrb[198].mxu0 }
0x1773   :  { %v5664_v55 = vpop.f32.mrb[199].mxu0  ;;  %v5679_v27 = vadd.f32 %v6949_v18, %v5463_v40  ;;  %v5683_v31 = vmul.f32 %v5678_v48, %v5678_v48 }
0x1774   :  { %v5677_v19 = vadd.f32 %v5664_v55, %v8637_v33  ;;  %v5681_v23 = vmul.f32 %v5676_v5, %v5676_v5 }
0x1775   :  { %v5684_v4 = vmul.f32 %v5679_v27, %v5679_v27  ;;  %v5691_v59 = vsel %vm63_vm0, %v5683_v31, 0.0 }
0x1776   :  { %v5685_v46 = vsel %vm63_vm0, %v5681_v23, 0.0  ;;  %v5682_v7 = vmul.f32 %v5677_v19, %v5677_v19 }
0x1777   :  { %5686 = vadd.xlane.f32.xlu0 %v5685_v46  ;;  %v5694_v51 = vsel %vm63_vm0, %v5684_v4, 0.0 }
0x1778   :  { %v5688_v32 = vsel %vm63_vm0, %v5682_v7, 0.0 }
0x1779   :  { %5689 = vadd.xlane.f32.xlu1 %v5688_v32 }
0x177b   :  { %5692 = vadd.xlane.f32.xlu0 %v5691_v59 }
0x177d   :  { %5695 = vadd.xlane.f32.xlu1 %v5694_v51 }
0x1804   :  { %v5687_v63 = vpop.xlane.xlu0 %5686 }
0x1805   :  { %v5697_v38 = vmul.f32 0.03125, %v5687_v63 }
0x1806   :  { %v5690_v37 = vpop.xlane.xlu1 %5689 }
0x1807   :  { %v5701_v33 = vadd.f32 1e-06, %v5697_v38  ;;  %v5698_v58 = vmul.f32 0.03125, %v5690_v37 }
0x1808   :  { %v5693_v57 = vpop.xlane.xlu0 %5692 }
0x1809   :  { %7175 = vrsqrt.f32 %v5701_v33  ;;  %v5702_v24 = vadd.f32 1e-06, %v5698_v58  ;;  %v5699_v21 = vmul.f32 0.03125, %v5693_v57 }
0x180a   :  { %v5696_v39 = vpop.xlane.xlu1 %5695 }
0x180b   :  { %7177 = vrsqrt.f32 %v5702_v24  ;;  %v5703_v28 = vadd.f32 1e-06, %v5699_v21  ;;  %v5700_v25 = vmul.f32 0.03125, %v5696_v39 }
0x180d   :  { %7179 = vrsqrt.f32 %v5703_v28  ;;  %v5704_v34 = vadd.f32 1e-06, %v5700_v25 }
0x180f   :  { %7181 = vrsqrt.f32 %v5704_v34 }
0x1813   :  { %v7176_v9 = vpop.eup %7175 }
0x1814   :  { %v5709_v40 = vmul.f32 %v7176_v9, %v5676_v5 }
0x1815   :  { %v7178_v41 = vpop.eup %7177 }
0x1816   :  { %v5719_v42 = vmul.f32 %v5977_v45, %v5709_v40  ;;  %v5710_v36 = vmul.f32 %v7178_v41, %v5677_v19 }
0x1817   :  { %v7180_v43 = vpop.eup %7179 }
0x1818   :  { %5723 = vst.msk [vmem:[#allocation2] sm:$0xff] %vm63_vm0, %v5719_v42  ;;  %v5720_v44 = vmul.f32 %v5977_v45, %v5710_v36  ;;  %v5711_v16 = vmul.f32 %v7180_v43, %v5678_v48 }
0x1819   :  { %v7182_v53 = vpop.eup %7181 }
0x181a   :  { %5724 = vst.msk [vmem:[#allocation2 + $0x8] sm:$0xff] %vm63_vm0, %v5720_v44  ;;  %v5721_v2 = vmul.f32 %v5977_v45, %v5711_v16  ;;  %v5712_v29 = vmul.f32 %v7182_v53, %v5679_v27 }
0x181c   :  { %5725 = vst.msk [vmem:[#allocation2 + $0x10] sm:$0xff] %vm63_vm0, %v5721_v2  ;;  %v5722_v11 = vmul.f32 %v5977_v45, %v5712_v29 }
0x181e   :  { %5726 = vst.msk [vmem:[#allocation2 + $0x18] sm:$0xff] %vm63_vm0, %v5722_v11 }
0x181f   :  { %7206 = shalt.err (!%p7203_p4)
}
0x1820   :  { %s7207_s13 = scalar_lea.hbm %s8764_s12, 512 }
0x1821   :  { %p7208_p5 = scmp.ne.s32.totalorder %s8764_s12, %s7207_s13  ;;  %p7211_p6 = scmp.lt.u32.totalorder %s7207_s13, %s8764_s12 }
0x1823   :  { %p7213_p7 = pnand %p7211_p6, %p7208_p5 }
0x1825   :  { %7216 = shalt.err (!%p7213_p7)
}
0x1826   :  { %s7222_s16 = smov 128   ;;  %s7223_s17 = smov 8  }
0x1827   :  { %5738 = dma.vmem_to_hbm [thread:$0]  %s5733_s28, 512, %s8764_s12, [#allocation3], %s7222_s16, %s7222_s16, %s7223_s17  }
0x1828   :  { %7217 = dma.done.wait [#allocation3], 512  }
0x1829   :  { %7218 = vsyncadd [#allocation3], 4294966784 }
0x182a   :  { %5742 = vsyncpa [#allocation3], 1 }

</bundles_post_ra>
